<compile_context>
chip_gen: v6e
topology: v6e:2x2x1
jax: 0.10.0
libtpu: 0.0.40
codegen_flags: <defaults>
</compile_context>

<pallas_src>
import functools

import jax
import jax.numpy as jnp
from jax import lax
from jax.experimental import pallas as pl
from jax.experimental.pallas import tpu as pltpu


_VMEM_LIMIT = 32 * 1024 * 1024
_CP2 = pltpu.CompilerParams(dimension_semantics=("parallel", "parallel"),
                            vmem_limit_bytes=_VMEM_LIMIT)


def _pick_tile(s, max_tile=512):
    """Pick an S-tile that is a multiple of 128 and divides S (else full S)."""
    if s <= max_tile:
        return s
    for t in range(max_tile, 127, -128):
        if s % t == 0:
            return t
    # TODO(synk): ragged S with no 128-multiple divisor falls back to a single
    # full-S block; pad S upstream for very large odd-sized problems.
    return s


# --------------------------------------------------------------------------
# fc0: (B, 13, S) -> (B, W, S), lane-dense output
# --------------------------------------------------------------------------

def _fc0_kernel(x_ref, w_ref, b_ref, o_ref):
    # x (K, TS), w (W, K), b (W, 1) -> o (W, TS)
    o_ref[...] = (jnp.dot(w_ref[...], x_ref[...],
                          preferred_element_type=jnp.float32) + b_ref[...])


def fc0_apply(xt, w0t, b0, ts):
    B, K, S = xt.shape
    W = w0t.shape[0]
    T = S // ts
    return pl.pallas_call(
        _fc0_kernel,
        out_shape=jax.ShapeDtypeStruct((B, W, S), jnp.float32),
        grid=(B, T),
        in_specs=[pl.BlockSpec((None, K, ts), lambda b, t: (b, 0, t)),
                  pl.BlockSpec((W, K), lambda b, t: (0, 0)),
                  pl.BlockSpec((W, 1), lambda b, t: (0, 0))],
        out_specs=pl.BlockSpec((None, W, ts), lambda b, t: (b, 0, t)),
        compiler_params=_CP2,
    )(xt, w0t, b0)


# --------------------------------------------------------------------------
# Fused: 1x1 pointwise mix + residual add + BN partial statistics (pass A)
# --------------------------------------------------------------------------

def _pw_add_stats_kernel(h_ref, x1_ref, w_ref, b_ref, s_ref, st_ref):
    # h (W, TS), x1 (W, TS), w (W, W) [out,in], b (W, 1)
    s = (x1_ref[...]
         + jnp.dot(w_ref[...], h_ref[...], preferred_element_type=jnp.float32)
         + b_ref[...])
    s_ref[...] = s
    # per-channel partial sums for BatchNorm (reduced over the lane axis)
    st_ref[:, 0:1] = jnp.sum(s, axis=1, keepdims=True)
    st_ref[:, 1:2] = jnp.sum(s * s, axis=1, keepdims=True)


def pw_add_stats(h, x1, pw_w, pw_b, ts):
    B, W, S = h.shape
    T = S // ts
    return pl.pallas_call(
        _pw_add_stats_kernel,
        out_shape=(jax.ShapeDtypeStruct((B, W, S), jnp.float32),
                   jax.ShapeDtypeStruct((B, T, W, 2), jnp.float32)),
        grid=(B, T),
        in_specs=[pl.BlockSpec((None, W, ts), lambda b, t: (b, 0, t)),
                  pl.BlockSpec((None, W, ts), lambda b, t: (b, 0, t)),
                  pl.BlockSpec((W, W), lambda b, t: (0, 0)),
                  pl.BlockSpec((W, 1), lambda b, t: (0, 0))],
        out_specs=(pl.BlockSpec((None, W, ts), lambda b, t: (b, 0, t)),
                   pl.BlockSpec((None, None, W, 2), lambda b, t: (b, t, 0, 0))),
        compiler_params=_CP2,
    )(h, x1, pw_w, pw_b)


# --------------------------------------------------------------------------
# BN normalize (+ReLU) (pass B) — tiled, scale/offset precomputed in XLA
# --------------------------------------------------------------------------

def _bn_relu_kernel(s_ref, sc_ref, off_ref, o_ref, *, apply_relu):
    y = s_ref[...] * sc_ref[...] + off_ref[...]
    if apply_relu:
        y = jnp.maximum(y, 0.0)
    o_ref[...] = y


def bn_relu_apply(s, scale, offset, ts, apply_relu):
    B, W, S = s.shape
    T = S // ts
    return pl.pallas_call(
        functools.partial(_bn_relu_kernel, apply_relu=apply_relu),
        out_shape=jax.ShapeDtypeStruct((B, W, S), jnp.float32),
        grid=(B, T),
        in_specs=[pl.BlockSpec((None, W, ts), lambda b, t: (b, 0, t)),
                  pl.BlockSpec((W, 1), lambda b, t: (0, 0)),
                  pl.BlockSpec((W, 1), lambda b, t: (0, 0))],
        out_specs=pl.BlockSpec((None, W, ts), lambda b, t: (b, 0, t)),
        compiler_params=_CP2,
    )(s, scale, offset)


# --------------------------------------------------------------------------
# Fused tail: bn3 (no ReLU) + fc1 + ReLU + fc2 — (M, 128) never hits HBM
# --------------------------------------------------------------------------

def _bn_fc1_fc2_kernel(s_ref, sc_ref, off_ref, w1_ref, b1_ref, w2_ref, b2_ref,
                       o_ref):
    y = s_ref[...] * sc_ref[...] + off_ref[...]                       # (W, TS)
    h1 = jnp.dot(w1_ref[...], y, preferred_element_type=jnp.float32)  # (128, TS)
    h1 = jnp.maximum(h1 + b1_ref[...], 0.0)
    o = jnp.dot(w2_ref[...], h1, preferred_element_type=jnp.float32)  # (1, TS)
    o_ref[...] = o + b2_ref[...]


def bn_fc1_fc2_apply(s, scale, offset, w1t, b1, w2t, b2, ts):
    B, W, S = s.shape
    H = w1t.shape[0]
    T = S // ts
    return pl.pallas_call(
        _bn_fc1_fc2_kernel,
        out_shape=jax.ShapeDtypeStruct((B, 1, S), jnp.float32),
        grid=(B, T),
        in_specs=[pl.BlockSpec((None, W, ts), lambda b, t: (b, 0, t)),
                  pl.BlockSpec((W, 1), lambda b, t: (0, 0)),
                  pl.BlockSpec((W, 1), lambda b, t: (0, 0)),
                  pl.BlockSpec((H, W), lambda b, t: (0, 0)),
                  pl.BlockSpec((H, 1), lambda b, t: (0, 0)),
                  pl.BlockSpec((1, H), lambda b, t: (0, 0)),
                  pl.BlockSpec((1, 1), lambda b, t: (0, 0))],
        out_specs=pl.BlockSpec((None, 1, ts), lambda b, t: (b, 0, t)),
        compiler_params=_CP2,
    )(s, scale, offset, w1t, b1, w2t, b2)


# --------------------------------------------------------------------------
# Spectral mode mixing: all 4 corners in one pallas_call, grid = (4, B)
# --------------------------------------------------------------------------

def _cmul_kernel(ar_ref, ai_ref, wr_ref, wi_ref, or_ref, oi_ref):
    # ar/ai (Ci, Mp), wr/wi (Ci, Co, Mp) -> out (Co, Mp)
    # Accumulate over input channels: live data stays O(Co * Mp).
    ci = ar_ref.shape[0]
    co, mp = or_ref.shape
    ar = ar_ref[...]
    ai = ai_ref[...]
    accr = jnp.zeros((co, mp), jnp.float32)
    acci = jnp.zeros((co, mp), jnp.float32)
    for i in range(ci):          # Ci is small & static -> fully unrolled
        a_r = ar[i:i + 1, :]     # (1, Mp), sublane-broadcast over Co
        a_i = ai[i:i + 1, :]
        w_r = wr_ref[i]          # (Co, Mp)
        w_i = wi_ref[i]
        accr = accr + a_r * w_r - a_i * w_i
        acci = acci + a_r * w_i + a_i * w_r
    or_ref[...] = accr
    oi_ref[...] = acci


def compl_mul_batched(ar, ai, wr, wi):
    """ar/ai: (4, B, Ci, Mp); wr/wi: (4, Ci, Co, Mp) -> two (4, B, Co, Mp)."""
    NC, B, Ci, Mp = ar.shape
    Co = wr.shape[2]
    return pl.pallas_call(
        _cmul_kernel,
        out_shape=(jax.ShapeDtypeStruct((NC, B, Co, Mp), jnp.float32),
                   jax.ShapeDtypeStruct((NC, B, Co, Mp), jnp.float32)),
        grid=(NC, B),
        in_specs=[pl.BlockSpec((None, None, Ci, Mp), lambda c, b: (c, b, 0, 0)),
                  pl.BlockSpec((None, None, Ci, Mp), lambda c, b: (c, b, 0, 0)),
                  pl.BlockSpec((None, Ci, Co, Mp), lambda c, b: (c, 0, 0, 0)),
                  pl.BlockSpec((None, Ci, Co, Mp), lambda c, b: (c, 0, 0, 0))],
        out_specs=(pl.BlockSpec((None, None, Co, Mp), lambda c, b: (c, b, 0, 0)),
                   pl.BlockSpec((None, None, Co, Mp), lambda c, b: (c, b, 0, 0))),
        compiler_params=_CP2,
    )(ar, ai, wr, wi)


def spectral_conv3d(h, wr, wi, dims, m1, m2, m3):
    """h: (B, W, S) channels-first; wr/wi: (4, Ci, Co, Mpad). -> (B, W, S)."""
    B, X, Y, Z = dims
    W = h.shape[1]
    S = X * Y * Z
    Zf = Z // 2 + 1
    Mm = m1 * m2 * m3
    Mp = wr.shape[-1]

    h5 = h.reshape(B, W, X, Y, Z)
    # torch.rfft(x, 3, normalized=True, onesided=True)
    x_ft = jnp.fft.rfftn(h5, axes=(2, 3, 4), norm="ortho")   # (B, W, X, Y, Zf)

    corners = jnp.stack([
        x_ft[:, :, :m1, :m2, :m3],          # weights1
        x_ft[:, :, X - m1:, :m2, :m3],      # weights2
        x_ft[:, :, :m1, Y - m2:, :m3],      # weights3
        x_ft[:, :, X - m1:, Y - m2:, :m3],  # weights4
    ], axis=0).reshape(4, B, W, Mm)
    ar = jnp.real(corners).astype(jnp.float32)
    ai = jnp.imag(corners).astype(jnp.float32)
    if Mp > Mm:
        pad = [(0, 0)] * 3 + [(0, Mp - Mm)]
        ar = jnp.pad(ar, pad)
        ai = jnp.pad(ai, pad)

    or_, oi_ = compl_mul_batched(ar, ai, wr, wi)              # (4, B, W, Mp)
    o = lax.complex(or_[..., :Mm], oi_[..., :Mm]).reshape(4, B, W, m1, m2, m3)

    # Assemble out_ft by concatenation/padding (no full-tensor zeros + scatters).
    # Requires X >= 2*m1 and Y >= 2*m2 (true for the FNO configurations used).
    c64 = jnp.complex64
    zy = jnp.zeros((B, W, m1, Y - 2 * m2, m3), c64)
    top = jnp.concatenate([o[0], zy, o[2]], axis=3)           # x in [0, m1)
    bot = jnp.concatenate([o[1], zy, o[3]], axis=3)           # x in [X-m1, X)
    zx = jnp.zeros((B, W, X - 2 * m1, Y, m3), c64)
    fx = jnp.concatenate([top, zx, bot], axis=2)              # (B, W, X, Y, m3)
    out_ft = jnp.concatenate(
        [fx, jnp.zeros((B, W, X, Y, Zf - m3), c64)], axis=4)  # (B, W, X, Y, Zf)

    # torch.irfft(out_ft, 3, normalized=True, onesided=True, signal_sizes=(X,Y,Z))
    y = jnp.fft.irfftn(out_ft, s=(X, Y, Z), axes=(2, 3, 4), norm="ortho")
    return y.astype(jnp.float32).reshape(B, W, S)


# --------------------------------------------------------------------------
# Net2d forward (SimpleBlock2d + final squeeze)
# --------------------------------------------------------------------------

def net2d_forward(params, x, *, modes):
    """x: (B, X, Y, Z, 13) float32 -> (B, X, Y, Z) float32."""
    B, X, Y, Z, K = x.shape
    W = params["fc0_wt"].shape[0]
    m1, m2, m3 = modes
    S = X * Y * Z
    TS = _pick_tile(S)
    eps = 1e-5
    count = float(B * S)

    # channels-first, spatially flattened layout: (B, C, S) with S on lanes
    xt = jnp.transpose(x.reshape(B, S, K), (0, 2, 1))          # (B, 13, S)
    h = fc0_apply(xt, params["fc0_wt"], params["fc0_b"], TS)   # (B, W, S)

    out = None
    for l in range(4):
        x1 = spectral_conv3d(h, params["spec_wr"][l], params["spec_wi"][l],
                             (B, X, Y, Z), m1, m2, m3)         # (B, W, S)
        s, pstats = pw_add_stats(h, x1, params["pw_w"][l], params["pw_b"][l], TS)

        # tiny XLA reduction of the per-tile BN statistics
        tot = jnp.sum(pstats, axis=(0, 1))                     # (W, 2)
        mean = tot[:, 0] / count
        var = jnp.maximum(tot[:, 1] / count - mean * mean, 0.0)
        scale = lax.rsqrt(var + eps)
        offset = -mean * scale
        scale = scale.reshape(W, 1)
        offset = offset.reshape(W, 1)

        if l < 3:
            h = bn_relu_apply(s, scale, offset, TS, apply_relu=True)
        else:
            # bn3 (no ReLU) + fc1 + ReLU + fc2 fused
            out = bn_fc1_fc2_apply(s, scale, offset,
                                   params["fc1_wt"], params["fc1_b"],
                                   params["fc2_wt"], params["fc2_b"], TS)
    return out.reshape(B, X, Y, Z)   # .squeeze() of the trailing size-1 dim


# --------------------------------------------------------------------------
# Deterministic parameter init (shapes follow the PyTorch __init__, stored
# transposed / padded for the channels-first Pallas layout)
# --------------------------------------------------------------------------

def init_params(key, modes, width):
    m1, m2, m3 = modes
    Mm = m1 * m2 * m3
    Mp = ((Mm + 127) // 128) * 128
    kit = iter(jax.random.split(key, 64))

    def lin_init_t(fan_in, fan_out):
        # stored as torch-style (out, in) plus (out, 1) bias
        bound = 1.0 / (fan_in ** 0.5)
        w = jax.random.uniform(next(kit), (fan_out, fan_in), jnp.float32, -bound, bound)
        b = jax.random.uniform(next(kit), (fan_out, 1), jnp.float32, -bound, bound)
        return w, b

    scale = 1.0 / (width * width)
    spec_wr, spec_wi = [], []
    for _ in range(4):            # conv0..conv3
        wrs, wis = [], []
        for _ in range(4):        # weights1..weights4
            wrs.append(scale * jax.random.uniform(next(kit), (width, width, Mm), jnp.float32))
            wis.append(scale * jax.random.uniform(next(kit), (width, width, Mm), jnp.float32))
        pad = [(0, 0), (0, 0), (0, 0), (0, Mp - Mm)]
        spec_wr.append(jnp.pad(jnp.stack(wrs, axis=0), pad))   # (4, Ci, Co, Mp)
        spec_wi.append(jnp.pad(jnp.stack(wis, axis=0), pad))

    fc0_wt, fc0_b = lin_init_t(13, width)
    pw = [lin_init_t(width, width) for _ in range(4)]   # Conv1d(W, W, 1) -> (out, in)
    fc1_wt, fc1_b = lin_init_t(width, 128)
    fc2_wt, fc2_b = lin_init_t(128, 1)

    return dict(fc0_wt=fc0_wt, fc0_b=fc0_b,
                spec_wr=spec_wr, spec_wi=spec_wi,
                pw_w=[p[0] for p in pw], pw_b=[p[1] for p in pw],
                fc1_wt=fc1_wt, fc1_b=fc1_b,
                fc2_wt=fc2_wt, fc2_b=fc2_b)


if __name__ == "__main__":
    key = jax.random.PRNGKey(0)
    pkey, xkey = jax.random.split(key)

    modes = (4, 4, 6)            # Net2d(modes, width) -> SimpleBlock2d(modes, modes, 6, width)
    width = 8
    B, X, Y, Z = 2, 8, 8, 12     # Z//2+1 = 7 >= modes3 = 6 ; X >= 2*m1, Y >= 2*m2

    params = init_params(pkey, modes, width)
    x = jax.random.normal(xkey, (B, X, Y, Z, 13), dtype=jnp.float32)

    fwd = jax.jit(functools.partial(net2d_forward, modes=modes))
    out = jax.block_until_ready(fwd(params, x))

    assert out.shape == (B, X, Y, Z), out.shape
    assert bool(jnp.all(jnp.isfinite(out)))
    print("KERNEL_OK")
</pallas_src>

<mosaic_0001>
module attributes {stable_mosaic.version = 11 : i64} {
  func.func @_fc0_kernel(%arg0: i32, %arg1: i32, %arg2: memref<1x13x384xf32, #tpu.memory_space<vmem>>, %arg3: memref<8x13xf32, #tpu.memory_space<vmem>>, %arg4: memref<8x1xf32, #tpu.memory_space<vmem>>, %arg5: memref<1x8x384xf32, #tpu.memory_space<vmem>>) attributes {dimension_semantics = [#tpu.dimension_semantics<parallel>, #tpu.dimension_semantics<parallel>], iteration_bounds = array<i64: 2, 2>, scalar_prefetch = 0 : i64, scratch_operands = 0 : i64, tpu.core_type = #tpu.core_type<tc>, window_params = [{transform_indices = @transform_0, window_bounds = array<i64: 1, 13, 384>}, {pipeline_mode = #tpu.pipeline_mode<synchronous>, transform_indices = @transform_1, window_bounds = array<i64: 8, 13>}, {pipeline_mode = #tpu.pipeline_mode<synchronous>, transform_indices = @transform_2, window_bounds = array<i64: 8, 1>}, {transform_indices = @transform_3, window_bounds = array<i64: 1, 8, 384>}]} {
    %c0 = arith.constant 0 : index
    %c0_0 = arith.constant 0 : index
    %0 = vector.load %arg3[%c0, %c0_0] : memref<8x13xf32, #tpu.memory_space<vmem>>, vector<8x13xf32>
    %c0_1 = arith.constant 0 : index
    %c0_2 = arith.constant 0 : index
    %c0_3 = arith.constant 0 : index
    %1 = vector.load %arg2[%c0_1, %c0_2, %c0_3] : memref<1x13x384xf32, #tpu.memory_space<vmem>>, vector<1x13x384xf32>
    %2 = vector.shape_cast %1 : vector<1x13x384xf32> to vector<13x384xf32>
    %cst = arith.constant dense<0.000000e+00> : vector<8x384xf32>
    %3 = tpu.matmul %0, %2, %cst {dimension_numbers = #tpu.dot_dimension_numbers<[1], [0], [0], [1], [0, 0, 1, 1], [], []>} : vector<8x13xf32>, vector<13x384xf32>, vector<8x384xf32> -> vector<8x384xf32>
    %c0_4 = arith.constant 0 : index
    %c0_5 = arith.constant 0 : index
    %4 = vector.load %arg4[%c0_4, %c0_5] : memref<8x1xf32, #tpu.memory_space<vmem>>, vector<8x1xf32>
    %5 = vector.broadcast %4 : vector<8x1xf32> to vector<8x384xf32>
    %6 = arith.addf %3, %5 : vector<8x384xf32>
    %c0_6 = arith.constant 0 : index
    %c0_7 = arith.constant 0 : index
    %c0_8 = arith.constant 0 : index
    %7 = vector.load %arg5[%c0_6, %c0_7, %c0_8] : memref<1x8x384xf32, #tpu.memory_space<vmem>>, vector<1x8x384xf32>
    %8 = vector.shape_cast %7 : vector<1x8x384xf32> to vector<8x384xf32>
    %9 = vector.shape_cast %6 : vector<8x384xf32> to vector<1x8x384xf32>
    tpu.vector_store %arg5[%c0_6, %c0_7, %c0_8], %9 {strides = array<i32>} : memref<1x8x384xf32, #tpu.memory_space<vmem>>, vector<1x8x384xf32>,
    return
  }
  func.func @transform_0(%arg0: i32, %arg1: i32) -> (i32, i32, i32) {
    %c0_i32 = arith.constant 0 : i32
    %c0_i32_0 = arith.constant 0 : i32
    return %arg0, %c0_i32, %arg1 : i32, i32, i32
  }
  func.func @transform_1(%arg0: i32, %arg1: i32) -> (i32, i32) {
    %c0_i32 = arith.constant 0 : i32
    %c0_i32_0 = arith.constant 0 : i32
    %c0_i32_1 = arith.constant 0 : i32
    return %c0_i32, %c0_i32_0 : i32, i32
  }
  func.func @transform_2(%arg0: i32, %arg1: i32) -> (i32, i32) {
    %c0_i32 = arith.constant 0 : i32
    %c0_i32_0 = arith.constant 0 : i32
    %c0_i32_1 = arith.constant 0 : i32
    return %c0_i32, %c0_i32_0 : i32, i32
  }
  func.func @transform_3(%arg0: i32, %arg1: i32) -> (i32, i32, i32) {
    %c0_i32 = arith.constant 0 : i32
    %c0_i32_0 = arith.constant 0 : i32
    return %arg0, %c0_i32, %arg1 : i32, i32, i32
  }
}

module attributes {stable_mosaic.version = 11 : i64} {
  func.func @_cmul_kernel(%arg0: i32, %arg1: i32, %arg2: memref<1x1x8x128xf32, #tpu.memory_space<vmem>>, %arg3: memref<1x1x8x128xf32, #tpu.memory_space<vmem>>, %arg4: memref<1x8x8x128xf32, #tpu.memory_space<vmem>>, %arg5: memref<1x8x8x128xf32, #tpu.memory_space<vmem>>, %arg6: memref<1x1x8x128xf32, #tpu.memory_space<vmem>>, %arg7: memref<1x1x8x128xf32, #tpu.memory_space<vmem>>) attributes {dimension_semantics = [#tpu.dimension_semantics<parallel>, #tpu.dimension_semantics<parallel>], iteration_bounds = array<i64: 4, 2>, scalar_prefetch = 0 : i64, scratch_operands = 0 : i64, tpu.core_type = #tpu.core_type<tc>, window_params = [{transform_indices = @transform_0, window_bounds = array<i64: 1, 1, 8, 128>}, {transform_indices = @transform_1, window_bounds = array<i64: 1, 1, 8, 128>}, {transform_indices = @transform_2, window_bounds = array<i64: 1, 8, 8, 128>}, {transform_indices = @transform_3, window_bounds = array<i64: 1, 8, 8, 128>}, {transform_indices = @transform_4, window_bounds = array<i64: 1, 1, 8, 128>}, {transform_indices = @transform_5, window_bounds = array<i64: 1, 1, 8, 128>}]} {
    %c0 = arith.constant 0 : index
    %c0_0 = arith.constant 0 : index
    %c0_1 = arith.constant 0 : index
    %c0_2 = arith.constant 0 : index
    %0 = vector.load %arg2[%c0, %c0_0, %c0_1, %c0_2] : memref<1x1x8x128xf32, #tpu.memory_space<vmem>>, vector<1x1x8x128xf32>
    %1 = vector.shape_cast %0 : vector<1x1x8x128xf32> to vector<8x128xf32>
    %c0_3 = arith.constant 0 : index
    %c0_4 = arith.constant 0 : index
    %c0_5 = arith.constant 0 : index
    %c0_6 = arith.constant 0 : index
    %2 = vector.load %arg3[%c0_3, %c0_4, %c0_5, %c0_6] : memref<1x1x8x128xf32, #tpu.memory_space<vmem>>, vector<1x1x8x128xf32>
    %3 = vector.shape_cast %2 : vector<1x1x8x128xf32> to vector<8x128xf32>
    %cst = arith.constant 0.000000e+00 : f32
    %4 = vector.broadcast %cst : f32 to vector<8x128xf32>
    %cst_7 = arith.constant 0.000000e+00 : f32
    %5 = vector.broadcast %cst_7 : f32 to vector<8x128xf32>
    %6 = vector.extract_strided_slice %1 {offsets = [0, 0], sizes = [1, 128], strides = [1, 1]} : vector<8x128xf32> to vector<1x128xf32>
    %7 = vector.extract_strided_slice %3 {offsets = [0, 0], sizes = [1, 128], strides = [1, 1]} : vector<8x128xf32> to vector<1x128xf32>
    %c0_8 = arith.constant 0 : index
    %c0_9 = arith.constant 0 : index
    %c0_10 = arith.constant 0 : index
    %c0_11 = arith.constant 0 : index
    %8 = vector.load %arg4[%c0_8, %c0_9, %c0_10, %c0_11] : memref<1x8x8x128xf32, #tpu.memory_space<vmem>>, vector<1x1x8x128xf32>
    %9 = vector.shape_cast %8 : vector<1x1x8x128xf32> to vector<8x128xf32>
    %c0_12 = arith.constant 0 : index
    %c0_13 = arith.constant 0 : index
    %c0_14 = arith.constant 0 : index
    %c0_15 = arith.constant 0 : index
    %10 = vector.load %arg5[%c0_12, %c0_13, %c0_14, %c0_15] : memref<1x8x8x128xf32, #tpu.memory_space<vmem>>, vector<1x1x8x128xf32>
    %11 = vector.shape_cast %10 : vector<1x1x8x128xf32> to vector<8x128xf32>
    %12 = vector.broadcast %6 : vector<1x128xf32> to vector<8x128xf32>
    %13 = arith.mulf %12, %9 : vector<8x128xf32>
    %14 = arith.addf %4, %13 : vector<8x128xf32>
    %15 = vector.broadcast %7 : vector<1x128xf32> to vector<8x128xf32>
    %16 = arith.mulf %15, %11 : vector<8x128xf32>
    %17 = arith.subf %14, %16 : vector<8x128xf32>
    %18 = vector.broadcast %6 : vector<1x128xf32> to vector<8x128xf32>
    %19 = arith.mulf %18, %11 : vector<8x128xf32>
    %20 = arith.addf %5, %19 : vector<8x128xf32>
    %21 = vector.broadcast %7 : vector<1x128xf32> to vector<8x128xf32>
    %22 = arith.mulf %21, %9 : vector<8x128xf32>
    %23 = arith.addf %20, %22 : vector<8x128xf32>
    %24 = vector.extract_strided_slice %1 {offsets = [1, 0], sizes = [1, 128], strides = [1, 1]} : vector<8x128xf32> to vector<1x128xf32>
    %25 = vector.extract_strided_slice %3 {offsets = [1, 0], sizes = [1, 128], strides = [1, 1]} : vector<8x128xf32> to vector<1x128xf32>
    %c0_16 = arith.constant 0 : index
    %c1 = arith.constant 1 : index
    %c0_17 = arith.constant 0 : index
    %c0_18 = arith.constant 0 : index
    %26 = vector.load %arg4[%c0_16, %c1, %c0_17, %c0_18] : memref<1x8x8x128xf32, #tpu.memory_space<vmem>>, vector<1x1x8x128xf32>
    %27 = vector.shape_cast %26 : vector<1x1x8x128xf32> to vector<8x128xf32>
    %c0_19 = arith.constant 0 : index
    %c1_20 = arith.constant 1 : index
    %c0_21 = arith.constant 0 : index
    %c0_22 = arith.constant 0 : index
    %28 = vector.load %arg5[%c0_19, %c1_20, %c0_21, %c0_22] : memref<1x8x8x128xf32, #tpu.memory_space<vmem>>, vector<1x1x8x128xf32>
    %29 = vector.shape_cast %28 : vector<1x1x8x128xf32> to vector<8x128xf32>
    %30 = vector.broadcast %24 : vector<1x128xf32> to vector<8x128xf32>
    %31 = arith.mulf %30, %27 : vector<8x128xf32>
    %32 = arith.addf %17, %31 : vector<8x128xf32>
    %33 = vector.broadcast %25 : vector<1x128xf32> to vector<8x128xf32>
    %34 = arith.mulf %33, %29 : vector<8x128xf32>
    %35 = arith.subf %32, %34 : vector<8x128xf32>
    %36 = vector.broadcast %24 : vector<1x128xf32> to vector<8x128xf32>
    %37 = arith.mulf %36, %29 : vector<8x128xf32>
    %38 = arith.addf %23, %37 : vector<8x128xf32>
    %39 = vector.broadcast %25 : vector<1x128xf32> to vector<8x128xf32>
    %40 = arith.mulf %39, %27 : vector<8x128xf32>
    %41 = arith.addf %38, %40 : vector<8x128xf32>
    %42 = vector.extract_strided_slice %1 {offsets = [2, 0], sizes = [1, 128], strides = [1, 1]} : vector<8x128xf32> to vector<1x128xf32>
    %43 = vector.extract_strided_slice %3 {offsets = [2, 0], sizes = [1, 128], strides = [1, 1]} : vector<8x128xf32> to vector<1x128xf32>
    %c0_23 = arith.constant 0 : index
    %c2 = arith.constant 2 : index
    %c0_24 = arith.constant 0 : index
    %c0_25 = arith.constant 0 : index
    %44 = vector.load %arg4[%c0_23, %c2, %c0_24, %c0_25] : memref<1x8x8x128xf32, #tpu.memory_space<vmem>>, vector<1x1x8x128xf32>
    %45 = vector.shape_cast %44 : vector<1x1x8x128xf32> to vector<8x128xf32>
    %c0_26 = arith.constant 0 : index
    %c2_27 = arith.constant 2 : index
    %c0_28 = arith.constant 0 : index
    %c0_29 = arith.constant 0 : index
    %46 = vector.load %arg5[%c0_26, %c2_27, %c0_28, %c0_29] : memref<1x8x8x128xf32, #tpu.memory_space<vmem>>, vector<1x1x8x128xf32>
    %47 = vector.shape_cast %46 : vector<1x1x8x128xf32> to vector<8x128xf32>
    %48 = vector.broadcast %42 : vector<1x128xf32> to vector<8x128xf32>
    %49 = arith.mulf %48, %45 : vector<8x128xf32>
    %50 = arith.addf %35, %49 : vector<8x128xf32>
    %51 = vector.broadcast %43 : vector<1x128xf32> to vector<8x128xf32>
    %52 = arith.mulf %51, %47 : vector<8x128xf32>
    %53 = arith.subf %50, %52 : vector<8x128xf32>
    %54 = vector.broadcast %42 : vector<1x128xf32> to vector<8x128xf32>
    %55 = arith.mulf %54, %47 : vector<8x128xf32>
    %56 = arith.addf %41, %55 : vector<8x128xf32>
    %57 = vector.broadcast %43 : vector<1x128xf32> to vector<8x128xf32>
    %58 = arith.mulf %57, %45 : vector<8x128xf32>
    %59 = arith.addf %56, %58 : vector<8x128xf32>
    %60 = vector.extract_strided_slice %1 {offsets = [3, 0], sizes = [1, 128], strides = [1, 1]} : vector<8x128xf32> to vector<1x128xf32>
    %61 = vector.extract_strided_slice %3 {offsets = [3, 0], sizes = [1, 128], strides = [1, 1]} : vector<8x128xf32> to vector<1x128xf32>
    %c0_30 = arith.constant 0 : index
    %c3 = arith.constant 3 : index
    %c0_31 = arith.constant 0 : index
    %c0_32 = arith.constant 0 : index
    %62 = vector.load %arg4[%c0_30, %c3, %c0_31, %c0_32] : memref<1x8x8x128xf32, #tpu.memory_space<vmem>>, vector<1x1x8x128xf32>
    %63 = vector.shape_cast %62 : vector<1x1x8x128xf32> to vector<8x128xf32>
    %c0_33 = arith.constant 0 : index
    %c3_34 = arith.constant 3 : index
    %c0_35 = arith.constant 0 : index
    %c0_36 = arith.constant 0 : index
    %64 = vector.load %arg5[%c0_33, %c3_34, %c0_35, %c0_36] : memref<1x8x8x128xf32, #tpu.memory_space<vmem>>, vector<1x1x8x128xf32>
    %65 = vector.shape_cast %64 : vector<1x1x8x128xf32> to vector<8x128xf32>
    %66 = vector.broadcast %60 : vector<1x128xf32> to vector<8x128xf32>
    %67 = arith.mulf %66, %63 : vector<8x128xf32>
    %68 = arith.addf %53, %67 : vector<8x128xf32>
    %69 = vector.broadcast %61 : vector<1x128xf32> to vector<8x128xf32>
    %70 = arith.mulf %69, %65 : vector<8x128xf32>
    %71 = arith.subf %68, %70 : vector<8x128xf32>
    %72 = vector.broadcast %60 : vector<1x128xf32> to vector<8x128xf32>
    %73 = arith.mulf %72, %65 : vector<8x128xf32>
    %74 = arith.addf %59, %73 : vector<8x128xf32>
    %75 = vector.broadcast %61 : vector<1x128xf32> to vector<8x128xf32>
    %76 = arith.mulf %75, %63 : vector<8x128xf32>
    %77 = arith.addf %74, %76 : vector<8x128xf32>
    %78 = vector.extract_strided_slice %1 {offsets = [4, 0], sizes = [1, 128], strides = [1, 1]} : vector<8x128xf32> to vector<1x128xf32>
    %79 = vector.extract_strided_slice %3 {offsets = [4, 0], sizes = [1, 128], strides = [1, 1]} : vector<8x128xf32> to vector<1x128xf32>
    %c0_37 = arith.constant 0 : index
    %c4 = arith.constant 4 : index
    %c0_38 = arith.constant 0 : index
    %c0_39 = arith.constant 0 : index
    %80 = vector.load %arg4[%c0_37, %c4, %c0_38, %c0_39] : memref<1x8x8x128xf32, #tpu.memory_space<vmem>>, vector<1x1x8x128xf32>
    %81 = vector.shape_cast %80 : vector<1x1x8x128xf32> to vector<8x128xf32>
    %c0_40 = arith.constant 0 : index
    %c4_41 = arith.constant 4 : index
    %c0_42 = arith.constant 0 : index
    %c0_43 = arith.constant 0 : index
    %82 = vector.load %arg5[%c0_40, %c4_41, %c0_42, %c0_43] : memref<1x8x8x128xf32, #tpu.memory_space<vmem>>, vector<1x1x8x128xf32>
    %83 = vector.shape_cast %82 : vector<1x1x8x128xf32> to vector<8x128xf32>
    %84 = vector.broadcast %78 : vector<1x128xf32> to vector<8x128xf32>
    %85 = arith.mulf %84, %81 : vector<8x128xf32>
    %86 = arith.addf %71, %85 : vector<8x128xf32>
    %87 = vector.broadcast %79 : vector<1x128xf32> to vector<8x128xf32>
    %88 = arith.mulf %87, %83 : vector<8x128xf32>
    %89 = arith.subf %86, %88 : vector<8x128xf32>
    %90 = vector.broadcast %78 : vector<1x128xf32> to vector<8x128xf32>
    %91 = arith.mulf %90, %83 : vector<8x128xf32>
    %92 = arith.addf %77, %91 : vector<8x128xf32>
    %93 = vector.broadcast %79 : vector<1x128xf32> to vector<8x128xf32>
    %94 = arith.mulf %93, %81 : vector<8x128xf32>
    %95 = arith.addf %92, %94 : vector<8x128xf32>
    %96 = vector.extract_strided_slice %1 {offsets = [5, 0], sizes = [1, 128], strides = [1, 1]} : vector<8x128xf32> to vector<1x128xf32>
    %97 = vector.extract_strided_slice %3 {offsets = [5, 0], sizes = [1, 128], strides = [1, 1]} : vector<8x128xf32> to vector<1x128xf32>
    %c0_44 = arith.constant 0 : index
    %c5 = arith.constant 5 : index
    %c0_45 = arith.constant 0 : index
    %c0_46 = arith.constant 0 : index
    %98 = vector.load %arg4[%c0_44, %c5, %c0_45, %c0_46] : memref<1x8x8x128xf32, #tpu.memory_space<vmem>>, vector<1x1x8x128xf32>
    %99 = vector.shape_cast %98 : vector<1x1x8x128xf32> to vector<8x128xf32>
    %c0_47 = arith.constant 0 : index
    %c5_48 = arith.constant 5 : index
    %c0_49 = arith.constant 0 : index
    %c0_50 = arith.constant 0 : index
    %100 = vector.load %arg5[%c0_47, %c5_48, %c0_49, %c0_50] : memref<1x8x8x128xf32, #tpu.memory_space<vmem>>, vector<1x1x8x128xf32>
    %101 = vector.shape_cast %100 : vector<1x1x8x128xf32> to vector<8x128xf32>
    %102 = vector.broadcast %96 : vector<1x128xf32> to vector<8x128xf32>
    %103 = arith.mulf %102, %99 : vector<8x128xf32>
    %104 = arith.addf %89, %103 : vector<8x128xf32>
    %105 = vector.broadcast %97 : vector<1x128xf32> to vector<8x128xf32>
    %106 = arith.mulf %105, %101 : vector<8x128xf32>
    %107 = arith.subf %104, %106 : vector<8x128xf32>
    %108 = vector.broadcast %96 : vector<1x128xf32> to vector<8x128xf32>
    %109 = arith.mulf %108, %101 : vector<8x128xf32>
    %110 = arith.addf %95, %109 : vector<8x128xf32>
    %111 = vector.broadcast %97 : vector<1x128xf32> to vector<8x128xf32>
    %112 = arith.mulf %111, %99 : vector<8x128xf32>
    %113 = arith.addf %110, %112 : vector<8x128xf32>
    %114 = vector.extract_strided_slice %1 {offsets = [6, 0], sizes = [1, 128], strides = [1, 1]} : vector<8x128xf32> to vector<1x128xf32>
    %115 = vector.extract_strided_slice %3 {offsets = [6, 0], sizes = [1, 128], strides = [1, 1]} : vector<8x128xf32> to vector<1x128xf32>
    %c0_51 = arith.constant 0 : index
    %c6 = arith.constant 6 : index
    %c0_52 = arith.constant 0 : index
    %c0_53 = arith.constant 0 : index
    %116 = vector.load %arg4[%c0_51, %c6, %c0_52, %c0_53] : memref<1x8x8x128xf32, #tpu.memory_space<vmem>>, vector<1x1x8x128xf32>
    %117 = vector.shape_cast %116 : vector<1x1x8x128xf32> to vector<8x128xf32>
    %c0_54 = arith.constant 0 : index
    %c6_55 = arith.constant 6 : index
    %c0_56 = arith.constant 0 : index
    %c0_57 = arith.constant 0 : index
    %118 = vector.load %arg5[%c0_54, %c6_55, %c0_56, %c0_57] : memref<1x8x8x128xf32, #tpu.memory_space<vmem>>, vector<1x1x8x128xf32>
    %119 = vector.shape_cast %118 : vector<1x1x8x128xf32> to vector<8x128xf32>
    %120 = vector.broadcast %114 : vector<1x128xf32> to vector<8x128xf32>
    %121 = arith.mulf %120, %117 : vector<8x128xf32>
    %122 = arith.addf %107, %121 : vector<8x128xf32>
    %123 = vector.broadcast %115 : vector<1x128xf32> to vector<8x128xf32>
    %124 = arith.mulf %123, %119 : vector<8x128xf32>
    %125 = arith.subf %122, %124 : vector<8x128xf32>
    %126 = vector.broadcast %114 : vector<1x128xf32> to vector<8x128xf32>
    %127 = arith.mulf %126, %119 : vector<8x128xf32>
    %128 = arith.addf %113, %127 : vector<8x128xf32>
    %129 = vector.broadcast %115 : vector<1x128xf32> to vector<8x128xf32>
    %130 = arith.mulf %129, %117 : vector<8x128xf32>
    %131 = arith.addf %128, %130 : vector<8x128xf32>
    %132 = vector.extract_strided_slice %1 {offsets = [7, 0], sizes = [1, 128], strides = [1, 1]} : vector<8x128xf32> to vector<1x128xf32>
    %133 = vector.extract_strided_slice %3 {offsets = [7, 0], sizes = [1, 128], strides = [1, 1]} : vector<8x128xf32> to vector<1x128xf32>
    %c0_58 = arith.constant 0 : index
    %c7 = arith.constant 7 : index
    %c0_59 = arith.constant 0 : index
    %c0_60 = arith.constant 0 : index
    %134 = vector.load %arg4[%c0_58, %c7, %c0_59, %c0_60] : memref<1x8x8x128xf32, #tpu.memory_space<vmem>>, vector<1x1x8x128xf32>
    %135 = vector.shape_cast %134 : vector<1x1x8x128xf32> to vector<8x128xf32>
    %c0_61 = arith.constant 0 : index
    %c7_62 = arith.constant 7 : index
    %c0_63 = arith.constant 0 : index
    %c0_64 = arith.constant 0 : index
    %136 = vector.load %arg5[%c0_61, %c7_62, %c0_63, %c0_64] : memref<1x8x8x128xf32, #tpu.memory_space<vmem>>, vector<1x1x8x128xf32>
    %137 = vector.shape_cast %136 : vector<1x1x8x128xf32> to vector<8x128xf32>
    %138 = vector.broadcast %132 : vector<1x128xf32> to vector<8x128xf32>
    %139 = arith.mulf %138, %135 : vector<8x128xf32>
    %140 = arith.addf %125, %139 : vector<8x128xf32>
    %141 = vector.broadcast %133 : vector<1x128xf32> to vector<8x128xf32>
    %142 = arith.mulf %141, %137 : vector<8x128xf32>
    %143 = arith.subf %140, %142 : vector<8x128xf32>
    %144 = vector.broadcast %132 : vector<1x128xf32> to vector<8x128xf32>
    %145 = arith.mulf %144, %137 : vector<8x128xf32>
    %146 = arith.addf %131, %145 : vector<8x128xf32>
    %147 = vector.broadcast %133 : vector<1x128xf32> to vector<8x128xf32>
    %148 = arith.mulf %147, %135 : vector<8x128xf32>
    %149 = arith.addf %146, %148 : vector<8x128xf32>
    %c0_65 = arith.constant 0 : index
    %c0_66 = arith.constant 0 : index
    %c0_67 = arith.constant 0 : index
    %c0_68 = arith.constant 0 : index
    %150 = vector.load %arg6[%c0_65, %c0_66, %c0_67, %c0_68] : memref<1x1x8x128xf32, #tpu.memory_space<vmem>>, vector<1x1x8x128xf32>
    %151 = vector.shape_cast %150 : vector<1x1x8x128xf32> to vector<8x128xf32>
    %152 = vector.shape_cast %143 : vector<8x128xf32> to vector<1x1x8x128xf32>
    tpu.vector_store %arg6[%c0_65, %c0_66, %c0_67, %c0_68], %152 {strides = array<i32>} : memref<1x1x8x128xf32, #tpu.memory_space<vmem>>, vector<1x1x8x128xf32>,
    %c0_69 = arith.constant 0 : index
    %c0_70 = arith.constant 0 : index
    %c0_71 = arith.constant 0 : index
    %c0_72 = arith.constant 0 : index
    %153 = vector.load %arg7[%c0_69, %c0_70, %c0_71, %c0_72] : memref<1x1x8x128xf32, #tpu.memory_space<vmem>>, vector<1x1x8x128xf32>
    %154 = vector.shape_cast %153 : vector<1x1x8x128xf32> to vector<8x128xf32>
    %155 = vector.shape_cast %149 : vector<8x128xf32> to vector<1x1x8x128xf32>
    tpu.vector_store %arg7[%c0_69, %c0_70, %c0_71, %c0_72], %155 {strides = array<i32>} : memref<1x1x8x128xf32, #tpu.memory_space<vmem>>, vector<1x1x8x128xf32>,
    return
  }
  func.func @transform_0(%arg0: i32, %arg1: i32) -> (i32, i32, i32, i32) {
    %c0_i32 = arith.constant 0 : i32
    %c0_i32_0 = arith.constant 0 : i32
    %c0_i32_1 = arith.constant 0 : i32
    return %arg0, %arg1, %c0_i32, %c0_i32_0 : i32, i32, i32, i32
  }
  func.func @transform_1(%arg0: i32, %arg1: i32) -> (i32, i32, i32, i32) {
    %c0_i32 = arith.constant 0 : i32
    %c0_i32_0 = arith.constant 0 : i32
    %c0_i32_1 = arith.constant 0 : i32
    return %arg0, %arg1, %c0_i32, %c0_i32_0 : i32, i32, i32, i32
  }
  func.func @transform_2(%arg0: i32, %arg1: i32) -> (i32, i32, i32, i32) {
    %c0_i32 = arith.constant 0 : i32
    %c0_i32_0 = arith.constant 0 : i32
    %c0_i32_1 = arith.constant 0 : i32
    %c0_i32_2 = arith.constant 0 : i32
    return %arg0, %c0_i32, %c0_i32_0, %c0_i32_1 : i32, i32, i32, i32
  }
  func.func @transform_3(%arg0: i32, %arg1: i32) -> (i32, i32, i32, i32) {
    %c0_i32 = arith.constant 0 : i32
    %c0_i32_0 = arith.constant 0 : i32
    %c0_i32_1 = arith.constant 0 : i32
    %c0_i32_2 = arith.constant 0 : i32
    return %arg0, %c0_i32, %c0_i32_0, %c0_i32_1 : i32, i32, i32, i32
  }
  func.func @transform_4(%arg0: i32, %arg1: i32) -> (i32, i32, i32, i32) {
    %c0_i32 = arith.constant 0 : i32
    %c0_i32_0 = arith.constant 0 : i32
    %c0_i32_1 = arith.constant 0 : i32
    return %arg0, %arg1, %c0_i32, %c0_i32_0 : i32, i32, i32, i32
  }
  func.func @transform_5(%arg0: i32, %arg1: i32) -> (i32, i32, i32, i32) {
    %c0_i32 = arith.constant 0 : i32
    %c0_i32_0 = arith.constant 0 : i32
    %c0_i32_1 = arith.constant 0 : i32
    return %arg0, %arg1, %c0_i32, %c0_i32_0 : i32, i32, i32, i32
  }
}

module attributes {stable_mosaic.version = 11 : i64} {
  func.func @_pw_add_stats_kernel(%arg0: i32, %arg1: i32, %arg2: memref<1x8x384xf32, #tpu.memory_space<vmem>>, %arg3: memref<1x8x384xf32, #tpu.memory_space<vmem>>, %arg4: memref<8x8xf32, #tpu.memory_space<vmem>>, %arg5: memref<8x1xf32, #tpu.memory_space<vmem>>, %arg6: memref<1x8x384xf32, #tpu.memory_space<vmem>>, %arg7: memref<1x1x8x2xf32, #tpu.memory_space<vmem>>) attributes {dimension_semantics = [#tpu.dimension_semantics<parallel>, #tpu.dimension_semantics<parallel>], iteration_bounds = array<i64: 2, 2>, scalar_prefetch = 0 : i64, scratch_operands = 0 : i64, tpu.core_type = #tpu.core_type<tc>, window_params = [{transform_indices = @transform_0, window_bounds = array<i64: 1, 8, 384>}, {transform_indices = @transform_1, window_bounds = array<i64: 1, 8, 384>}, {pipeline_mode = #tpu.pipeline_mode<synchronous>, transform_indices = @transform_2, window_bounds = array<i64: 8, 8>}, {pipeline_mode = #tpu.pipeline_mode<synchronous>, transform_indices = @transform_3, window_bounds = array<i64: 8, 1>}, {transform_indices = @transform_4, window_bounds = array<i64: 1, 8, 384>}, {transform_indices = @transform_5, window_bounds = array<i64: 1, 1, 8, 2>}]} {
    %c0 = arith.constant 0 : index
    %c0_0 = arith.constant 0 : index
    %c0_1 = arith.constant 0 : index
    %0 = vector.load %arg3[%c0, %c0_0, %c0_1] : memref<1x8x384xf32, #tpu.memory_space<vmem>>, vector<1x8x384xf32>
    %1 = vector.shape_cast %0 : vector<1x8x384xf32> to vector<8x384xf32>
    %c0_2 = arith.constant 0 : index
    %c0_3 = arith.constant 0 : index
    %2 = vector.load %arg4[%c0_2, %c0_3] : memref<8x8xf32, #tpu.memory_space<vmem>>, vector<8x8xf32>
    %c0_4 = arith.constant 0 : index
    %c0_5 = arith.constant 0 : index
    %c0_6 = arith.constant 0 : index
    %3 = vector.load %arg2[%c0_4, %c0_5, %c0_6] : memref<1x8x384xf32, #tpu.memory_space<vmem>>, vector<1x8x384xf32>
    %4 = vector.shape_cast %3 : vector<1x8x384xf32> to vector<8x384xf32>
    %cst = arith.constant dense<0.000000e+00> : vector<8x384xf32>
    %5 = tpu.matmul %2, %4, %cst {dimension_numbers = #tpu.dot_dimension_numbers<[1], [0], [0], [1], [0, 0, 1, 1], [], []>} : vector<8x8xf32>, vector<8x384xf32>, vector<8x384xf32> -> vector<8x384xf32>
    %6 = arith.addf %1, %5 : vector<8x384xf32>
    %c0_7 = arith.constant 0 : index
    %c0_8 = arith.constant 0 : index
    %7 = vector.load %arg5[%c0_7, %c0_8] : memref<8x1xf32, #tpu.memory_space<vmem>>, vector<8x1xf32>
    %8 = vector.broadcast %7 : vector<8x1xf32> to vector<8x384xf32>
    %9 = arith.addf %6, %8 : vector<8x384xf32>
    %c0_9 = arith.constant 0 : index
    %c0_10 = arith.constant 0 : index
    %c0_11 = arith.constant 0 : index
    %10 = vector.load %arg6[%c0_9, %c0_10, %c0_11] : memref<1x8x384xf32, #tpu.memory_space<vmem>>, vector<1x8x384xf32>
    %11 = vector.shape_cast %10 : vector<1x8x384xf32> to vector<8x384xf32>
    %12 = vector.shape_cast %9 : vector<8x384xf32> to vector<1x8x384xf32>
    tpu.vector_store %arg6[%c0_9, %c0_10, %c0_11], %12 {strides = array<i32>} : memref<1x8x384xf32, #tpu.memory_space<vmem>>, vector<1x8x384xf32>,
    %cst_12 = arith.constant dense<0.000000e+00> : vector<8xf32>
    %13 = vector.multi_reduction <add>, %9, %cst_12 [1] : vector<8x384xf32> to vector<8xf32>
    %14 = vector.shape_cast %13 : vector<8xf32> to vector<8x1xf32>
    %c0_13 = arith.constant 0 : index
    %c0_14 = arith.constant 0 : index
    %c0_15 = arith.constant 0 : index
    %c0_16 = arith.constant 0 : index
    %15 = vector.load %arg7[%c0_13, %c0_14, %c0_15, %c0_16] : memref<1x1x8x2xf32, #tpu.memory_space<vmem>>, vector<1x1x8x1xf32>
    %16 = vector.shape_cast %15 : vector<1x1x8x1xf32> to vector<8x1xf32>
    %17 = vector.shape_cast %14 : vector<8x1xf32> to vector<1x1x8x1xf32>
    tpu.vector_store %arg7[%c0_13, %c0_14, %c0_15, %c0_16], %17 {strides = array<i32>} : memref<1x1x8x2xf32, #tpu.memory_space<vmem>>, vector<1x1x8x1xf32>,
    %18 = arith.mulf %9, %9 : vector<8x384xf32>
    %cst_17 = arith.constant dense<0.000000e+00> : vector<8xf32>
    %19 = vector.multi_reduction <add>, %18, %cst_17 [1] : vector<8x384xf32> to vector<8xf32>
    %20 = vector.shape_cast %19 : vector<8xf32> to vector<8x1xf32>
    %c0_18 = arith.constant 0 : index
    %c0_19 = arith.constant 0 : index
    %c0_20 = arith.constant 0 : index
    %c1 = arith.constant 1 : index
    %21 = vector.load %arg7[%c0_18, %c0_19, %c0_20, %c1] : memref<1x1x8x2xf32, #tpu.memory_space<vmem>>, vector<1x1x8x1xf32>
    %22 = vector.shape_cast %21 : vector<1x1x8x1xf32> to vector<8x1xf32>
    %23 = vector.shape_cast %20 : vector<8x1xf32> to vector<1x1x8x1xf32>
    tpu.vector_store %arg7[%c0_18, %c0_19, %c0_20, %c1], %23 {strides = array<i32>} : memref<1x1x8x2xf32, #tpu.memory_space<vmem>>, vector<1x1x8x1xf32>,
    return
  }
  func.func @transform_0(%arg0: i32, %arg1: i32) -> (i32, i32, i32) {
    %c0_i32 = arith.constant 0 : i32
    %c0_i32_0 = arith.constant 0 : i32
    return %arg0, %c0_i32, %arg1 : i32, i32, i32
  }
  func.func @transform_1(%arg0: i32, %arg1: i32) -> (i32, i32, i32) {
    %c0_i32 = arith.constant 0 : i32
    %c0_i32_0 = arith.constant 0 : i32
    return %arg0, %c0_i32, %arg1 : i32, i32, i32
  }
  func.func @transform_2(%arg0: i32, %arg1: i32) -> (i32, i32) {
    %c0_i32 = arith.constant 0 : i32
    %c0_i32_0 = arith.constant 0 : i32
    %c0_i32_1 = arith.constant 0 : i32
    return %c0_i32, %c0_i32_0 : i32, i32
  }
  func.func @transform_3(%arg0: i32, %arg1: i32) -> (i32, i32) {
    %c0_i32 = arith.constant 0 : i32
    %c0_i32_0 = arith.constant 0 : i32
    %c0_i32_1 = arith.constant 0 : i32
    return %c0_i32, %c0_i32_0 : i32, i32
  }
  func.func @transform_4(%arg0: i32, %arg1: i32) -> (i32, i32, i32) {
    %c0_i32 = arith.constant 0 : i32
    %c0_i32_0 = arith.constant 0 : i32
    return %arg0, %c0_i32, %arg1 : i32, i32, i32
  }
  func.func @transform_5(%arg0: i32, %arg1: i32) -> (i32, i32, i32, i32) {
    %c0_i32 = arith.constant 0 : i32
    %c0_i32_0 = arith.constant 0 : i32
    %c0_i32_1 = arith.constant 0 : i32
    return %arg0, %arg1, %c0_i32, %c0_i32_0 : i32, i32, i32, i32
  }
}

module attributes {stable_mosaic.version = 11 : i64} {
  func.func @_bn_relu_kernel(%arg0: i32, %arg1: i32, %arg2: memref<1x8x384xf32, #tpu.memory_space<vmem>>, %arg3: memref<8x1xf32, #tpu.memory_space<vmem>>, %arg4: memref<8x1xf32, #tpu.memory_space<vmem>>, %arg5: memref<1x8x384xf32, #tpu.memory_space<vmem>>) attributes {dimension_semantics = [#tpu.dimension_semantics<parallel>, #tpu.dimension_semantics<parallel>], iteration_bounds = array<i64: 2, 2>, scalar_prefetch = 0 : i64, scratch_operands = 0 : i64, tpu.core_type = #tpu.core_type<tc>, window_params = [{transform_indices = @transform_0, window_bounds = array<i64: 1, 8, 384>}, {pipeline_mode = #tpu.pipeline_mode<synchronous>, transform_indices = @transform_1, window_bounds = array<i64: 8, 1>}, {pipeline_mode = #tpu.pipeline_mode<synchronous>, transform_indices = @transform_2, window_bounds = array<i64: 8, 1>}, {transform_indices = @transform_3, window_bounds = array<i64: 1, 8, 384>}]} {
    %c0 = arith.constant 0 : index
    %c0_0 = arith.constant 0 : index
    %c0_1 = arith.constant 0 : index
    %0 = vector.load %arg2[%c0, %c0_0, %c0_1] : memref<1x8x384xf32, #tpu.memory_space<vmem>>, vector<1x8x384xf32>
    %1 = vector.shape_cast %0 : vector<1x8x384xf32> to vector<8x384xf32>
    %c0_2 = arith.constant 0 : index
    %c0_3 = arith.constant 0 : index
    %2 = vector.load %arg3[%c0_2, %c0_3] : memref<8x1xf32, #tpu.memory_space<vmem>>, vector<8x1xf32>
    %3 = vector.broadcast %2 : vector<8x1xf32> to vector<8x384xf32>
    %4 = arith.mulf %1, %3 : vector<8x384xf32>
    %c0_4 = arith.constant 0 : index
    %c0_5 = arith.constant 0 : index
    %5 = vector.load %arg4[%c0_4, %c0_5] : memref<8x1xf32, #tpu.memory_space<vmem>>, vector<8x1xf32>
    %6 = vector.broadcast %5 : vector<8x1xf32> to vector<8x384xf32>
    %7 = arith.addf %4, %6 : vector<8x384xf32>
    %cst = arith.constant 0.000000e+00 : f32
    %8 = vector.broadcast %cst : f32 to vector<8x384xf32>
    %9 = arith.maximumf %7, %8 : vector<8x384xf32>
    %c0_6 = arith.constant 0 : index
    %c0_7 = arith.constant 0 : index
    %c0_8 = arith.constant 0 : index
    %10 = vector.load %arg5[%c0_6, %c0_7, %c0_8] : memref<1x8x384xf32, #tpu.memory_space<vmem>>, vector<1x8x384xf32>
    %11 = vector.shape_cast %10 : vector<1x8x384xf32> to vector<8x384xf32>
    %12 = vector.shape_cast %9 : vector<8x384xf32> to vector<1x8x384xf32>
    tpu.vector_store %arg5[%c0_6, %c0_7, %c0_8], %12 {strides = array<i32>} : memref<1x8x384xf32, #tpu.memory_space<vmem>>, vector<1x8x384xf32>,
    return
  }
  func.func @transform_0(%arg0: i32, %arg1: i32) -> (i32, i32, i32) {
    %c0_i32 = arith.constant 0 : i32
    %c0_i32_0 = arith.constant 0 : i32
    return %arg0, %c0_i32, %arg1 : i32, i32, i32
  }
  func.func @transform_1(%arg0: i32, %arg1: i32) -> (i32, i32) {
    %c0_i32 = arith.constant 0 : i32
    %c0_i32_0 = arith.constant 0 : i32
    %c0_i32_1 = arith.constant 0 : i32
    return %c0_i32, %c0_i32_0 : i32, i32
  }
  func.func @transform_2(%arg0: i32, %arg1: i32) -> (i32, i32) {
    %c0_i32 = arith.constant 0 : i32
    %c0_i32_0 = arith.constant 0 : i32
    %c0_i32_1 = arith.constant 0 : i32
    return %c0_i32, %c0_i32_0 : i32, i32
  }
  func.func @transform_3(%arg0: i32, %arg1: i32) -> (i32, i32, i32) {
    %c0_i32 = arith.constant 0 : i32
    %c0_i32_0 = arith.constant 0 : i32
    return %arg0, %c0_i32, %arg1 : i32, i32, i32
  }
}

module attributes {stable_mosaic.version = 11 : i64} {
  func.func @_bn_fc1_fc2_kernel(%arg0: i32, %arg1: i32, %arg2: memref<1x8x384xf32, #tpu.memory_space<vmem>>, %arg3: memref<8x1xf32, #tpu.memory_space<vmem>>, %arg4: memref<8x1xf32, #tpu.memory_space<vmem>>, %arg5: memref<128x8xf32, #tpu.memory_space<vmem>>, %arg6: memref<128x1xf32, #tpu.memory_space<vmem>>, %arg7: memref<1x128xf32, #tpu.memory_space<vmem>>, %arg8: memref<1x1xf32, #tpu.memory_space<vmem>>, %arg9: memref<1x1x384xf32, #tpu.memory_space<vmem>>) attributes {dimension_semantics = [#tpu.dimension_semantics<parallel>, #tpu.dimension_semantics<parallel>], iteration_bounds = array<i64: 2, 2>, scalar_prefetch = 0 : i64, scratch_operands = 0 : i64, tpu.core_type = #tpu.core_type<tc>, window_params = [{transform_indices = @transform_0, window_bounds = array<i64: 1, 8, 384>}, {pipeline_mode = #tpu.pipeline_mode<synchronous>, transform_indices = @transform_1, window_bounds = array<i64: 8, 1>}, {pipeline_mode = #tpu.pipeline_mode<synchronous>, transform_indices = @transform_2, window_bounds = array<i64: 8, 1>}, {pipeline_mode = #tpu.pipeline_mode<synchronous>, transform_indices = @transform_3, window_bounds = array<i64: 128, 8>}, {pipeline_mode = #tpu.pipeline_mode<synchronous>, transform_indices = @transform_4, window_bounds = array<i64: 128, 1>}, {pipeline_mode = #tpu.pipeline_mode<synchronous>, transform_indices = @transform_5, window_bounds = array<i64: 1, 128>}, {pipeline_mode = #tpu.pipeline_mode<synchronous>, transform_indices = @transform_6, window_bounds = array<i64: 1, 1>}, {transform_indices = @transform_7, window_bounds = array<i64: 1, 1, 384>}]} {
    %c0 = arith.constant 0 : index
    %c0_0 = arith.constant 0 : index
    %c0_1 = arith.constant 0 : index
    %0 = vector.load %arg2[%c0, %c0_0, %c0_1] : memref<1x8x384xf32, #tpu.memory_space<vmem>>, vector<1x8x384xf32>
    %1 = vector.shape_cast %0 : vector<1x8x384xf32> to vector<8x384xf32>
    %c0_2 = arith.constant 0 : index
    %c0_3 = arith.constant 0 : index
    %2 = vector.load %arg3[%c0_2, %c0_3] : memref<8x1xf32, #tpu.memory_space<vmem>>, vector<8x1xf32>
    %3 = vector.broadcast %2 : vector<8x1xf32> to vector<8x384xf32>
    %4 = arith.mulf %1, %3 : vector<8x384xf32>
    %c0_4 = arith.constant 0 : index
    %c0_5 = arith.constant 0 : index
    %5 = vector.load %arg4[%c0_4, %c0_5] : memref<8x1xf32, #tpu.memory_space<vmem>>, vector<8x1xf32>
    %6 = vector.broadcast %5 : vector<8x1xf32> to vector<8x384xf32>
    %7 = arith.addf %4, %6 : vector<8x384xf32>
    %c0_6 = arith.constant 0 : index
    %c0_7 = arith.constant 0 : index
    %8 = vector.load %arg5[%c0_6, %c0_7] : memref<128x8xf32, #tpu.memory_space<vmem>>, vector<128x8xf32>
    %cst = arith.constant dense<0.000000e+00> : vector<128x384xf32>
    %9 = tpu.matmul %8, %7, %cst {dimension_numbers = #tpu.dot_dimension_numbers<[1], [0], [0], [1], [0, 0, 1, 1], [], []>} : vector<128x8xf32>, vector<8x384xf32>, vector<128x384xf32> -> vector<128x384xf32>
    %c0_8 = arith.constant 0 : index
    %c0_9 = arith.constant 0 : index
    %10 = vector.load %arg6[%c0_8, %c0_9] : memref<128x1xf32, #tpu.memory_space<vmem>>, vector<128x1xf32>
    %11 = vector.broadcast %10 : vector<128x1xf32> to vector<128x384xf32>
    %12 = arith.addf %9, %11 : vector<128x384xf32>
    %cst_10 = arith.constant 0.000000e+00 : f32
    %13 = vector.broadcast %cst_10 : f32 to vector<128x384xf32>
    %14 = arith.maximumf %12, %13 : vector<128x384xf32>
    %c0_11 = arith.constant 0 : index
    %c0_12 = arith.constant 0 : index
    %15 = vector.load %arg7[%c0_11, %c0_12] : memref<1x128xf32, #tpu.memory_space<vmem>>, vector<1x128xf32>
    %cst_13 = arith.constant dense<0.000000e+00> : vector<1x384xf32>
    %16 = tpu.matmul %15, %14, %cst_13 {dimension_numbers = #tpu.dot_dimension_numbers<[1], [0], [0], [1], [0, 0, 1, 1], [], []>} : vector<1x128xf32>, vector<128x384xf32>, vector<1x384xf32> -> vector<1x384xf32>
    %c0_14 = arith.constant 0 : index
    %c0_15 = arith.constant 0 : index
    %17 = vector.load %arg8[%c0_14, %c0_15] : memref<1x1xf32, #tpu.memory_space<vmem>>, vector<1x1xf32>
    %18 = vector.broadcast %17 : vector<1x1xf32> to vector<1x384xf32>
    %19 = arith.addf %16, %18 : vector<1x384xf32>
    %c0_16 = arith.constant 0 : index
    %c0_17 = arith.constant 0 : index
    %c0_18 = arith.constant 0 : index
    %20 = vector.load %arg9[%c0_16, %c0_17, %c0_18] : memref<1x1x384xf32, #tpu.memory_space<vmem>>, vector<1x1x384xf32>
    %21 = vector.shape_cast %20 : vector<1x1x384xf32> to vector<1x384xf32>
    %22 = vector.shape_cast %19 : vector<1x384xf32> to vector<1x1x384xf32>
    tpu.vector_store %arg9[%c0_16, %c0_17, %c0_18], %22 {strides = array<i32>} : memref<1x1x384xf32, #tpu.memory_space<vmem>>, vector<1x1x384xf32>,
    return
  }
  func.func @transform_0(%arg0: i32, %arg1: i32) -> (i32, i32, i32) {
    %c0_i32 = arith.constant 0 : i32
    %c0_i32_0 = arith.constant 0 : i32
    return %arg0, %c0_i32, %arg1 : i32, i32, i32
  }
  func.func @transform_1(%arg0: i32, %arg1: i32) -> (i32, i32) {
    %c0_i32 = arith.constant 0 : i32
    %c0_i32_0 = arith.constant 0 : i32
    %c0_i32_1 = arith.constant 0 : i32
    return %c0_i32, %c0_i32_0 : i32, i32
  }
  func.func @transform_2(%arg0: i32, %arg1: i32) -> (i32, i32) {
    %c0_i32 = arith.constant 0 : i32
    %c0_i32_0 = arith.constant 0 : i32
    %c0_i32_1 = arith.constant 0 : i32
    return %c0_i32, %c0_i32_0 : i32, i32
  }
  func.func @transform_3(%arg0: i32, %arg1: i32) -> (i32, i32) {
    %c0_i32 = arith.constant 0 : i32
    %c0_i32_0 = arith.constant 0 : i32
    %c0_i32_1 = arith.constant 0 : i32
    return %c0_i32, %c0_i32_0 : i32, i32
  }
  func.func @transform_4(%arg0: i32, %arg1: i32) -> (i32, i32) {
    %c0_i32 = arith.constant 0 : i32
    %c0_i32_0 = arith.constant 0 : i32
    %c0_i32_1 = arith.constant 0 : i32
    return %c0_i32, %c0_i32_0 : i32, i32
  }
  func.func @transform_5(%arg0: i32, %arg1: i32) -> (i32, i32) {
    %c0_i32 = arith.constant 0 : i32
    %c0_i32_0 = arith.constant 0 : i32
    %c0_i32_1 = arith.constant 0 : i32
    return %c0_i32, %c0_i32_0 : i32, i32
  }
  func.func @transform_6(%arg0: i32, %arg1: i32) -> (i32, i32) {
    %c0_i32 = arith.constant 0 : i32
    %c0_i32_0 = arith.constant 0 : i32
    %c0_i32_1 = arith.constant 0 : i32
    return %c0_i32, %c0_i32_0 : i32, i32
  }
  func.func @transform_7(%arg0: i32, %arg1: i32) -> (i32, i32, i32) {
    %c0_i32 = arith.constant 0 : i32
    %c0_i32_0 = arith.constant 0 : i32
    return %arg0, %c0_i32, %arg1 : i32, i32, i32
  }
}

</mosaic_0001>

<bundles_post_ra>
// kernel: net2d_forward.13
= control target key start
LH: loop header
LB: loop body
LE: loop exit
PB: predicated region body
PF: predicated region fallthrough
CT: control target
= control target key end

     0   :  { %s660_s12 = smov 0   ;;  %s662_s13 = smov 0   ;;  %s759_s0 = inlined_call_operand.vmem [shape: f32[2,13,768], index: 0, kind: input, shape index: {}]   ;;  %s760_s1 = inlined_call_operand.vmem [shape: f32[8,13], index: 1, kind: input, shape index: {}]   ;;  %s761_s2 = inlined_call_operand.vmem [shape: f32[8,1], index: 2, kind: input, shape index: {}]   ;;  %s762_s3 = inlined_call_operand.vmem [shape: f32[2,8,768], index: 3, kind: output, shape index: {}]  }
   0x1   :  { %s664_s14 = smov 0   ;;  %s666_s15 = smov 0  }
   0x2   :  { %s668_s16 = smov 0   ;;  %s670_s17 = smov 0  }
   0x3   :  { %s672_s18 = smov 0  }
   0x4 LB: > { %s22_s19 = sadd.s32 1, %s627_s16  ;;  %s25_s20 = sadd.s32 1, %s631_s17  ;;  %s635_s18 = sphi %s672_s18, %s13_s18   ;;  %s631_s17 = sphi %s670_s17, %s768_s17   ;;  %s627_s16 = sphi %s668_s16, %s767_s16   ;;  %s623_s15 = sphi %s666_s15, %s766_s15   ;;  %s619_s14 = sphi %s664_s14, %s765_s14   ;;  %s615_s13 = sphi %s662_s13, %s764_s13   ;;  %s611_s12 = sphi %s660_s12, %s763_s12  }
   0x5   : > { %p23_p0 = scmp.ge.s32.totalorder %s22_s19, 2  ;;  %p41_p1 = scmp.ne.s32.totalorder %s615_s13, %s611_s12 }
   0x6   : > { %p42_p2 = scmp.eq.s32.totalorder %s635_s18, 0  ;;  %s34_s24 = sadd.s32 1, %s615_s13 }
   0x7   : > { %s770_s19 = smov (%p23_p0, %s22_s19), 0  ;;  %s772_s20 = smov (!%p23_p0, %s25_s20), %s631_s17 }
   0x8   : > { %p43_p3 = por %p42_p2, %p41_p1  ;;  %p27_p4 = scmp.ge.s32.totalorder %s772_s20, 2 }
   0x9   : > { %s30_s21 = ssub.s32 %s627_s16, %s770_s19  ;;  %p496_p6 = scmp.ge.s32.totalorder %s635_s18, 4 }
   0xa   : > { %s774_s20 = smov (%p27_p4, %s772_s20), 0 }
   0xb   : > { %s29_s22 = ssub.s32 %s631_s17, %s774_s20  ;;  %143 = sbr.rel (%p496_p6) target bundleno = 28 (0x1c), region = 24 }
   0xc   : > { %s31_s23 = sor.u32 %s30_s21, %s29_s22 }
   0xd   : > { %p32_p5 = scmp.eq.s32.totalorder %s31_s23, 0 }
   0xf   : > { %s711_s25 = scalar_select %p32_p5, %s615_s13, %s34_s24  }
  0x10   : > { %146 = sbr.rel (!%p43_p3) target bundleno = 28 (0x1c), region = 28  ;;  %s148_s26 = sand.u32 (%p43_p3), 1, %s615_s13  }
  0x11   : > { %s151_s27 = smul.u32 (%p43_p3), 3, %s627_s16 }
  0x12   : > { %s517_s28 = smul.u32 (%p43_p3), 48, %s148_s26 }
  0x13   : > { %s518_s29 = smul.u32 (%p43_p3), 12, %s631_s17 }
  0x14   : > { %s150_s8 = scalar_lea.vmem (%p43_p3), [#allocation2], %s517_s28 }
  0x15   : > { %s153_s30 = sadd.s32 %s518_s29, %s151_s27 }
  0x16   : > { %s497_s4 = sshll.u32 %s153_s30, 3 }
  0x17   : > { %s155_s7 = scalar_lea.vmem %s759_s0, %s497_s4 }
  0x18   : > { %v168_v0 = vld [vmem:[%s155_s7] sm:$0xff]  ;;  %v170_v1 = vld [vmem:[%s155_s7 + $0x8] sm:$0xff]  ;;  %v172_v2 = vld [vmem:[%s155_s7 + $0x10] sm:$0xff] }
  0x19   : > { %169 = vst [vmem:[%s150_s8] sm:$0xff] %v168_v0  ;;  %171 = vst [vmem:[%s150_s8 + $0x8] sm:$0xff] %v170_v1  ;;  %v174_v3 = vld [vmem:[%s155_s7 + $0x30] sm:$0xff]  ;;  %v176_v4 = vld [vmem:[%s155_s7 + $0x38] sm:$0xff] }
  0x1a   : > { %173 = vst [vmem:[%s150_s8 + $0x10] sm:$0xff] %v172_v2  ;;  %v178_v5 = vld [vmem:[%s155_s7 + $0x40] sm:$0xff]  ;;  %175 = vst [vmem:[%s150_s8 + $0x18] sm:$0xff] %v174_v3 }
  0x1b   : > { %177 = vst [vmem:[%s150_s8 + $0x20] sm:$0xff] %v176_v4  ;;  %179 = vst [vmem:[%s150_s8 + $0x28] sm:$0xff] %v178_v5 }
  0x1c PF: > { %p498_p7 = scmp.ge.s32.totalorder %s635_s18, 1  ;;  %p184_p8 = scmp.lt.s32.totalorder %s635_s18, 5 }
  0x1e   : > { %p185_p9 = pnand %p498_p7, %p184_p8 }
  0x1f   : > { %s191_s9 = sand.u32 (!%p185_p9), 1, %s611_s12   ;;  %p220_p10 = scmp.lt.s32.totalorder (!%p185_p9), %s623_s15, 1 }
  0x20   : > { %188 = sbr.rel (%p185_p9) target bundleno = 242 (0xf2), region = 51 }
  0x21   : > { %s519_s10 = smul.u32 (!%p185_p9), 48, %s191_s9 }
  0x22   : > { %s219_s12 = smul.u32 (!%p185_p9), 3, %s619_s14 }
  0x23   : > { %s193_s24 = scalar_lea.vmem (!%p185_p9), [#allocation2], %s519_s10 }
  0x24   : > { %p222_p11 = scmp.lt.s32.totalorder (!%p185_p9), %s219_s12, 5 }
  0x25   : > { %v637_v6 = vmov 0.0   ;;  %v236_v7 = vld [vmem:[%s761_s2] sm:$0xff]  ;;  %vm246_vm0 = vcmask 1044480   ;;  %vm638_vm1 = vmmov 0   ;;  %v639_v8 = vmov 0   ;;  %v231_v13 = vld [vmem:[%s193_s24 + $0x8] sm:$0xff] }
  0x26   : > { %510 = vmatprep.subr.mxu1 %v637_v6  ;;  %320 = vmatprep.mubr.f32.mxu0 %v637_v6  ;;  %v229_v9 = vld [vmem:[%s760_s1] sm:$0xff]  ;;  %v233_v11 = vld [vmem:[%s193_s24 + $0x18] sm:$0x1f]  ;;  %v235_v12 = vld [vmem:[%s193_s24 + $0x28] sm:$0x1f]  ;;  %vm242_vm2 = vcmask 105472  }
  0x27   : > { %514 = vmatprep.mubr.msk.f32.mxu1 %vm638_vm1, %v637_v6  ;;  %580 = vset.pattern.permute.xlu0 %v639_v8  ;;  %v234_v10 = vld [vmem:[%s193_s24 + $0x20] sm:$0x1f]  ;;  %v232_v15 = vld [vmem:[%s193_s24 + $0x10] sm:$0xff]  ;;  %s776_s15 = smov (!%p220_p10, %s623_s15), 1  ;;  %s778_s12 = smov (!%p222_p11, %s219_s12), 5 }
  0x28   : > { %239 = vperm.xlu0 %580, %v236_v7   ;;  %500 = vmatprep.subr.msk.mxu0 %vm246_vm0, %v234_v10  ;;  %v230_v14 = vld [vmem:[%s193_s24] sm:$0xff]  ;;  %s520_s26 = smul.u32 6, %s776_s15 }
  0x29   : > { %511 = vmatpush3.msk.msra.mxu1 %vm246_vm0, %v235_v12  ;;  %501 = vmatpush1.msk.msra.mxu0 %vm246_vm0, %v233_v11 }
  0x2a   : > { %512 = vmatprep.subr.mxu1 %v637_v6  ;;  %286 = vmatprep.subr.mxu0 %v231_v13  ;;  %s225_s27 = sadd.s32 %s520_s26, %s778_s12 }
  0x2b   : > { %513 = vmatpush3.msra.mxu1 %v232_v15  ;;  %287 = vmatpush1.msra.mxu0 %v230_v14  ;;  %s499_s28 = sshll.u32 %s225_s27, 3 }
  0x2c   : > { %515 = vmatmul.mubr.msk.f32.vlgmr.msra.gmra.mxu1 %vm242_vm2, %v229_v9  ;;  %502 = vmatmul.mubr.msk.f32.vlgmr.msra.gmra.mxu0 %vm242_vm2, %v229_v9  ;;  %s227_s4 = scalar_lea.vmem %s762_s3, %s499_s28 }
  0xa3   : > { %v240_v16 = vpop.permute.xlu0 %239 }
  0xec   : > { %v393_v17 = vpop.f32.mrf.mxu1  ;;  %v322_v18 = vpop.f32.mrf.mxu0 }
  0xed   : > { %v394_v19 = vadd.f32 %v393_v17, %v240_v16  ;;  %v323_v20 = vadd.f32 %v322_v18, %v240_v16 }
  0xee   : > { %v516_v21 = vpop.f32.mrf.mxu1  ;;  %v324_v22 = vpop.f32.mrf.mxu0 }
  0xef   : > { %399 = vst [vmem:[%s227_s4 + $0x10] sm:$0xff] %v394_v19  ;;  %397 = vst [vmem:[%s227_s4] sm:$0xff] %v323_v20  ;;  %v325_v23 = vadd.f32 %v324_v22, %v240_v16 }
  0xf1   : > { %398 = vst [vmem:[%s227_s4 + $0x8] sm:$0xff] %v325_v23 }
  0xf2 PF: > { %s13_s18 = sadd.s32 1, %s635_s18   ;;  %s763_s12 = smov %s615_s13 }
  0xf3   : > { %p10_p12 = scmp.ge.s32.totalorder %s13_s18, 6   ;;  %s764_s13 = smov %s711_s25 }
  0xf4   : > { %s765_s14 = smov %s627_s16  ;;  %s766_s15 = smov %s631_s17 }
  0xf5   : > { %s767_s16 = smov %s770_s19  ;;  %s768_s17 = smov %s774_s20 }
  0xf6   :  { %12 = sbr.rel (!%p10_p12) target bundleno = 4 (0x4), region = 90 }

// kernel: net2d_forward.14
= control target key start
LH: loop header
LB: loop body
LE: loop exit
PB: predicated region body
PF: predicated region fallthrough
CT: control target
= control target key end

     0   :  { %s830_s18 = smov 0   ;;  %s832_s19 = smov 0   ;;  %s949_s0 = inlined_call_operand.vmem [shape: f32[4,2,8,128], index: 0, kind: input, shape index: {}]   ;;  %s950_s1 = inlined_call_operand.vmem [shape: f32[4,2,8,128], index: 1, kind: input, shape index: {}]   ;;  %s951_s2 = inlined_call_operand.vmem [shape: f32[4,8,8,128], index: 2, kind: input, shape index: {}]   ;;  %s952_s3 = inlined_call_operand.vmem [shape: f32[4,8,8,128], index: 3, kind: input, shape index: {}]   ;;  %s953_s4 = inlined_call_operand.vmem [shape: f32[4,2,8,128], index: 4, kind: output, shape index: {0}]   ;;  %s954_s5 = inlined_call_operand.vmem [shape: f32[4,2,8,128], index: 5, kind: output, shape index: {1}]  }
   0x1   :  { %s834_s20 = smov 0   ;;  %s836_s21 = smov 0  }
   0x2   :  { %s838_s22 = smov 0  }
   0x3 LB: > { %s25_s23 = sadd.s32 1, %s790_s20  ;;  %s28_s24 = sadd.s32 1, %s794_s21  ;;  %s798_s22 = sphi %s838_s22, %s16_s22   ;;  %s794_s21 = sphi %s836_s21, %s958_s21   ;;  %s790_s20 = sphi %s834_s20, %s957_s20   ;;  %s786_s19 = sphi %s832_s19, %s956_s19   ;;  %s782_s18 = sphi %s830_s18, %s955_s18  }
   0x4   : > { %p26_p0 = scmp.ge.s32.totalorder %s25_s23, 2  ;;  %p689_p1 = scmp.ge.s32.totalorder %s798_s22, 1 }
   0x5   : > { %p246_p2 = scmp.lt.s32.totalorder %s798_s22, 9 }
   0x6   : > { %s960_s23 = smov (%p26_p0, %s25_s23), 0  ;;  %s962_s24 = smov (!%p26_p0, %s28_s24), %s794_s21 }
   0x7   : > { %p247_p3 = pnand %p689_p1, %p246_p2  ;;  %p30_p4 = scmp.ge.s32.totalorder %s962_s24, 4 }
   0x8   : > { %p306_p5 = scmp.lt.s32.totalorder (!%p247_p3), %s786_s19, 3  ;;  %p308_p6 = scmp.lt.s32.totalorder (!%p247_p3), %s782_s18, 1 }
   0x9   : > { %s964_s24 = smov (%p30_p4, %s962_s24), 0  ;;  %250 = sbr.rel (%p247_p3) target bundleno = 56 (0x38), region = 36 }
   0xe   : > { %v352_v0 = vlaneseq  ;;  %s966_s19 = smov (!%p306_p5, %s786_s19), 3  ;;  %s968_s18 = smov (!%p308_p6, %s782_s18), 1 }
   0xf   : > { %s690_s25 = sshll.u32 %s966_s19, 1  ;;  %s718_s26 = sshll.u32 %s966_s19, 6 }
  0x10   : > { %v860_v1 = vshrl.u32 %v352_v0, 7  ;;  %s311_s27 = sadd.s32 %s690_s25, %s968_s18  ;;  %s865_s30 = scalar_lea.vmem %s951_s2, %s718_s26 }
  0x11   : > { %s869_s6 = sshll.u32 %s311_s27, 3  ;;  %s874_s9 = scalar_lea.vmem %s952_s3, %s718_s26  ;;  %v350_v5 = vld [vmem:[%s865_s30] sm:$0xff]  ;;  %v702_v11 = vld [vmem:[%s865_s30 + $0x8] sm:$0xff]  ;;  %v704_v22 = vld [vmem:[%s865_s30 + $0x10] sm:$0xff] }
  0x12   : > { %v354_v2 = vsub.s32 0, %v860_v1  ;;  %v374_v3 = vsub.s32 1, %v860_v1  ;;  %v394_v4 = vsub.s32 2, %v860_v1  ;;  %s313_s12 = scalar_lea.vmem %s949_s0, %s869_s6  ;;  %s321_s15 = scalar_lea.vmem %s950_s1, %s869_s6  ;;  %v351_v8 = vld [vmem:[%s874_s9] sm:$0xff]  ;;  %v414_v15 = vsub.s32 3, %v860_v1  ;;  %v703_v20 = vld [vmem:[%s874_s9 + $0x8] sm:$0xff] }
  0x13   : > { %v886_v6 = vld [vmem:[%s313_s12] sm:$0xff]  ;;  %v434_v31 = vsub.s32 4, %v860_v1  ;;  %v705_v33 = vld [vmem:[%s874_s9 + $0x10] sm:$0xff]  ;;  %v706_v34 = vld [vmem:[%s865_s30 + $0x18] sm:$0xff]  ;;  %v454_v38 = vsub.s32 5, %v860_v1  ;;  %v474_v57 = vsub.s32 6, %v860_v1  ;;  %s339_s18 = scalar_lea.vmem %s953_s4, %s869_s6  ;;  %s347_s26 = scalar_lea.vmem %s954_s5, %s869_s6 }
  0x14   : > { %v888_v7 = vld [vmem:[%s321_s15] sm:$0xff]  ;;  %v355_v9 = vrot.slane %v886_v6, %v354_v2  ;;  %v375_v12 = vrot.slane %v886_v6, %v374_v3  ;;  %v395_v14 = vrot.slane %v886_v6, %v394_v4  ;;  %v415_v30 = vrot.slane %v886_v6, %v414_v15  ;;  %v707_v41 = vld [vmem:[%s874_s9 + $0x18] sm:$0xff]  ;;  %v710_v58 = vld [vmem:[%s865_s30 + $0x28] sm:$0xff] }
  0x15   : > { %v361_v10 = vrot.slane %v888_v7, %v354_v2  ;;  %v381_v13 = vrot.slane %v888_v7, %v374_v3  ;;  %v401_v25 = vrot.slane %v888_v7, %v394_v4  ;;  %v421_v37 = vrot.slane %v888_v7, %v414_v15  ;;  %v708_v45 = vld [vmem:[%s865_s30 + $0x20] sm:$0xff]  ;;  %v711_v4 = vld [vmem:[%s874_s9 + $0x28] sm:$0xff] }
  0x16   : > { %v356_v16 = vmul.f32 %v355_v9, %v350_v5  ;;  %v364_v18 = vmul.f32 %v355_v9, %v351_v8  ;;  %v376_v21 = vmul.f32 %v702_v11, %v375_v12  ;;  %v384_v27 = vmul.f32 %v703_v20, %v375_v12  ;;  %v709_v54 = vld [vmem:[%s874_s9 + $0x20] sm:$0xff] }
  0x17   : > { %v362_v17 = vmul.f32 %v361_v10, %v351_v8  ;;  %v366_v19 = vmul.f32 %v361_v10, %v350_v5  ;;  %v382_v24 = vmul.f32 %v703_v20, %v381_v13  ;;  %v396_v29 = vmul.f32 %v704_v22, %v395_v14  ;;  %v712_v10 = vld [vmem:[%s865_s30 + $0x30] sm:$0xff] }
  0x18   : > { %v386_v32 = vmul.f32 %v702_v11, %v381_v13  ;;  %v402_v36 = vmul.f32 %v705_v33, %v401_v25  ;;  %v416_v42 = vmul.f32 %v706_v34, %v415_v30  ;;  %v435_v43 = vrot.slane %v886_v6, %v434_v31 }
  0x19   : > { %v363_v23 = vsub.f32 %v356_v16, %v362_v17  ;;  %v367_v26 = vadd.f32 %v366_v19, %v364_v18  ;;  %v404_v44 = vmul.f32 %v705_v33, %v395_v14  ;;  %v406_v47 = vmul.f32 %v704_v22, %v401_v25  ;;  %v713_v19 = vld [vmem:[%s874_s9 + $0x30] sm:$0xff]  ;;  %v714_v22 = vld [vmem:[%s865_s30 + $0x38] sm:$0xff] }
  0x1a   : > { %v422_v49 = vmul.f32 %v707_v41, %v421_v37  ;;  %v441_v50 = vrot.slane %v888_v7, %v434_v31  ;;  %v424_v52 = vmul.f32 %v707_v41, %v415_v30  ;;  %v436_v55 = vmul.f32 %v708_v45, %v435_v43  ;;  %v715_v30 = vld [vmem:[%s874_s9 + $0x38] sm:$0xff] }
  0x1b   : > { %v377_v28 = vadd.f32 %v376_v21, %v363_v23  ;;  %v385_v39 = vadd.f32 %v384_v27, %v367_v26  ;;  %v455_v56 = vrot.slane %v886_v6, %v454_v38  ;;  %v426_v60 = vmul.f32 %v706_v34, %v421_v37 }
  0x1c   : > { %v442_v62 = vmul.f32 %v709_v54, %v441_v50  ;;  %v461_v63 = vrot.slane %v888_v7, %v454_v38  ;;  %v444_v2 = vmul.f32 %v709_v54, %v435_v43  ;;  %v475_v8 = vrot.slane %v886_v6, %v474_v57 }
  0x1d   : > { %v383_v35 = vsub.f32 %v377_v28, %v382_v24  ;;  %v387_v46 = vadd.f32 %v386_v32, %v385_v39  ;;  %v456_v5 = vmul.f32 %v710_v58, %v455_v56  ;;  %v494_v9 = vsub.s32 7, %v860_v1 }
  0x1e   : > { %v446_v12 = vmul.f32 %v708_v45, %v441_v50  ;;  %v462_v14 = vmul.f32 %v711_v4, %v461_v63  ;;  %v481_v15 = vrot.slane %v888_v7, %v474_v57  ;;  %v464_v17 = vmul.f32 %v711_v4, %v455_v56 }
  0x1f   : > { %v397_v40 = vadd.f32 %v396_v29, %v383_v35  ;;  %v405_v51 = vadd.f32 %v404_v44, %v387_v46  ;;  %v476_v20 = vmul.f32 %v712_v10, %v475_v8  ;;  %v495_v21 = vrot.slane %v886_v6, %v494_v9 }
  0x20   : > { %v466_v24 = vmul.f32 %v710_v58, %v461_v63  ;;  %v482_v25 = vmul.f32 %v713_v19, %v481_v15  ;;  %v501_v26 = vrot.slane %v888_v7, %v494_v9  ;;  %v484_v28 = vmul.f32 %v713_v19, %v475_v8 }
  0x21   : > { %v403_v48 = vsub.f32 %v397_v40, %v402_v36  ;;  %v407_v59 = vadd.f32 %v406_v47, %v405_v51  ;;  %v496_v31 = vmul.f32 %v714_v22, %v495_v21  ;;  %v486_v33 = vmul.f32 %v712_v10, %v481_v15 }
  0x22   : > { %v502_v35 = vmul.f32 %v715_v30, %v501_v26  ;;  %v504_v6 = vmul.f32 %v715_v30, %v495_v21  ;;  %v506_v39 = vmul.f32 %v714_v22, %v501_v26 }
  0x23   : > { %v417_v53 = vadd.f32 %v416_v42, %v403_v48  ;;  %v425_v0 = vadd.f32 %v424_v52, %v407_v59 }
  0x25   : > { %v423_v61 = vsub.f32 %v417_v53, %v422_v49  ;;  %v427_v11 = vadd.f32 %v426_v60, %v425_v0 }
  0x27   : > { %v437_v3 = vadd.f32 %v436_v55, %v423_v61  ;;  %v445_v16 = vadd.f32 %v444_v2, %v427_v11 }
  0x29   : > { %v443_v13 = vsub.f32 %v437_v3, %v442_v62  ;;  %v447_v23 = vadd.f32 %v446_v12, %v445_v16 }
  0x2b   : > { %v457_v18 = vadd.f32 %v456_v5, %v443_v13  ;;  %v465_v27 = vadd.f32 %v464_v17, %v447_v23 }
  0x2d   : > { %v463_v1 = vsub.f32 %v457_v18, %v462_v14  ;;  %v467_v32 = vadd.f32 %v466_v24, %v465_v27 }
  0x2f   : > { %v477_v29 = vadd.f32 %v476_v20, %v463_v1  ;;  %v485_v36 = vadd.f32 %v484_v28, %v467_v32 }
  0x31   : > { %v483_v34 = vsub.f32 %v477_v29, %v482_v25  ;;  %v487_v38 = vadd.f32 %v486_v33, %v485_v36 }
  0x33   : > { %v497_v37 = vadd.f32 %v496_v31, %v483_v34  ;;  %v505_v40 = vadd.f32 %v504_v6, %v487_v38 }
  0x35   : > { %v503_v7 = vsub.f32 %v497_v37, %v502_v35  ;;  %v507_v41 = vadd.f32 %v506_v39, %v505_v40 }
  0x37   : > { %508 = vst [vmem:[%s339_s18] sm:$0xff] %v503_v7  ;;  %509 = vst [vmem:[%s347_s26] sm:$0xff] %v507_v41 }
  0x38 PF: > { %s16_s22 = sadd.s32 1, %s798_s22   ;;  %s955_s18 = smov %s790_s20 }
  0x39   : > { %p13_p7 = scmp.ge.s32.totalorder %s16_s22, 10   ;;  %s956_s19 = smov %s794_s21 }
  0x3a   : > { %s957_s20 = smov %s960_s23  ;;  %s958_s21 = smov %s964_s24 }
  0x3b   :  { %15 = sbr.rel (!%p13_p7) target bundleno = 3 (0x3), region = 101 }

// kernel: squeeze.24
= control target key start
LH: loop header
LB: loop body
LE: loop exit
PB: predicated region body
PF: predicated region fallthrough
CT: control target
= control target key end

     0   :  { %vm3_vm0 = vcmask 48128   ;;  %s1258_s10 = smov 122   ;;  %s1259_s11 = smov 110   ;;  %s1736_s0 = inlined_call_operand.vmem [shape: f32[1,2,8,96], index: 0, kind: input, shape index: {}]   ;;  %s1737_s1 = inlined_call_operand.vmem [shape: f32[2,8,4,4,6], index: 1, kind: output, shape index: {}]  }
   0x1   :  { %v79_v0 = vld [vmem:[%s1736_s0] sm:$0xff]   ;;  %v1165_v1 = vld [vmem:[%s1736_s0 + $0x8] sm:$0xff]   ;;  %s1257_s0 = smov 116   ;;  %s1260_s12 = smov 104  }
   0x2   :  { %80 = vrot.lane.b32.xlu1 %v79_v0, %s1257_s0  ;;  %39 = vrot.lane.b32.xlu0 %v79_v0, %s1258_s10  ;;  %6 = vst.msk [vmem:[#allocation0 + $0x1f] sm:$0x2] %vm3_vm0, %v79_v0   ;;  %10 = vst.msk [vmem:[#allocation0 + $0x5d] sm:$0x8] %vm3_vm0, %v79_v0   ;;  %s1261_s13 = smov 98   ;;  %s1262_s14 = smov 92  }
   0x3   :  { %12 = vst.msk [vmem:[#allocation0 + $0x7c] sm:$0x10] %vm3_vm0, %v79_v0   ;;  %14 = vst.msk [vmem:[#allocation0 + $0x9b] sm:$0x20] %vm3_vm0, %v79_v0   ;;  %s1263_s15 = smov 86   ;;  %s1264_s16 = smov 80  }
   0x4   :  { %16 = vst.msk [vmem:[#allocation0 + $0xba] sm:$0x40] %vm3_vm0, %v79_v0   ;;  %4 = vst.msk [vmem:[#allocation0] sm:$0x1] %vm3_vm0, %v79_v0   ;;  %s1265_s17 = smov 74   ;;  %s1266_s18 = smov 68  }
   0x5   :  { %8 = vst.msk [vmem:[#allocation0 + $0x3e] sm:$0x4] %vm3_vm0, %v79_v0   ;;  %18 = vst.msk [vmem:[#allocation0 + $0xd9] sm:$0x80] %vm3_vm0, %v79_v0   ;;  %s1267_s19 = smov 62   ;;  %s1268_s20 = smov 56  }
   0x6   :  { %25 = vst.msk [vmem:[#allocation0 + $0x11f] sm:$0x2] %vm3_vm0, %v1165_v1   ;;  %27 = vst.msk [vmem:[#allocation0 + $0x13e] sm:$0x4] %vm3_vm0, %v1165_v1   ;;  %101 = vrot.lane.b32.xlu1 %v1165_v1, %s1257_s0  ;;  %60 = vrot.lane.b32.xlu0 %v1165_v1, %s1258_s10  ;;  %s1269_s21 = smov 50   ;;  %s1270_s22 = smov 44  }
   0x7   :  { %29 = vst.msk [vmem:[#allocation0 + $0x15d] sm:$0x8] %vm3_vm0, %v1165_v1   ;;  %31 = vst.msk [vmem:[#allocation0 + $0x17c] sm:$0x10] %vm3_vm0, %v1165_v1   ;;  %s1271_s23 = smov 38  }
   0x8   :  { %33 = vst.msk [vmem:[#allocation0 + $0x19b] sm:$0x20] %vm3_vm0, %v1165_v1   ;;  %35 = vst.msk [vmem:[#allocation0 + $0x1ba] sm:$0x40] %vm3_vm0, %v1165_v1  }
   0x9   :  { %37 = vst.msk [vmem:[#allocation0 + $0x1d9] sm:$0x80] %vm3_vm0, %v1165_v1   ;;  %23 = vst.msk [vmem:[#allocation0 + $0x100] sm:$0x1] %vm3_vm0, %v1165_v1  }
   0xa   :  { %142 = vrot.lane.b32.xlu1 %v1165_v1, %s1259_s11  ;;  %121 = vrot.lane.b32.xlu0 %v79_v0, %s1259_s11 }
   0xe   :  { %183 = vrot.lane.b32.xlu1 %v1165_v1, %s1260_s12  ;;  %162 = vrot.lane.b32.xlu0 %v79_v0, %s1260_s12 }
  0x12   :  { %224 = vrot.lane.b32.xlu1 %v1165_v1, %s1261_s13  ;;  %203 = vrot.lane.b32.xlu0 %v79_v0, %s1261_s13 }
  0x16   :  { %265 = vrot.lane.b32.xlu1 %v1165_v1, %s1262_s14  ;;  %244 = vrot.lane.b32.xlu0 %v79_v0, %s1262_s14 }
  0x1a   :  { %306 = vrot.lane.b32.xlu1 %v1165_v1, %s1263_s15  ;;  %285 = vrot.lane.b32.xlu0 %v79_v0, %s1263_s15 }
  0x1e   :  { %347 = vrot.lane.b32.xlu1 %v1165_v1, %s1264_s16  ;;  %326 = vrot.lane.b32.xlu0 %v79_v0, %s1264_s16 }
  0x22   :  { %388 = vrot.lane.b32.xlu1 %v1165_v1, %s1265_s17  ;;  %367 = vrot.lane.b32.xlu0 %v79_v0, %s1265_s17 }
  0x26   :  { %429 = vrot.lane.b32.xlu1 %v1165_v1, %s1266_s18  ;;  %408 = vrot.lane.b32.xlu0 %v79_v0, %s1266_s18 }
  0x2a   :  { %470 = vrot.lane.b32.xlu1 %v1165_v1, %s1267_s19  ;;  %449 = vrot.lane.b32.xlu0 %v79_v0, %s1267_s19 }
  0x2e   :  { %511 = vrot.lane.b32.xlu1 %v1165_v1, %s1268_s20  ;;  %490 = vrot.lane.b32.xlu0 %v79_v0, %s1268_s20 }
  0x32   :  { %552 = vrot.lane.b32.xlu1 %v1165_v1, %s1269_s21  ;;  %531 = vrot.lane.b32.xlu0 %v79_v0, %s1269_s21 }
  0x36   :  { %593 = vrot.lane.b32.xlu1 %v1165_v1, %s1270_s22  ;;  %572 = vrot.lane.b32.xlu0 %v79_v0, %s1270_s22 }
  0x3a   :  { %634 = vrot.lane.b32.xlu1 %v1165_v1, %s1271_s23  ;;  %613 = vrot.lane.b32.xlu0 %v79_v0, %s1271_s23 }
  0x74   :  { %v81_v2 = vpop.permute.xlu1 %80   ;;  %v40_v3 = vpop.permute.xlu0 %39  }
  0x75   :  { %84 = vst.msk [vmem:[#allocation0 + $0x2] sm:$0x1] %vm3_vm0, %v81_v2   ;;  %86 = vst.msk [vmem:[#allocation0 + $0x21] sm:$0x2] %vm3_vm0, %v81_v2  }
  0x76   :  { %88 = vst.msk [vmem:[#allocation0 + $0x40] sm:$0x4] %vm3_vm0, %v81_v2   ;;  %90 = vst.msk [vmem:[#allocation0 + $0x5f] sm:$0x8] %vm3_vm0, %v81_v2  }
  0x77   :  { %92 = vst.msk [vmem:[#allocation0 + $0x7e] sm:$0x10] %vm3_vm0, %v81_v2   ;;  %94 = vst.msk [vmem:[#allocation0 + $0x9d] sm:$0x20] %vm3_vm0, %v81_v2  }
  0x78   :  { %96 = vst.msk [vmem:[#allocation0 + $0xbc] sm:$0x40] %vm3_vm0, %v81_v2   ;;  %98 = vst.msk [vmem:[#allocation0 + $0xdb] sm:$0x80] %vm3_vm0, %v81_v2   ;;  %v102_v4 = vpop.permute.xlu1 %101   ;;  %v61_v5 = vpop.permute.xlu0 %60  }
  0x79   :  { %43 = vst.msk [vmem:[#allocation0 + $0x1] sm:$0x1] %vm3_vm0, %v40_v3   ;;  %45 = vst.msk [vmem:[#allocation0 + $0x20] sm:$0x2] %vm3_vm0, %v40_v3  }
  0x7a   :  { %47 = vst.msk [vmem:[#allocation0 + $0x3f] sm:$0x4] %vm3_vm0, %v40_v3   ;;  %49 = vst.msk [vmem:[#allocation0 + $0x5e] sm:$0x8] %vm3_vm0, %v40_v3  }
  0x7b   :  { %51 = vst.msk [vmem:[#allocation0 + $0x7d] sm:$0x10] %vm3_vm0, %v40_v3   ;;  %53 = vst.msk [vmem:[#allocation0 + $0x9c] sm:$0x20] %vm3_vm0, %v40_v3  }
  0x7c   :  { %55 = vst.msk [vmem:[#allocation0 + $0xbb] sm:$0x40] %vm3_vm0, %v40_v3   ;;  %57 = vst.msk [vmem:[#allocation0 + $0xda] sm:$0x80] %vm3_vm0, %v40_v3   ;;  %v143_v6 = vpop.permute.xlu1 %142   ;;  %v122_v7 = vpop.permute.xlu0 %121  }
  0x7d   :  { %105 = vst.msk [vmem:[#allocation0 + $0x102] sm:$0x1] %vm3_vm0, %v102_v4   ;;  %107 = vst.msk [vmem:[#allocation0 + $0x121] sm:$0x2] %vm3_vm0, %v102_v4  }
  0x7e   :  { %109 = vst.msk [vmem:[#allocation0 + $0x140] sm:$0x4] %vm3_vm0, %v102_v4   ;;  %111 = vst.msk [vmem:[#allocation0 + $0x15f] sm:$0x8] %vm3_vm0, %v102_v4  }
  0x7f   :  { %113 = vst.msk [vmem:[#allocation0 + $0x17e] sm:$0x10] %vm3_vm0, %v102_v4   ;;  %115 = vst.msk [vmem:[#allocation0 + $0x19d] sm:$0x20] %vm3_vm0, %v102_v4  }
  0x80   :  { %117 = vst.msk [vmem:[#allocation0 + $0x1bc] sm:$0x40] %vm3_vm0, %v102_v4   ;;  %119 = vst.msk [vmem:[#allocation0 + $0x1db] sm:$0x80] %vm3_vm0, %v102_v4   ;;  %v184_v8 = vpop.permute.xlu1 %183   ;;  %v163_v9 = vpop.permute.xlu0 %162  }
  0x81   :  { %64 = vst.msk [vmem:[#allocation0 + $0x101] sm:$0x1] %vm3_vm0, %v61_v5   ;;  %66 = vst.msk [vmem:[#allocation0 + $0x120] sm:$0x2] %vm3_vm0, %v61_v5  }
  0x82   :  { %68 = vst.msk [vmem:[#allocation0 + $0x13f] sm:$0x4] %vm3_vm0, %v61_v5   ;;  %70 = vst.msk [vmem:[#allocation0 + $0x15e] sm:$0x8] %vm3_vm0, %v61_v5  }
  0x83   :  { %72 = vst.msk [vmem:[#allocation0 + $0x17d] sm:$0x10] %vm3_vm0, %v61_v5   ;;  %74 = vst.msk [vmem:[#allocation0 + $0x19c] sm:$0x20] %vm3_vm0, %v61_v5  }
  0x84   :  { %76 = vst.msk [vmem:[#allocation0 + $0x1bb] sm:$0x40] %vm3_vm0, %v61_v5   ;;  %78 = vst.msk [vmem:[#allocation0 + $0x1da] sm:$0x80] %vm3_vm0, %v61_v5   ;;  %v225_v13 = vpop.permute.xlu1 %224   ;;  %v204_v14 = vpop.permute.xlu0 %203  }
  0x85   :  { %146 = vst.msk [vmem:[#allocation0 + $0x103] sm:$0x1] %vm3_vm0, %v143_v6   ;;  %148 = vst.msk [vmem:[#allocation0 + $0x122] sm:$0x2] %vm3_vm0, %v143_v6  }
  0x86   :  { %150 = vst.msk [vmem:[#allocation0 + $0x141] sm:$0x4] %vm3_vm0, %v143_v6   ;;  %152 = vst.msk [vmem:[#allocation0 + $0x160] sm:$0x8] %vm3_vm0, %v143_v6  }
  0x87   :  { %154 = vst.msk [vmem:[#allocation0 + $0x17f] sm:$0x10] %vm3_vm0, %v143_v6   ;;  %156 = vst.msk [vmem:[#allocation0 + $0x19e] sm:$0x20] %vm3_vm0, %v143_v6  }
  0x88   :  { %158 = vst.msk [vmem:[#allocation0 + $0x1bd] sm:$0x40] %vm3_vm0, %v143_v6   ;;  %160 = vst.msk [vmem:[#allocation0 + $0x1dc] sm:$0x80] %vm3_vm0, %v143_v6   ;;  %v266_v27 = vpop.permute.xlu1 %265   ;;  %v245_v28 = vpop.permute.xlu0 %244  }
  0x89   :  { %125 = vst.msk [vmem:[#allocation0 + $0x3] sm:$0x1] %vm3_vm0, %v122_v7   ;;  %127 = vst.msk [vmem:[#allocation0 + $0x22] sm:$0x2] %vm3_vm0, %v122_v7  }
  0x8a   :  { %129 = vst.msk [vmem:[#allocation0 + $0x41] sm:$0x4] %vm3_vm0, %v122_v7   ;;  %131 = vst.msk [vmem:[#allocation0 + $0x60] sm:$0x8] %vm3_vm0, %v122_v7  }
  0x8b   :  { %133 = vst.msk [vmem:[#allocation0 + $0x7f] sm:$0x10] %vm3_vm0, %v122_v7   ;;  %135 = vst.msk [vmem:[#allocation0 + $0x9e] sm:$0x20] %vm3_vm0, %v122_v7  }
  0x8c   :  { %137 = vst.msk [vmem:[#allocation0 + $0xbd] sm:$0x40] %vm3_vm0, %v122_v7   ;;  %139 = vst.msk [vmem:[#allocation0 + $0xdc] sm:$0x80] %vm3_vm0, %v122_v7   ;;  %v878_v10 = vld [vmem:[#allocation0 + $0x100] sm:$0xf]  ;;  %v307_v30 = vpop.permute.xlu1 %306   ;;  %v286_v31 = vpop.permute.xlu0 %285  }
  0x8d   :  { %187 = vst.msk [vmem:[#allocation0 + $0x108] sm:$0x1] %vm3_vm0, %v184_v8   ;;  %189 = vst.msk [vmem:[#allocation0 + $0x127] sm:$0x2] %vm3_vm0, %v184_v8   ;;  %v906_v11 = vld [vmem:[#allocation0 + $0x120] sm:$0xf] }
  0x8e   :  { %191 = vst.msk [vmem:[#allocation0 + $0x146] sm:$0x4] %vm3_vm0, %v184_v8   ;;  %193 = vst.msk [vmem:[#allocation0 + $0x165] sm:$0x8] %vm3_vm0, %v184_v8   ;;  %v934_v12 = vld [vmem:[#allocation0 + $0x140] sm:$0xf] }
  0x8f   :  { %195 = vst.msk [vmem:[#allocation0 + $0x184] sm:$0x10] %vm3_vm0, %v184_v8   ;;  %197 = vst.msk [vmem:[#allocation0 + $0x1a3] sm:$0x20] %vm3_vm0, %v184_v8   ;;  %v962_v15 = vld [vmem:[#allocation0 + $0x160] sm:$0xf] }
  0x90   :  { %199 = vst.msk [vmem:[#allocation0 + $0x1c2] sm:$0x40] %vm3_vm0, %v184_v8   ;;  %201 = vst.msk [vmem:[#allocation0 + $0x1e1] sm:$0x80] %vm3_vm0, %v184_v8   ;;  %v990_v16 = vld [vmem:[#allocation0 + $0x180] sm:$0xf]  ;;  %v348_v32 = vpop.permute.xlu1 %347   ;;  %v327_v33 = vpop.permute.xlu0 %326  }
  0x91   :  { %166 = vst.msk [vmem:[#allocation0 + $0x8] sm:$0x1] %vm3_vm0, %v163_v9   ;;  %168 = vst.msk [vmem:[#allocation0 + $0x27] sm:$0x2] %vm3_vm0, %v163_v9   ;;  %v1018_v17 = vld [vmem:[#allocation0 + $0x1a0] sm:$0xf] }
  0x92   :  { %170 = vst.msk [vmem:[#allocation0 + $0x46] sm:$0x4] %vm3_vm0, %v163_v9   ;;  %172 = vst.msk [vmem:[#allocation0 + $0x65] sm:$0x8] %vm3_vm0, %v163_v9   ;;  %v1046_v18 = vld [vmem:[#allocation0 + $0x1c0] sm:$0xf] }
  0x93   :  { %174 = vst.msk [vmem:[#allocation0 + $0x84] sm:$0x10] %vm3_vm0, %v163_v9   ;;  %176 = vst.msk [vmem:[#allocation0 + $0xa3] sm:$0x20] %vm3_vm0, %v163_v9   ;;  %v1074_v19 = vld [vmem:[#allocation0 + $0x1e0] sm:$0xf] }
  0x94   :  { %178 = vst.msk [vmem:[#allocation0 + $0xc2] sm:$0x40] %vm3_vm0, %v163_v9   ;;  %180 = vst.msk [vmem:[#allocation0 + $0xe1] sm:$0x80] %vm3_vm0, %v163_v9   ;;  %v657_v20 = vld [vmem:[#allocation0] sm:$0xf]  ;;  %v389_v37 = vpop.permute.xlu1 %388   ;;  %v368_v38 = vpop.permute.xlu0 %367  }
  0x95   :  { %1210 = vst [vmem:[%s1737_s1 + $0x80] sm:$0xf] %v878_v10  ;;  %1214 = vst [vmem:[%s1737_s1 + $0x90] sm:$0xf] %v906_v11  ;;  %v682_v21 = vld [vmem:[#allocation0 + $0x20] sm:$0xf] }
  0x96   :  { %1218 = vst [vmem:[%s1737_s1 + $0xa0] sm:$0xf] %v934_v12  ;;  %228 = vst.msk [vmem:[#allocation0 + $0x109] sm:$0x1] %vm3_vm0, %v225_v13   ;;  %v710_v22 = vld [vmem:[#allocation0 + $0x40] sm:$0xf] }
  0x97   :  { %230 = vst.msk [vmem:[#allocation0 + $0x128] sm:$0x2] %vm3_vm0, %v225_v13   ;;  %232 = vst.msk [vmem:[#allocation0 + $0x147] sm:$0x4] %vm3_vm0, %v225_v13   ;;  %v738_v23 = vld [vmem:[#allocation0 + $0x60] sm:$0xf] }
  0x98   :  { %234 = vst.msk [vmem:[#allocation0 + $0x166] sm:$0x8] %vm3_vm0, %v225_v13   ;;  %236 = vst.msk [vmem:[#allocation0 + $0x185] sm:$0x10] %vm3_vm0, %v225_v13   ;;  %v766_v24 = vld [vmem:[#allocation0 + $0x80] sm:$0xf]  ;;  %v430_v51 = vpop.permute.xlu1 %429   ;;  %v409_v52 = vpop.permute.xlu0 %408  }
  0x99   :  { %238 = vst.msk [vmem:[#allocation0 + $0x1a4] sm:$0x20] %vm3_vm0, %v225_v13   ;;  %240 = vst.msk [vmem:[#allocation0 + $0x1c3] sm:$0x40] %vm3_vm0, %v225_v13   ;;  %v794_v25 = vld [vmem:[#allocation0 + $0xa0] sm:$0xf] }
  0x9a   :  { %242 = vst.msk [vmem:[#allocation0 + $0x1e2] sm:$0x80] %vm3_vm0, %v225_v13   ;;  %207 = vst.msk [vmem:[#allocation0 + $0x9] sm:$0x1] %vm3_vm0, %v204_v14   ;;  %v822_v26 = vld [vmem:[#allocation0 + $0xc0] sm:$0xf] }
  0x9b   :  { %209 = vst.msk [vmem:[#allocation0 + $0x28] sm:$0x2] %vm3_vm0, %v204_v14   ;;  %211 = vst.msk [vmem:[#allocation0 + $0x47] sm:$0x4] %vm3_vm0, %v204_v14   ;;  %v850_v29 = vld [vmem:[#allocation0 + $0xe0] sm:$0xf] }
  0x9c   :  { %213 = vst.msk [vmem:[#allocation0 + $0x66] sm:$0x8] %vm3_vm0, %v204_v14   ;;  %215 = vst.msk [vmem:[#allocation0 + $0x85] sm:$0x10] %vm3_vm0, %v204_v14   ;;  %v471_v54 = vpop.permute.xlu1 %470   ;;  %v450_v55 = vpop.permute.xlu0 %449  }
  0x9d   :  { %217 = vst.msk [vmem:[#allocation0 + $0xa4] sm:$0x20] %vm3_vm0, %v204_v14   ;;  %219 = vst.msk [vmem:[#allocation0 + $0xc3] sm:$0x40] %vm3_vm0, %v204_v14  }
  0x9e   :  { %221 = vst.msk [vmem:[#allocation0 + $0xe2] sm:$0x80] %vm3_vm0, %v204_v14   ;;  %1222 = vst [vmem:[%s1737_s1 + $0xb0] sm:$0xf] %v962_v15 }
  0x9f   :  { %1226 = vst [vmem:[%s1737_s1 + $0xc0] sm:$0xf] %v990_v16  ;;  %1230 = vst [vmem:[%s1737_s1 + $0xd0] sm:$0xf] %v1018_v17 }
  0xa0   :  { %660 = vst [vmem:[%s1737_s1] sm:$0xf] %v657_v20  ;;  %1234 = vst [vmem:[%s1737_s1 + $0xe0] sm:$0xf] %v1046_v18  ;;  %v512_v56 = vpop.permute.xlu1 %511   ;;  %v491_v57 = vpop.permute.xlu0 %490  }
  0xa1   :  { %1238 = vst [vmem:[%s1737_s1 + $0xf0] sm:$0xf] %v1074_v19  ;;  %1182 = vst [vmem:[%s1737_s1 + $0x10] sm:$0xf] %v682_v21 }
  0xa2   :  { %1186 = vst [vmem:[%s1737_s1 + $0x20] sm:$0xf] %v710_v22  ;;  %1190 = vst [vmem:[%s1737_s1 + $0x30] sm:$0xf] %v738_v23 }
  0xa3   :  { %1194 = vst [vmem:[%s1737_s1 + $0x40] sm:$0xf] %v766_v24  ;;  %1198 = vst [vmem:[%s1737_s1 + $0x50] sm:$0xf] %v794_v25 }
  0xa4   :  { %1202 = vst [vmem:[%s1737_s1 + $0x60] sm:$0xf] %v822_v26  ;;  %269 = vst.msk [vmem:[#allocation0 + $0x10a] sm:$0x1] %vm3_vm0, %v266_v27   ;;  %v553_v61 = vpop.permute.xlu1 %552   ;;  %v532_v62 = vpop.permute.xlu0 %531  }
  0xa5   :  { %271 = vst.msk [vmem:[#allocation0 + $0x129] sm:$0x2] %vm3_vm0, %v266_v27   ;;  %273 = vst.msk [vmem:[#allocation0 + $0x148] sm:$0x4] %vm3_vm0, %v266_v27  }
  0xa6   :  { %275 = vst.msk [vmem:[#allocation0 + $0x167] sm:$0x8] %vm3_vm0, %v266_v27   ;;  %277 = vst.msk [vmem:[#allocation0 + $0x186] sm:$0x10] %vm3_vm0, %v266_v27  }
  0xa7   :  { %279 = vst.msk [vmem:[#allocation0 + $0x1a5] sm:$0x20] %vm3_vm0, %v266_v27   ;;  %281 = vst.msk [vmem:[#allocation0 + $0x1c4] sm:$0x40] %vm3_vm0, %v266_v27  }
  0xa8   :  { %283 = vst.msk [vmem:[#allocation0 + $0x1e3] sm:$0x80] %vm3_vm0, %v266_v27   ;;  %248 = vst.msk [vmem:[#allocation0 + $0xa] sm:$0x1] %vm3_vm0, %v245_v28   ;;  %v594_v11 = vpop.permute.xlu1 %593   ;;  %v573_v12 = vpop.permute.xlu0 %572  }
  0xa9   :  { %250 = vst.msk [vmem:[#allocation0 + $0x29] sm:$0x2] %vm3_vm0, %v245_v28   ;;  %252 = vst.msk [vmem:[#allocation0 + $0x48] sm:$0x4] %vm3_vm0, %v245_v28  }
  0xaa   :  { %254 = vst.msk [vmem:[#allocation0 + $0x67] sm:$0x8] %vm3_vm0, %v245_v28   ;;  %256 = vst.msk [vmem:[#allocation0 + $0x86] sm:$0x10] %vm3_vm0, %v245_v28  }
  0xab   :  { %258 = vst.msk [vmem:[#allocation0 + $0xa5] sm:$0x20] %vm3_vm0, %v245_v28   ;;  %260 = vst.msk [vmem:[#allocation0 + $0xc4] sm:$0x40] %vm3_vm0, %v245_v28  }
  0xac   :  { %262 = vst.msk [vmem:[#allocation0 + $0xe3] sm:$0x80] %vm3_vm0, %v245_v28   ;;  %1206 = vst [vmem:[%s1737_s1 + $0x70] sm:$0xf] %v850_v29  ;;  %v635_v14 = vpop.permute.xlu1 %634   ;;  %v614_v15 = vpop.permute.xlu0 %613  }
  0xad   :  { %310 = vst.msk [vmem:[#allocation0 + $0x10b] sm:$0x1] %vm3_vm0, %v307_v30   ;;  %312 = vst.msk [vmem:[#allocation0 + $0x12a] sm:$0x2] %vm3_vm0, %v307_v30  }
  0xae   :  { %314 = vst.msk [vmem:[#allocation0 + $0x149] sm:$0x4] %vm3_vm0, %v307_v30   ;;  %316 = vst.msk [vmem:[#allocation0 + $0x168] sm:$0x8] %vm3_vm0, %v307_v30  }
  0xaf   :  { %318 = vst.msk [vmem:[#allocation0 + $0x187] sm:$0x10] %vm3_vm0, %v307_v30   ;;  %320 = vst.msk [vmem:[#allocation0 + $0x1a6] sm:$0x20] %vm3_vm0, %v307_v30  }
  0xb0   :  { %322 = vst.msk [vmem:[#allocation0 + $0x1c5] sm:$0x40] %vm3_vm0, %v307_v30   ;;  %324 = vst.msk [vmem:[#allocation0 + $0x1e4] sm:$0x80] %vm3_vm0, %v307_v30  }
  0xb1   :  { %289 = vst.msk [vmem:[#allocation0 + $0xb] sm:$0x1] %vm3_vm0, %v286_v31   ;;  %291 = vst.msk [vmem:[#allocation0 + $0x2a] sm:$0x2] %vm3_vm0, %v286_v31  }
  0xb2   :  { %293 = vst.msk [vmem:[#allocation0 + $0x49] sm:$0x4] %vm3_vm0, %v286_v31   ;;  %295 = vst.msk [vmem:[#allocation0 + $0x68] sm:$0x8] %vm3_vm0, %v286_v31  }
  0xb3   :  { %297 = vst.msk [vmem:[#allocation0 + $0x87] sm:$0x10] %vm3_vm0, %v286_v31   ;;  %299 = vst.msk [vmem:[#allocation0 + $0xa6] sm:$0x20] %vm3_vm0, %v286_v31  }
  0xb4   :  { %301 = vst.msk [vmem:[#allocation0 + $0xc5] sm:$0x40] %vm3_vm0, %v286_v31   ;;  %303 = vst.msk [vmem:[#allocation0 + $0xe4] sm:$0x80] %vm3_vm0, %v286_v31   ;;  %v885_v36 = vld [vmem:[#allocation0 + $0x108] sm:$0xf] }
  0xb5   :  { %351 = vst.msk [vmem:[#allocation0 + $0x110] sm:$0x1] %vm3_vm0, %v348_v32   ;;  %353 = vst.msk [vmem:[#allocation0 + $0x12f] sm:$0x2] %vm3_vm0, %v348_v32   ;;  %v913_v39 = vld [vmem:[#allocation0 + $0x128] sm:$0xf] }
  0xb6   :  { %355 = vst.msk [vmem:[#allocation0 + $0x14e] sm:$0x4] %vm3_vm0, %v348_v32   ;;  %357 = vst.msk [vmem:[#allocation0 + $0x16d] sm:$0x8] %vm3_vm0, %v348_v32   ;;  %v997_v34 = vld [vmem:[#allocation0 + $0x188] sm:$0xf] }
  0xb7   :  { %359 = vst.msk [vmem:[#allocation0 + $0x18c] sm:$0x10] %vm3_vm0, %v348_v32   ;;  %361 = vst.msk [vmem:[#allocation0 + $0x1ab] sm:$0x20] %vm3_vm0, %v348_v32   ;;  %v1025_v35 = vld [vmem:[#allocation0 + $0x1a8] sm:$0xf] }
  0xb8   :  { %363 = vst.msk [vmem:[#allocation0 + $0x1ca] sm:$0x40] %vm3_vm0, %v348_v32   ;;  %365 = vst.msk [vmem:[#allocation0 + $0x1e9] sm:$0x80] %vm3_vm0, %v348_v32   ;;  %v941_v40 = vld [vmem:[#allocation0 + $0x148] sm:$0xf] }
  0xb9   :  { %330 = vst.msk [vmem:[#allocation0 + $0x10] sm:$0x1] %vm3_vm0, %v327_v33   ;;  %332 = vst.msk [vmem:[#allocation0 + $0x2f] sm:$0x2] %vm3_vm0, %v327_v33   ;;  %v969_v41 = vld [vmem:[#allocation0 + $0x168] sm:$0xf] }
  0xba   :  { %334 = vst.msk [vmem:[#allocation0 + $0x4e] sm:$0x4] %vm3_vm0, %v327_v33   ;;  %336 = vst.msk [vmem:[#allocation0 + $0x6d] sm:$0x8] %vm3_vm0, %v327_v33   ;;  %v1053_v42 = vld [vmem:[#allocation0 + $0x1c8] sm:$0xf] }
  0xbb   :  { %338 = vst.msk [vmem:[#allocation0 + $0x8c] sm:$0x10] %vm3_vm0, %v327_v33   ;;  %340 = vst.msk [vmem:[#allocation0 + $0xab] sm:$0x20] %vm3_vm0, %v327_v33   ;;  %v1081_v43 = vld [vmem:[#allocation0 + $0x1e8] sm:$0xf] }
  0xbc   :  { %342 = vst.msk [vmem:[#allocation0 + $0xca] sm:$0x40] %vm3_vm0, %v327_v33   ;;  %344 = vst.msk [vmem:[#allocation0 + $0xe9] sm:$0x80] %vm3_vm0, %v327_v33   ;;  %v662_v44 = vld [vmem:[#allocation0 + $0x8] sm:$0xf] }
  0xbd   :  { %1227 = vst [vmem:[%s1737_s1 + $0xc4] sm:$0xf] %v997_v34  ;;  %1231 = vst [vmem:[%s1737_s1 + $0xd4] sm:$0xf] %v1025_v35  ;;  %v689_v45 = vld [vmem:[#allocation0 + $0x28] sm:$0xf] }
  0xbe   :  { %1211 = vst [vmem:[%s1737_s1 + $0x84] sm:$0xf] %v885_v36  ;;  %392 = vst.msk [vmem:[#allocation0 + $0x111] sm:$0x1] %vm3_vm0, %v389_v37   ;;  %v717_v46 = vld [vmem:[#allocation0 + $0x48] sm:$0xf] }
  0xbf   :  { %394 = vst.msk [vmem:[#allocation0 + $0x130] sm:$0x2] %vm3_vm0, %v389_v37   ;;  %396 = vst.msk [vmem:[#allocation0 + $0x14f] sm:$0x4] %vm3_vm0, %v389_v37   ;;  %v745_v47 = vld [vmem:[#allocation0 + $0x68] sm:$0xf] }
  0xc0   :  { %398 = vst.msk [vmem:[#allocation0 + $0x16e] sm:$0x8] %vm3_vm0, %v389_v37   ;;  %400 = vst.msk [vmem:[#allocation0 + $0x18d] sm:$0x10] %vm3_vm0, %v389_v37   ;;  %v773_v48 = vld [vmem:[#allocation0 + $0x88] sm:$0xf] }
  0xc1   :  { %402 = vst.msk [vmem:[#allocation0 + $0x1ac] sm:$0x20] %vm3_vm0, %v389_v37   ;;  %404 = vst.msk [vmem:[#allocation0 + $0x1cb] sm:$0x40] %vm3_vm0, %v389_v37   ;;  %v801_v49 = vld [vmem:[#allocation0 + $0xa8] sm:$0xf] }
  0xc2   :  { %406 = vst.msk [vmem:[#allocation0 + $0x1ea] sm:$0x80] %vm3_vm0, %v389_v37   ;;  %371 = vst.msk [vmem:[#allocation0 + $0x11] sm:$0x1] %vm3_vm0, %v368_v38   ;;  %v829_v50 = vld [vmem:[#allocation0 + $0xc8] sm:$0xf] }
  0xc3   :  { %373 = vst.msk [vmem:[#allocation0 + $0x30] sm:$0x2] %vm3_vm0, %v368_v38   ;;  %375 = vst.msk [vmem:[#allocation0 + $0x4f] sm:$0x4] %vm3_vm0, %v368_v38   ;;  %v857_v53 = vld [vmem:[#allocation0 + $0xe8] sm:$0xf] }
  0xc4   :  { %377 = vst.msk [vmem:[#allocation0 + $0x6e] sm:$0x8] %vm3_vm0, %v368_v38   ;;  %379 = vst.msk [vmem:[#allocation0 + $0x8d] sm:$0x10] %vm3_vm0, %v368_v38  }
  0xc5   :  { %381 = vst.msk [vmem:[#allocation0 + $0xac] sm:$0x20] %vm3_vm0, %v368_v38   ;;  %383 = vst.msk [vmem:[#allocation0 + $0xcb] sm:$0x40] %vm3_vm0, %v368_v38  }
  0xc6   :  { %385 = vst.msk [vmem:[#allocation0 + $0xea] sm:$0x80] %vm3_vm0, %v368_v38   ;;  %1215 = vst [vmem:[%s1737_s1 + $0x94] sm:$0xf] %v913_v39 }
  0xc7   :  { %1219 = vst [vmem:[%s1737_s1 + $0xa4] sm:$0xf] %v941_v40  ;;  %1223 = vst [vmem:[%s1737_s1 + $0xb4] sm:$0xf] %v969_v41 }
  0xc8   :  { %1235 = vst [vmem:[%s1737_s1 + $0xe4] sm:$0xf] %v1053_v42  ;;  %1239 = vst [vmem:[%s1737_s1 + $0xf4] sm:$0xf] %v1081_v43 }
  0xc9   :  { %1179 = vst [vmem:[%s1737_s1 + $0x4] sm:$0xf] %v662_v44  ;;  %1183 = vst [vmem:[%s1737_s1 + $0x14] sm:$0xf] %v689_v45 }
  0xca   :  { %1187 = vst [vmem:[%s1737_s1 + $0x24] sm:$0xf] %v717_v46  ;;  %1191 = vst [vmem:[%s1737_s1 + $0x34] sm:$0xf] %v745_v47 }
  0xcb   :  { %1195 = vst [vmem:[%s1737_s1 + $0x44] sm:$0xf] %v773_v48  ;;  %1199 = vst [vmem:[%s1737_s1 + $0x54] sm:$0xf] %v801_v49 }
  0xcc   :  { %1203 = vst [vmem:[%s1737_s1 + $0x64] sm:$0xf] %v829_v50  ;;  %433 = vst.msk [vmem:[#allocation0 + $0x112] sm:$0x1] %vm3_vm0, %v430_v51  }
  0xcd   :  { %435 = vst.msk [vmem:[#allocation0 + $0x131] sm:$0x2] %vm3_vm0, %v430_v51   ;;  %437 = vst.msk [vmem:[#allocation0 + $0x150] sm:$0x4] %vm3_vm0, %v430_v51  }
  0xce   :  { %439 = vst.msk [vmem:[#allocation0 + $0x16f] sm:$0x8] %vm3_vm0, %v430_v51   ;;  %441 = vst.msk [vmem:[#allocation0 + $0x18e] sm:$0x10] %vm3_vm0, %v430_v51  }
  0xcf   :  { %443 = vst.msk [vmem:[#allocation0 + $0x1ad] sm:$0x20] %vm3_vm0, %v430_v51   ;;  %445 = vst.msk [vmem:[#allocation0 + $0x1cc] sm:$0x40] %vm3_vm0, %v430_v51  }
  0xd0   :  { %447 = vst.msk [vmem:[#allocation0 + $0x1eb] sm:$0x80] %vm3_vm0, %v430_v51   ;;  %412 = vst.msk [vmem:[#allocation0 + $0x12] sm:$0x1] %vm3_vm0, %v409_v52  }
  0xd1   :  { %414 = vst.msk [vmem:[#allocation0 + $0x31] sm:$0x2] %vm3_vm0, %v409_v52   ;;  %416 = vst.msk [vmem:[#allocation0 + $0x50] sm:$0x4] %vm3_vm0, %v409_v52  }
  0xd2   :  { %418 = vst.msk [vmem:[#allocation0 + $0x6f] sm:$0x8] %vm3_vm0, %v409_v52   ;;  %420 = vst.msk [vmem:[#allocation0 + $0x8e] sm:$0x10] %vm3_vm0, %v409_v52  }
  0xd3   :  { %422 = vst.msk [vmem:[#allocation0 + $0xad] sm:$0x20] %vm3_vm0, %v409_v52   ;;  %424 = vst.msk [vmem:[#allocation0 + $0xcc] sm:$0x40] %vm3_vm0, %v409_v52  }
  0xd4   :  { %426 = vst.msk [vmem:[#allocation0 + $0xeb] sm:$0x80] %vm3_vm0, %v409_v52   ;;  %1207 = vst [vmem:[%s1737_s1 + $0x74] sm:$0xf] %v857_v53 }
  0xd5   :  { %474 = vst.msk [vmem:[#allocation0 + $0x113] sm:$0x1] %vm3_vm0, %v471_v54   ;;  %476 = vst.msk [vmem:[#allocation0 + $0x132] sm:$0x2] %vm3_vm0, %v471_v54  }
  0xd6   :  { %478 = vst.msk [vmem:[#allocation0 + $0x151] sm:$0x4] %vm3_vm0, %v471_v54   ;;  %480 = vst.msk [vmem:[#allocation0 + $0x170] sm:$0x8] %vm3_vm0, %v471_v54  }
  0xd7   :  { %482 = vst.msk [vmem:[#allocation0 + $0x18f] sm:$0x10] %vm3_vm0, %v471_v54   ;;  %484 = vst.msk [vmem:[#allocation0 + $0x1ae] sm:$0x20] %vm3_vm0, %v471_v54  }
  0xd8   :  { %486 = vst.msk [vmem:[#allocation0 + $0x1cd] sm:$0x40] %vm3_vm0, %v471_v54   ;;  %488 = vst.msk [vmem:[#allocation0 + $0x1ec] sm:$0x80] %vm3_vm0, %v471_v54  }
  0xd9   :  { %453 = vst.msk [vmem:[#allocation0 + $0x13] sm:$0x1] %vm3_vm0, %v450_v55   ;;  %455 = vst.msk [vmem:[#allocation0 + $0x32] sm:$0x2] %vm3_vm0, %v450_v55  }
  0xda   :  { %457 = vst.msk [vmem:[#allocation0 + $0x51] sm:$0x4] %vm3_vm0, %v450_v55   ;;  %459 = vst.msk [vmem:[#allocation0 + $0x70] sm:$0x8] %vm3_vm0, %v450_v55  }
  0xdb   :  { %461 = vst.msk [vmem:[#allocation0 + $0x8f] sm:$0x10] %vm3_vm0, %v450_v55   ;;  %463 = vst.msk [vmem:[#allocation0 + $0xae] sm:$0x20] %vm3_vm0, %v450_v55  }
  0xdc   :  { %465 = vst.msk [vmem:[#allocation0 + $0xcd] sm:$0x40] %vm3_vm0, %v450_v55   ;;  %467 = vst.msk [vmem:[#allocation0 + $0xec] sm:$0x80] %vm3_vm0, %v450_v55   ;;  %v920_v58 = vld [vmem:[#allocation0 + $0x130] sm:$0xf] }
  0xdd   :  { %515 = vst.msk [vmem:[#allocation0 + $0x118] sm:$0x1] %vm3_vm0, %v512_v56   ;;  %517 = vst.msk [vmem:[#allocation0 + $0x137] sm:$0x2] %vm3_vm0, %v512_v56   ;;  %v976_v59 = vld [vmem:[#allocation0 + $0x170] sm:$0xf] }
  0xde   :  { %519 = vst.msk [vmem:[#allocation0 + $0x156] sm:$0x4] %vm3_vm0, %v512_v56   ;;  %521 = vst.msk [vmem:[#allocation0 + $0x175] sm:$0x8] %vm3_vm0, %v512_v56   ;;  %v1004_v60 = vld [vmem:[#allocation0 + $0x190] sm:$0xf] }
  0xdf   :  { %523 = vst.msk [vmem:[#allocation0 + $0x194] sm:$0x10] %vm3_vm0, %v512_v56   ;;  %525 = vst.msk [vmem:[#allocation0 + $0x1b3] sm:$0x20] %vm3_vm0, %v512_v56   ;;  %v1032_v63 = vld [vmem:[#allocation0 + $0x1b0] sm:$0xf] }
  0xe0   :  { %527 = vst.msk [vmem:[#allocation0 + $0x1d2] sm:$0x40] %vm3_vm0, %v512_v56   ;;  %529 = vst.msk [vmem:[#allocation0 + $0x1f1] sm:$0x80] %vm3_vm0, %v512_v56   ;;  %v1060_v0 = vld [vmem:[#allocation0 + $0x1d0] sm:$0xf] }
  0xe1   :  { %494 = vst.msk [vmem:[#allocation0 + $0x18] sm:$0x1] %vm3_vm0, %v491_v57   ;;  %496 = vst.msk [vmem:[#allocation0 + $0x37] sm:$0x2] %vm3_vm0, %v491_v57   ;;  %v892_v1 = vld [vmem:[#allocation0 + $0x110] sm:$0xf] }
  0xe2   :  { %498 = vst.msk [vmem:[#allocation0 + $0x56] sm:$0x4] %vm3_vm0, %v491_v57   ;;  %500 = vst.msk [vmem:[#allocation0 + $0x75] sm:$0x8] %vm3_vm0, %v491_v57   ;;  %v948_v2 = vld [vmem:[#allocation0 + $0x150] sm:$0xf] }
  0xe3   :  { %502 = vst.msk [vmem:[#allocation0 + $0x94] sm:$0x10] %vm3_vm0, %v491_v57   ;;  %504 = vst.msk [vmem:[#allocation0 + $0xb3] sm:$0x20] %vm3_vm0, %v491_v57   ;;  %v1088_v3 = vld [vmem:[#allocation0 + $0x1f0] sm:$0xf] }
  0xe4   :  { %506 = vst.msk [vmem:[#allocation0 + $0xd2] sm:$0x40] %vm3_vm0, %v491_v57   ;;  %508 = vst.msk [vmem:[#allocation0 + $0xf1] sm:$0x80] %vm3_vm0, %v491_v57   ;;  %v668_v4 = vld [vmem:[#allocation0 + $0x10] sm:$0xf] }
  0xe5   :  { %1216 = vst [vmem:[%s1737_s1 + $0x98] sm:$0xf] %v920_v58  ;;  %1224 = vst [vmem:[%s1737_s1 + $0xb8] sm:$0xf] %v976_v59  ;;  %v696_v5 = vld [vmem:[#allocation0 + $0x30] sm:$0xf] }
  0xe6   :  { %1228 = vst [vmem:[%s1737_s1 + $0xc8] sm:$0xf] %v1004_v60  ;;  %556 = vst.msk [vmem:[#allocation0 + $0x119] sm:$0x1] %vm3_vm0, %v553_v61   ;;  %v724_v6 = vld [vmem:[#allocation0 + $0x50] sm:$0xf] }
  0xe7   :  { %558 = vst.msk [vmem:[#allocation0 + $0x138] sm:$0x2] %vm3_vm0, %v553_v61   ;;  %560 = vst.msk [vmem:[#allocation0 + $0x157] sm:$0x4] %vm3_vm0, %v553_v61   ;;  %v780_v7 = vld [vmem:[#allocation0 + $0x90] sm:$0xf] }
  0xe8   :  { %562 = vst.msk [vmem:[#allocation0 + $0x176] sm:$0x8] %vm3_vm0, %v553_v61   ;;  %564 = vst.msk [vmem:[#allocation0 + $0x195] sm:$0x10] %vm3_vm0, %v553_v61   ;;  %v808_v8 = vld [vmem:[#allocation0 + $0xb0] sm:$0xf] }
  0xe9   :  { %566 = vst.msk [vmem:[#allocation0 + $0x1b4] sm:$0x20] %vm3_vm0, %v553_v61   ;;  %568 = vst.msk [vmem:[#allocation0 + $0x1d3] sm:$0x40] %vm3_vm0, %v553_v61   ;;  %v836_v9 = vld [vmem:[#allocation0 + $0xd0] sm:$0xf] }
  0xea   :  { %570 = vst.msk [vmem:[#allocation0 + $0x1f2] sm:$0x80] %vm3_vm0, %v553_v61   ;;  %535 = vst.msk [vmem:[#allocation0 + $0x19] sm:$0x1] %vm3_vm0, %v532_v62   ;;  %v752_v10 = vld [vmem:[#allocation0 + $0x70] sm:$0xf] }
  0xeb   :  { %537 = vst.msk [vmem:[#allocation0 + $0x38] sm:$0x2] %vm3_vm0, %v532_v62   ;;  %539 = vst.msk [vmem:[#allocation0 + $0x57] sm:$0x4] %vm3_vm0, %v532_v62   ;;  %v864_v13 = vld [vmem:[#allocation0 + $0xf0] sm:$0xf] }
  0xec   :  { %541 = vst.msk [vmem:[#allocation0 + $0x76] sm:$0x8] %vm3_vm0, %v532_v62   ;;  %543 = vst.msk [vmem:[#allocation0 + $0x95] sm:$0x10] %vm3_vm0, %v532_v62  }
  0xed   :  { %545 = vst.msk [vmem:[#allocation0 + $0xb4] sm:$0x20] %vm3_vm0, %v532_v62   ;;  %547 = vst.msk [vmem:[#allocation0 + $0xd3] sm:$0x40] %vm3_vm0, %v532_v62  }
  0xee   :  { %549 = vst.msk [vmem:[#allocation0 + $0xf2] sm:$0x80] %vm3_vm0, %v532_v62   ;;  %1232 = vst [vmem:[%s1737_s1 + $0xd8] sm:$0xf] %v1032_v63 }
  0xef   :  { %1236 = vst [vmem:[%s1737_s1 + $0xe8] sm:$0xf] %v1060_v0  ;;  %1212 = vst [vmem:[%s1737_s1 + $0x88] sm:$0xf] %v892_v1 }
  0xf0   :  { %1180 = vst [vmem:[%s1737_s1 + $0x8] sm:$0xf] %v668_v4  ;;  %1220 = vst [vmem:[%s1737_s1 + $0xa8] sm:$0xf] %v948_v2 }
  0xf1   :  { %1240 = vst [vmem:[%s1737_s1 + $0xf8] sm:$0xf] %v1088_v3  ;;  %1184 = vst [vmem:[%s1737_s1 + $0x18] sm:$0xf] %v696_v5 }
  0xf2   :  { %1188 = vst [vmem:[%s1737_s1 + $0x28] sm:$0xf] %v724_v6  ;;  %1196 = vst [vmem:[%s1737_s1 + $0x48] sm:$0xf] %v780_v7 }
  0xf3   :  { %1200 = vst [vmem:[%s1737_s1 + $0x58] sm:$0xf] %v808_v8  ;;  %1204 = vst [vmem:[%s1737_s1 + $0x68] sm:$0xf] %v836_v9 }
  0xf4   :  { %1192 = vst [vmem:[%s1737_s1 + $0x38] sm:$0xf] %v752_v10  ;;  %597 = vst.msk [vmem:[#allocation0 + $0x11a] sm:$0x1] %vm3_vm0, %v594_v11  }
  0xf5   :  { %599 = vst.msk [vmem:[#allocation0 + $0x139] sm:$0x2] %vm3_vm0, %v594_v11   ;;  %601 = vst.msk [vmem:[#allocation0 + $0x158] sm:$0x4] %vm3_vm0, %v594_v11  }
  0xf6   :  { %603 = vst.msk [vmem:[#allocation0 + $0x177] sm:$0x8] %vm3_vm0, %v594_v11   ;;  %605 = vst.msk [vmem:[#allocation0 + $0x196] sm:$0x10] %vm3_vm0, %v594_v11  }
  0xf7   :  { %607 = vst.msk [vmem:[#allocation0 + $0x1b5] sm:$0x20] %vm3_vm0, %v594_v11   ;;  %609 = vst.msk [vmem:[#allocation0 + $0x1d4] sm:$0x40] %vm3_vm0, %v594_v11  }
  0xf8   :  { %611 = vst.msk [vmem:[#allocation0 + $0x1f3] sm:$0x80] %vm3_vm0, %v594_v11   ;;  %576 = vst.msk [vmem:[#allocation0 + $0x1a] sm:$0x1] %vm3_vm0, %v573_v12  }
  0xf9   :  { %578 = vst.msk [vmem:[#allocation0 + $0x39] sm:$0x2] %vm3_vm0, %v573_v12   ;;  %580 = vst.msk [vmem:[#allocation0 + $0x58] sm:$0x4] %vm3_vm0, %v573_v12  }
  0xfa   :  { %582 = vst.msk [vmem:[#allocation0 + $0x77] sm:$0x8] %vm3_vm0, %v573_v12   ;;  %584 = vst.msk [vmem:[#allocation0 + $0x96] sm:$0x10] %vm3_vm0, %v573_v12  }
  0xfb   :  { %586 = vst.msk [vmem:[#allocation0 + $0xb5] sm:$0x20] %vm3_vm0, %v573_v12   ;;  %588 = vst.msk [vmem:[#allocation0 + $0xd4] sm:$0x40] %vm3_vm0, %v573_v12  }
  0xfc   :  { %590 = vst.msk [vmem:[#allocation0 + $0xf3] sm:$0x80] %vm3_vm0, %v573_v12   ;;  %1208 = vst [vmem:[%s1737_s1 + $0x78] sm:$0xf] %v864_v13 }
  0xfd   :  { %638 = vst.msk [vmem:[#allocation0 + $0x11b] sm:$0x1] %vm3_vm0, %v635_v14   ;;  %640 = vst.msk [vmem:[#allocation0 + $0x13a] sm:$0x2] %vm3_vm0, %v635_v14  }
  0xfe   :  { %642 = vst.msk [vmem:[#allocation0 + $0x159] sm:$0x4] %vm3_vm0, %v635_v14   ;;  %644 = vst.msk [vmem:[#allocation0 + $0x178] sm:$0x8] %vm3_vm0, %v635_v14  }
  0xff   :  { %646 = vst.msk [vmem:[#allocation0 + $0x197] sm:$0x10] %vm3_vm0, %v635_v14   ;;  %648 = vst.msk [vmem:[#allocation0 + $0x1b6] sm:$0x20] %vm3_vm0, %v635_v14  }
 0x100   :  { %650 = vst.msk [vmem:[#allocation0 + $0x1d5] sm:$0x40] %vm3_vm0, %v635_v14   ;;  %652 = vst.msk [vmem:[#allocation0 + $0x1f4] sm:$0x80] %vm3_vm0, %v635_v14  }
 0x101   :  { %617 = vst.msk [vmem:[#allocation0 + $0x1b] sm:$0x1] %vm3_vm0, %v614_v15   ;;  %619 = vst.msk [vmem:[#allocation0 + $0x3a] sm:$0x2] %vm3_vm0, %v614_v15  }
 0x102   :  { %621 = vst.msk [vmem:[#allocation0 + $0x59] sm:$0x4] %vm3_vm0, %v614_v15   ;;  %623 = vst.msk [vmem:[#allocation0 + $0x78] sm:$0x8] %vm3_vm0, %v614_v15  }
 0x103   :  { %625 = vst.msk [vmem:[#allocation0 + $0x97] sm:$0x10] %vm3_vm0, %v614_v15   ;;  %627 = vst.msk [vmem:[#allocation0 + $0xb6] sm:$0x20] %vm3_vm0, %v614_v15  }
 0x104   :  { %629 = vst.msk [vmem:[#allocation0 + $0xd5] sm:$0x40] %vm3_vm0, %v614_v15   ;;  %631 = vst.msk [vmem:[#allocation0 + $0xf4] sm:$0x80] %vm3_vm0, %v614_v15   ;;  %v899_v16 = vld [vmem:[#allocation0 + $0x118] sm:$0xf] }
 0x105   :  { %v927_v17 = vld [vmem:[#allocation0 + $0x138] sm:$0xf]  ;;  %1213 = vst [vmem:[%s1737_s1 + $0x8c] sm:$0xf] %v899_v16 }
 0x106   :  { %v955_v18 = vld [vmem:[#allocation0 + $0x158] sm:$0xf]  ;;  %1217 = vst [vmem:[%s1737_s1 + $0x9c] sm:$0xf] %v927_v17 }
 0x107   :  { %1221 = vst [vmem:[%s1737_s1 + $0xac] sm:$0xf] %v955_v18  ;;  %v983_v19 = vld [vmem:[#allocation0 + $0x178] sm:$0xf] }
 0x108   :  { %v1011_v20 = vld [vmem:[#allocation0 + $0x198] sm:$0xf]  ;;  %1225 = vst [vmem:[%s1737_s1 + $0xbc] sm:$0xf] %v983_v19 }
 0x109   :  { %v1039_v21 = vld [vmem:[#allocation0 + $0x1b8] sm:$0xf]  ;;  %1229 = vst [vmem:[%s1737_s1 + $0xcc] sm:$0xf] %v1011_v20 }
 0x10a   :  { %1233 = vst [vmem:[%s1737_s1 + $0xdc] sm:$0xf] %v1039_v21  ;;  %v1067_v22 = vld [vmem:[#allocation0 + $0x1d8] sm:$0xf] }
 0x10b   :  { %v1095_v23 = vld [vmem:[#allocation0 + $0x1f8] sm:$0xf]  ;;  %1237 = vst [vmem:[%s1737_s1 + $0xec] sm:$0xf] %v1067_v22 }
 0x10c   :  { %v675_v24 = vld [vmem:[#allocation0 + $0x18] sm:$0xf]  ;;  %1241 = vst [vmem:[%s1737_s1 + $0xfc] sm:$0xf] %v1095_v23 }
 0x10d   :  { %1181 = vst [vmem:[%s1737_s1 + $0xc] sm:$0xf] %v675_v24  ;;  %v703_v25 = vld [vmem:[#allocation0 + $0x38] sm:$0xf] }
 0x10e   :  { %v731_v26 = vld [vmem:[#allocation0 + $0x58] sm:$0xf]  ;;  %1185 = vst [vmem:[%s1737_s1 + $0x1c] sm:$0xf] %v703_v25 }
 0x10f   :  { %v759_v27 = vld [vmem:[#allocation0 + $0x78] sm:$0xf]  ;;  %1189 = vst [vmem:[%s1737_s1 + $0x2c] sm:$0xf] %v731_v26 }
 0x110   :  { %1193 = vst [vmem:[%s1737_s1 + $0x3c] sm:$0xf] %v759_v27  ;;  %v787_v28 = vld [vmem:[#allocation0 + $0x98] sm:$0xf] }
 0x111   :  { %v815_v29 = vld [vmem:[#allocation0 + $0xb8] sm:$0xf]  ;;  %1197 = vst [vmem:[%s1737_s1 + $0x4c] sm:$0xf] %v787_v28 }
 0x112   :  { %v843_v30 = vld [vmem:[#allocation0 + $0xd8] sm:$0xf]  ;;  %1201 = vst [vmem:[%s1737_s1 + $0x5c] sm:$0xf] %v815_v29 }
 0x113   :  { %1205 = vst [vmem:[%s1737_s1 + $0x6c] sm:$0xf] %v843_v30  ;;  %v871_v31 = vld [vmem:[#allocation0 + $0xf8] sm:$0xf] }
 0x114   :  { %1209 = vst [vmem:[%s1737_s1 + $0x7c] sm:$0xf] %v871_v31 }

// kernel: reverse.8
= control target key start
LH: loop header
LB: loop body
LE: loop exit
PB: predicated region body
PF: predicated region fallthrough
CT: control target
= control target key end

     0   :  { %s968_s0 = inlined_call_operand.vmem [shape: f32[2,8,8,8,5], index: 0, kind: input, shape index: {}]   ;;  %s969_s1 = inlined_call_operand.vmem [shape: f32[2,8,8,8,5], index: 1, kind: output, shape index: {}]  }
   0x1   :  { %v320_v0 = vld [vmem:[%s968_s0 + $0x20] sm:$0xff]  ;;  %v323_v2 = vld [vmem:[%s968_s0 + $0x48] sm:$0xff]  ;;  %v327_v4 = vld [vmem:[%s968_s0 + $0x70] sm:$0xff] }
   0x2   :  { %v321_v1 = vld [vmem:[%s968_s0 + $0x160] sm:$0xff]  ;;  %4 = vst [vmem:[%s969_s1] sm:$0xff] %v320_v0  ;;  %324 = vst [vmem:[%s969_s1 + $0x28] sm:$0xff] %v323_v2  ;;  %v325_v3 = vld [vmem:[%s968_s0 + $0x188] sm:$0xff] }
   0x3   :  { %322 = vst [vmem:[%s969_s1 + $0x140] sm:$0xff] %v321_v1  ;;  %v329_v5 = vld [vmem:[%s968_s0 + $0x1b0] sm:$0xff]  ;;  %326 = vst [vmem:[%s969_s1 + $0x168] sm:$0xff] %v325_v3  ;;  %v331_v6 = vld [vmem:[%s968_s0 + $0x98] sm:$0xff] }
   0x4   :  { %328 = vst [vmem:[%s969_s1 + $0x50] sm:$0xff] %v327_v4  ;;  %330 = vst [vmem:[%s969_s1 + $0x190] sm:$0xff] %v329_v5  ;;  %v333_v7 = vld [vmem:[%s968_s0 + $0x1d8] sm:$0xff]  ;;  %v335_v8 = vld [vmem:[%s968_s0 + $0xc0] sm:$0xff] }
   0x5   :  { %332 = vst [vmem:[%s969_s1 + $0x78] sm:$0xff] %v331_v6  ;;  %334 = vst [vmem:[%s969_s1 + $0x1b8] sm:$0xff] %v333_v7  ;;  %v337_v9 = vld [vmem:[%s968_s0 + $0x200] sm:$0xff]  ;;  %v339_v10 = vld [vmem:[%s968_s0 + $0xe8] sm:$0xff] }
   0x6   :  { %336 = vst [vmem:[%s969_s1 + $0xa0] sm:$0xff] %v335_v8  ;;  %v341_v11 = vld [vmem:[%s968_s0 + $0x228] sm:$0xff]  ;;  %338 = vst [vmem:[%s969_s1 + $0x1e0] sm:$0xff] %v337_v9  ;;  %v343_v12 = vld [vmem:[%s968_s0 + $0x110] sm:$0xff] }
   0x7   :  { %340 = vst [vmem:[%s969_s1 + $0xc8] sm:$0xff] %v339_v10  ;;  %342 = vst [vmem:[%s969_s1 + $0x208] sm:$0xff] %v341_v11  ;;  %v345_v13 = vld [vmem:[%s968_s0 + $0x250] sm:$0xff]  ;;  %v347_v14 = vld [vmem:[%s968_s0 + $0x138] sm:$0xff] }
   0x8   :  { %344 = vst [vmem:[%s969_s1 + $0xf0] sm:$0xff] %v343_v12  ;;  %346 = vst [vmem:[%s969_s1 + $0x230] sm:$0xff] %v345_v13  ;;  %v349_v15 = vld [vmem:[%s968_s0 + $0x278] sm:$0xff]  ;;  %v355_v18 = vld [vmem:[%s968_s0 + $0x40] sm:$0xff] }
   0x9   :  { %348 = vst [vmem:[%s969_s1 + $0x118] sm:$0xff] %v347_v14  ;;  %v351_v16 = vld [vmem:[%s968_s0 + $0x18] sm:$0xff]  ;;  %350 = vst [vmem:[%s969_s1 + $0x258] sm:$0xff] %v349_v15  ;;  %v357_v19 = vld [vmem:[%s968_s0 + $0x180] sm:$0xff] }
   0xa   :  { %v353_v17 = vld [vmem:[%s968_s0 + $0x158] sm:$0xff]  ;;  %352 = vst [vmem:[%s969_s1 + $0x8] sm:$0xff] %v351_v16  ;;  %v359_v20 = vld [vmem:[%s968_s0 + $0x68] sm:$0xff]  ;;  %356 = vst [vmem:[%s969_s1 + $0x30] sm:$0xff] %v355_v18 }
   0xb   :  { %354 = vst [vmem:[%s969_s1 + $0x148] sm:$0xff] %v353_v17  ;;  %358 = vst [vmem:[%s969_s1 + $0x170] sm:$0xff] %v357_v19  ;;  %v361_v21 = vld [vmem:[%s968_s0 + $0x1a8] sm:$0xff]  ;;  %v363_v22 = vld [vmem:[%s968_s0 + $0x90] sm:$0xff] }
   0xc   :  { %360 = vst [vmem:[%s969_s1 + $0x58] sm:$0xff] %v359_v20  ;;  %v365_v23 = vld [vmem:[%s968_s0 + $0x1d0] sm:$0xff]  ;;  %362 = vst [vmem:[%s969_s1 + $0x198] sm:$0xff] %v361_v21  ;;  %v367_v24 = vld [vmem:[%s968_s0 + $0xb8] sm:$0xff] }
   0xd   :  { %364 = vst [vmem:[%s969_s1 + $0x80] sm:$0xff] %v363_v22  ;;  %366 = vst [vmem:[%s969_s1 + $0x1c0] sm:$0xff] %v365_v23  ;;  %v369_v25 = vld [vmem:[%s968_s0 + $0x1f8] sm:$0xff]  ;;  %v371_v26 = vld [vmem:[%s968_s0 + $0xe0] sm:$0xff] }
   0xe   :  { %368 = vst [vmem:[%s969_s1 + $0xa8] sm:$0xff] %v367_v24  ;;  %370 = vst [vmem:[%s969_s1 + $0x1e8] sm:$0xff] %v369_v25  ;;  %v373_v27 = vld [vmem:[%s968_s0 + $0x220] sm:$0xff]  ;;  %v375_v28 = vld [vmem:[%s968_s0 + $0x108] sm:$0xff] }
   0xf   :  { %372 = vst [vmem:[%s969_s1 + $0xd0] sm:$0xff] %v371_v26  ;;  %v377_v29 = vld [vmem:[%s968_s0 + $0x248] sm:$0xff]  ;;  %374 = vst [vmem:[%s969_s1 + $0x210] sm:$0xff] %v373_v27  ;;  %v379_v30 = vld [vmem:[%s968_s0 + $0x130] sm:$0xff] }
  0x10   :  { %376 = vst [vmem:[%s969_s1 + $0xf8] sm:$0xff] %v375_v28  ;;  %378 = vst [vmem:[%s969_s1 + $0x238] sm:$0xff] %v377_v29  ;;  %v381_v31 = vld [vmem:[%s968_s0 + $0x270] sm:$0xff]  ;;  %v387_v34 = vld [vmem:[%s968_s0 + $0x38] sm:$0xff] }
  0x11   :  { %v383_v32 = vld [vmem:[%s968_s0 + $0x10] sm:$0xff]  ;;  %380 = vst [vmem:[%s969_s1 + $0x120] sm:$0xff] %v379_v30  ;;  %382 = vst [vmem:[%s969_s1 + $0x260] sm:$0xff] %v381_v31  ;;  %v389_v35 = vld [vmem:[%s968_s0 + $0x178] sm:$0xff] }
  0x12   :  { %384 = vst [vmem:[%s969_s1 + $0x10] sm:$0xff] %v383_v32  ;;  %v385_v33 = vld [vmem:[%s968_s0 + $0x150] sm:$0xff]  ;;  %388 = vst [vmem:[%s969_s1 + $0x38] sm:$0xff] %v387_v34  ;;  %v391_v36 = vld [vmem:[%s968_s0 + $0x60] sm:$0xff] }
  0x13   :  { %386 = vst [vmem:[%s969_s1 + $0x150] sm:$0xff] %v385_v33  ;;  %390 = vst [vmem:[%s969_s1 + $0x178] sm:$0xff] %v389_v35  ;;  %v393_v37 = vld [vmem:[%s968_s0 + $0x1a0] sm:$0xff]  ;;  %v395_v38 = vld [vmem:[%s968_s0 + $0x88] sm:$0xff] }
  0x14   :  { %392 = vst [vmem:[%s969_s1 + $0x60] sm:$0xff] %v391_v36  ;;  %394 = vst [vmem:[%s969_s1 + $0x1a0] sm:$0xff] %v393_v37  ;;  %v397_v39 = vld [vmem:[%s968_s0 + $0x1c8] sm:$0xff]  ;;  %v399_v40 = vld [vmem:[%s968_s0 + $0xb0] sm:$0xff] }
  0x15   :  { %396 = vst [vmem:[%s969_s1 + $0x88] sm:$0xff] %v395_v38  ;;  %v401_v41 = vld [vmem:[%s968_s0 + $0x1f0] sm:$0xff]  ;;  %398 = vst [vmem:[%s969_s1 + $0x1c8] sm:$0xff] %v397_v39  ;;  %v403_v42 = vld [vmem:[%s968_s0 + $0xd8] sm:$0xff] }
  0x16   :  { %400 = vst [vmem:[%s969_s1 + $0xb0] sm:$0xff] %v399_v40  ;;  %402 = vst [vmem:[%s969_s1 + $0x1f0] sm:$0xff] %v401_v41  ;;  %v405_v43 = vld [vmem:[%s968_s0 + $0x218] sm:$0xff]  ;;  %v407_v44 = vld [vmem:[%s968_s0 + $0x100] sm:$0xff] }
  0x17   :  { %404 = vst [vmem:[%s969_s1 + $0xd8] sm:$0xff] %v403_v42  ;;  %406 = vst [vmem:[%s969_s1 + $0x218] sm:$0xff] %v405_v43  ;;  %v409_v45 = vld [vmem:[%s968_s0 + $0x240] sm:$0xff]  ;;  %v411_v46 = vld [vmem:[%s968_s0 + $0x128] sm:$0xff] }
  0x18   :  { %408 = vst [vmem:[%s969_s1 + $0x100] sm:$0xff] %v407_v44  ;;  %v413_v47 = vld [vmem:[%s968_s0 + $0x268] sm:$0xff]  ;;  %410 = vst [vmem:[%s969_s1 + $0x240] sm:$0xff] %v409_v45  ;;  %v419_v50 = vld [vmem:[%s968_s0 + $0x30] sm:$0xff] }
  0x19   :  { %412 = vst [vmem:[%s969_s1 + $0x128] sm:$0xff] %v411_v46  ;;  %414 = vst [vmem:[%s969_s1 + $0x268] sm:$0xff] %v413_v47  ;;  %v415_v48 = vld [vmem:[%s968_s0 + $0x8] sm:$0xff]  ;;  %v421_v51 = vld [vmem:[%s968_s0 + $0x170] sm:$0xff] }
  0x1a   :  { %v417_v49 = vld [vmem:[%s968_s0 + $0x148] sm:$0xff]  ;;  %416 = vst [vmem:[%s969_s1 + $0x18] sm:$0xff] %v415_v48  ;;  %420 = vst [vmem:[%s969_s1 + $0x40] sm:$0xff] %v419_v50  ;;  %v423_v52 = vld [vmem:[%s968_s0 + $0x58] sm:$0xff] }
  0x1b   :  { %418 = vst [vmem:[%s969_s1 + $0x158] sm:$0xff] %v417_v49  ;;  %v425_v53 = vld [vmem:[%s968_s0 + $0x198] sm:$0xff]  ;;  %422 = vst [vmem:[%s969_s1 + $0x180] sm:$0xff] %v421_v51  ;;  %v427_v54 = vld [vmem:[%s968_s0 + $0x80] sm:$0xff] }
  0x1c   :  { %424 = vst [vmem:[%s969_s1 + $0x68] sm:$0xff] %v423_v52  ;;  %426 = vst [vmem:[%s969_s1 + $0x1a8] sm:$0xff] %v425_v53  ;;  %v429_v55 = vld [vmem:[%s968_s0 + $0x1c0] sm:$0xff]  ;;  %v431_v56 = vld [vmem:[%s968_s0 + $0xa8] sm:$0xff] }
  0x1d   :  { %428 = vst [vmem:[%s969_s1 + $0x90] sm:$0xff] %v427_v54  ;;  %430 = vst [vmem:[%s969_s1 + $0x1d0] sm:$0xff] %v429_v55  ;;  %v433_v57 = vld [vmem:[%s968_s0 + $0x1e8] sm:$0xff]  ;;  %v435_v58 = vld [vmem:[%s968_s0 + $0xd0] sm:$0xff] }
  0x1e   :  { %432 = vst [vmem:[%s969_s1 + $0xb8] sm:$0xff] %v431_v56  ;;  %v437_v59 = vld [vmem:[%s968_s0 + $0x210] sm:$0xff]  ;;  %434 = vst [vmem:[%s969_s1 + $0x1f8] sm:$0xff] %v433_v57  ;;  %v439_v60 = vld [vmem:[%s968_s0 + $0xf8] sm:$0xff] }
  0x1f   :  { %436 = vst [vmem:[%s969_s1 + $0xe0] sm:$0xff] %v435_v58  ;;  %438 = vst [vmem:[%s969_s1 + $0x220] sm:$0xff] %v437_v59  ;;  %v441_v61 = vld [vmem:[%s968_s0 + $0x238] sm:$0xff]  ;;  %v443_v62 = vld [vmem:[%s968_s0 + $0x120] sm:$0xff] }
  0x20   :  { %440 = vst [vmem:[%s969_s1 + $0x108] sm:$0xff] %v439_v60  ;;  %442 = vst [vmem:[%s969_s1 + $0x248] sm:$0xff] %v441_v61  ;;  %v445_v63 = vld [vmem:[%s968_s0 + $0x260] sm:$0xff]  ;;  %v450_v2 = vld [vmem:[%s968_s0 + $0x28] sm:$0xff] }
  0x21   :  { %444 = vst [vmem:[%s969_s1 + $0x130] sm:$0xff] %v443_v62  ;;  %v257_v0 = vld [vmem:[%s968_s0] sm:$0xff]  ;;  %446 = vst [vmem:[%s969_s1 + $0x270] sm:$0xff] %v445_v63  ;;  %v452_v3 = vld [vmem:[%s968_s0 + $0x168] sm:$0xff] }
  0x22   :  { %v448_v1 = vld [vmem:[%s968_s0 + $0x140] sm:$0xff]  ;;  %447 = vst [vmem:[%s969_s1 + $0x20] sm:$0xff] %v257_v0  ;;  %v454_v4 = vld [vmem:[%s968_s0 + $0x50] sm:$0xff]  ;;  %451 = vst [vmem:[%s969_s1 + $0x48] sm:$0xff] %v450_v2 }
  0x23   :  { %449 = vst [vmem:[%s969_s1 + $0x160] sm:$0xff] %v448_v1  ;;  %453 = vst [vmem:[%s969_s1 + $0x188] sm:$0xff] %v452_v3  ;;  %v456_v5 = vld [vmem:[%s968_s0 + $0x190] sm:$0xff]  ;;  %v458_v6 = vld [vmem:[%s968_s0 + $0x78] sm:$0xff] }
  0x24   :  { %455 = vst [vmem:[%s969_s1 + $0x70] sm:$0xff] %v454_v4  ;;  %v460_v7 = vld [vmem:[%s968_s0 + $0x1b8] sm:$0xff]  ;;  %457 = vst [vmem:[%s969_s1 + $0x1b0] sm:$0xff] %v456_v5  ;;  %v462_v8 = vld [vmem:[%s968_s0 + $0xa0] sm:$0xff] }
  0x25   :  { %459 = vst [vmem:[%s969_s1 + $0x98] sm:$0xff] %v458_v6  ;;  %461 = vst [vmem:[%s969_s1 + $0x1d8] sm:$0xff] %v460_v7  ;;  %v464_v9 = vld [vmem:[%s968_s0 + $0x1e0] sm:$0xff]  ;;  %v466_v10 = vld [vmem:[%s968_s0 + $0xc8] sm:$0xff] }
  0x26   :  { %463 = vst [vmem:[%s969_s1 + $0xc0] sm:$0xff] %v462_v8  ;;  %465 = vst [vmem:[%s969_s1 + $0x200] sm:$0xff] %v464_v9  ;;  %v468_v11 = vld [vmem:[%s968_s0 + $0x208] sm:$0xff]  ;;  %v470_v12 = vld [vmem:[%s968_s0 + $0xf0] sm:$0xff] }
  0x27   :  { %467 = vst [vmem:[%s969_s1 + $0xe8] sm:$0xff] %v466_v10  ;;  %v472_v13 = vld [vmem:[%s968_s0 + $0x230] sm:$0xff]  ;;  %469 = vst [vmem:[%s969_s1 + $0x228] sm:$0xff] %v468_v11  ;;  %v474_v14 = vld [vmem:[%s968_s0 + $0x118] sm:$0xff] }
  0x28   :  { %471 = vst [vmem:[%s969_s1 + $0x110] sm:$0xff] %v470_v12  ;;  %473 = vst [vmem:[%s969_s1 + $0x250] sm:$0xff] %v472_v13  ;;  %v476_v15 = vld [vmem:[%s968_s0 + $0x258] sm:$0xff] }
  0x29   :  { %475 = vst [vmem:[%s969_s1 + $0x138] sm:$0xff] %v474_v14  ;;  %477 = vst [vmem:[%s969_s1 + $0x278] sm:$0xff] %v476_v15 }

// kernel: net2d_forward.15
= control target key start
LH: loop header
LB: loop body
LE: loop exit
PB: predicated region body
PF: predicated region fallthrough
CT: control target
= control target key end

     0   :  { %s797_s18 = smov 0   ;;  %s799_s19 = smov 0   ;;  %s869_s0 = inlined_call_operand.vmem [shape: f32[2,8,768], index: 0, kind: input, shape index: {}]   ;;  %s870_s1 = inlined_call_operand.vmem [shape: f32[2,8,768], index: 1, kind: input, shape index: {}]   ;;  %s871_s2 = inlined_call_operand.vmem [shape: f32[8,8], index: 2, kind: input, shape index: {}]   ;;  %s872_s3 = inlined_call_operand.vmem [shape: f32[8,1], index: 3, kind: input, shape index: {}]   ;;  %s873_s4 = inlined_call_operand.vmem [shape: f32[2,8,768], index: 4, kind: output, shape index: {0}]   ;;  %s874_s5 = inlined_call_operand.vmem [shape: f32[2,2,8,2], index: 5, kind: output, shape index: {1}]  }
   0x1   :  { %s801_s20 = smov 0   ;;  %s803_s21 = smov 0  }
   0x2   :  { %s805_s22 = smov 0  }
   0x3 LB: > { %s25_s23 = sadd.s32 1, %s754_s20  ;;  %s28_s24 = sadd.s32 1, %s758_s21  ;;  %s762_s22 = sphi %s805_s22, %s16_s22   ;;  %s758_s21 = sphi %s803_s21, %s878_s21   ;;  %s754_s20 = sphi %s801_s20, %s877_s20   ;;  %s750_s19 = sphi %s799_s19, %s876_s19   ;;  %s746_s18 = sphi %s797_s18, %s875_s18  }
   0x4   : > { %p26_p0 = scmp.ge.s32.totalorder %s25_s23, 2  ;;  %p662_p1 = scmp.ge.s32.totalorder %s762_s22, 1 }
   0x5   : > { %p230_p2 = scmp.lt.s32.totalorder %s762_s22, 5 }
   0x6   : > { %s880_s23 = smov (%p26_p0, %s25_s23), 0  ;;  %s882_s24 = smov (!%p26_p0, %s28_s24), %s758_s21 }
   0x7   : > { %p231_p3 = pnand %p662_p1, %p230_p2  ;;  %p30_p4 = scmp.ge.s32.totalorder %s882_s24, 2 }
   0x8   : > { %s283_s25 = smul.u32 (!%p231_p3), 3, %s746_s18  ;;  %p284_p5 = scmp.lt.s32.totalorder (!%p231_p3), %s750_s19, 1 }
   0x9   : > { %s884_s24 = smov (%p30_p4, %s882_s24), 0  ;;  %234 = sbr.rel (%p231_p3) target bundleno = 367 (0x16f), region = 36 }
   0xa   : > { %p286_p6 = scmp.lt.s32.totalorder (!%p231_p3), %s283_s25, 5  ;;  %p315_p7 = scmp.lt.s32.totalorder (!%p231_p3), %s746_s18, 1 }
   0xe   : > { %v764_v0 = vmov 0.0   ;;  %v476_v1 = vld [vmem:[%s872_s3] sm:$0xff]  ;;  %s886_s19 = smov (!%p284_p5, %s750_s19), 1  ;;  %vm765_vm0 = vmmov 0   ;;  %v766_v2 = vmov 0   ;;  %s888_s25 = smov (!%p286_p6, %s283_s25), 5 }
   0xf   : > { %396 = vmatprep.mubr.f32.mxu0 %v764_v0  ;;  %674 = vmatprep.subr.mxu1 %v764_v0  ;;  %s679_s28 = smul.u32 6, %s886_s19  ;;  %v324_v3 = vld [vmem:[%s871_s2] sm:$0xff]  ;;  %vm328_vm1 = vcmask 64512   ;;  %s890_s18 = smov (!%p315_p7, %s746_s18), 1  ;;  %vm492_vm2 = vcmask 7168   ;;  %vm501_vm3 = vcmask 15368  }
  0x10   : > { %676 = vmatprep.mubr.msk.f32.mxu1 %vm765_vm0, %v764_v0  ;;  %723 = vset.pattern.permute.xlu0 %v766_v2  ;;  %s666_s17 = sshll.u32 %s886_s19, 1 }
  0x11   : > { %479 = vperm.xlu0 %723, %v476_v1   ;;  %s289_s29 = sadd.s32 %s679_s28, %s888_s25  ;;  %s318_s25 = sadd.s32 %s666_s17, %s890_s18 }
  0x12   : > { %s663_s30 = sshll.u32 %s289_s29, 3  ;;  %s667_s26 = sshll.u32 %s318_s25, 3 }
  0x13   : > { %s291_s8 = scalar_lea.vmem %s869_s0, %s663_s30  ;;  %s301_s13 = scalar_lea.vmem %s870_s1, %s663_s30 }
  0x14   : > { %v326_v4 = vld [vmem:[%s291_s8 + $0x8] sm:$0xff]  ;;  %v325_v5 = vld [vmem:[%s291_s8] sm:$0xff]  ;;  %v327_v6 = vld [vmem:[%s291_s8 + $0x10] sm:$0xff]  ;;  %s311_s16 = scalar_lea.vmem %s873_s4, %s663_s30  ;;  %s320_s29 = scalar_lea.vmem %s874_s5, %s667_s26 }
  0x15   : > { %362 = vmatprep.subr.mxu0 %v326_v4  ;;  %675 = vmatpush3.msra.mxu1 %v327_v6  ;;  %v323_v7 = vld [vmem:[%s301_s13 + $0x10] sm:$0xff]  ;;  %v321_v8 = vld [vmem:[%s301_s13] sm:$0xff]  ;;  %v322_v12 = vld [vmem:[%s301_s13 + $0x8] sm:$0xff] }
  0x16   : > { %363 = vmatpush1.msra.mxu0 %v325_v5  ;;  %677 = vmatmul.mubr.msk.f32.vlgmr.msra.gmra.mxu1 %vm328_vm1, %v324_v3 }
  0x17   : > { %668 = vmatmul.mubr.msk.f32.vlgmr.msra.gmra.mxu0 %vm328_vm1, %v324_v3 }
  0x8c   : > { %v480_v11 = vpop.permute.xlu0 %479 }
  0xd6   : > { %v469_v9 = vpop.f32.mrf.mxu1 }
  0xd7   : > { %v398_v10 = vpop.f32.mrf.mxu0  ;;  %v475_v13 = vadd.f32 %v469_v9, %v323_v7 }
  0xd8   : > { %v473_v14 = vadd.f32 %v398_v10, %v321_v8  ;;  %v678_v15 = vpop.f32.mrf.mxu1 }
  0xd9   : > { %v400_v16 = vpop.f32.mrf.mxu0  ;;  %v484_v17 = vadd.f32 %v480_v11, %v475_v13 }
  0xda   : > { %v482_v18 = vadd.f32 %v480_v11, %v473_v14  ;;  %v474_v19 = vadd.f32 %v400_v16, %v322_v12 }
  0xdb   : > { %487 = vst [vmem:[%s311_s16 + $0x10] sm:$0xff] %v484_v17  ;;  %v496_v25 = vmul.f32 %v484_v17, %v484_v17 }
  0xdc   : > { %485 = vst [vmem:[%s311_s16] sm:$0xff] %v482_v18  ;;  %v483_v20 = vadd.f32 %v480_v11, %v474_v19  ;;  %v494_v22 = vmul.f32 %v482_v18, %v482_v18 }
  0xde   : > { %486 = vst [vmem:[%s311_s16 + $0x8] sm:$0xff] %v483_v20  ;;  %v488_v21 = vadd.f32 %v483_v20, %v482_v18  ;;  %v495_v23 = vmul.f32 %v483_v20, %v483_v20 }
  0xe0   : > { %v489_v24 = vadd.f32 %v488_v21, %v484_v17  ;;  %v497_v26 = vadd.f32 %v495_v23, %v494_v22 }
  0xe2   : > { %490 = vadd.xlane.f32.xlu0 %v489_v24  ;;  %v498_v27 = vadd.f32 %v497_v26, %v496_v25 }
  0xe4   : > { %499 = vadd.xlane.f32.xlu1 %v498_v27 }
 0x16b   : > { %v491_v28 = vpop.xlane.xlu0 %490 }
 0x16c   : > { %493 = vst.msk [vmem:[%s320_s29] sm:$0xff] %vm492_vm2, %v491_v28 }
 0x16d   : > { %v500_v29 = vpop.xlane.xlu1 %499 }
 0x16e   : > { %502 = vst.msk [vmem:[%s320_s29] sm:$0xff] %vm501_vm3, %v500_v29 }
 0x16f PF: > { %s16_s22 = sadd.s32 1, %s762_s22   ;;  %s875_s18 = smov %s754_s20 }
 0x170   : > { %p13_p8 = scmp.ge.s32.totalorder %s16_s22, 6   ;;  %s876_s19 = smov %s758_s21 }
 0x171   : > { %s877_s20 = smov %s880_s23  ;;  %s878_s21 = smov %s884_s24 }
 0x172   :  { %15 = sbr.rel (!%p13_p8) target bundleno = 3 (0x3), region = 81 }

// kernel: net2d_forward.16
= control target key start
LH: loop header
LB: loop body
LE: loop exit
PB: predicated region body
PF: predicated region fallthrough
CT: control target
= control target key end

     0   :  { %s440_s12 = smov 0   ;;  %s442_s13 = smov 0   ;;  %s497_s0 = inlined_call_operand.vmem [shape: f32[2,8,768], index: 0, kind: input, shape index: {}]   ;;  %s498_s1 = inlined_call_operand.vmem [shape: f32[8,1], index: 1, kind: input, shape index: {}]   ;;  %s499_s2 = inlined_call_operand.vmem [shape: f32[8,1], index: 2, kind: input, shape index: {}]   ;;  %s500_s3 = inlined_call_operand.vmem [shape: f32[2,8,768], index: 3, kind: output, shape index: {}]  }
   0x1   :  { %s444_s14 = smov 0   ;;  %s446_s15 = smov 0  }
   0x2   :  { %s448_s16 = smov 0  }
   0x3 LB: > { %s22_s17 = sadd.s32 1, %s409_s14  ;;  %s25_s18 = sadd.s32 1, %s413_s15  ;;  %s417_s16 = sphi %s448_s16, %s13_s16   ;;  %s413_s15 = sphi %s446_s15, %s504_s15   ;;  %s409_s14 = sphi %s444_s14, %s503_s14   ;;  %s405_s13 = sphi %s442_s13, %s502_s13   ;;  %s401_s12 = sphi %s440_s12, %s501_s12  }
   0x4   : > { %p23_p0 = scmp.ge.s32.totalorder %s22_s17, 2  ;;  %p331_p1 = scmp.ge.s32.totalorder %s417_s16, 1 }
   0x5   : > { %p158_p2 = scmp.lt.s32.totalorder %s417_s16, 5 }
   0x6   : > { %s506_s17 = smov (%p23_p0, %s22_s17), 0  ;;  %s508_s18 = smov (!%p23_p0, %s25_s18), %s413_s15 }
   0x7   : > { %p159_p3 = pnand %p331_p1, %p158_p2  ;;  %p27_p4 = scmp.ge.s32.totalorder %s508_s18, 2 }
   0x8   : > { %p191_p5 = scmp.lt.s32.totalorder (!%p159_p3), %s405_s13, 1  ;;  %s190_s23 = smul.u32 (!%p159_p3), 3, %s401_s12 }
   0x9   : > { %s510_s18 = smov (%p27_p4, %s508_s18), 0  ;;  %162 = sbr.rel (%p159_p3) target bundleno = 150 (0x96), region = 32 }
   0xa   : > { %p193_p6 = scmp.lt.s32.totalorder (!%p159_p3), %s190_s23, 5 }
   0xe   : > { %v213_v0 = vld [vmem:[%s498_s1] sm:$0xff]  ;;  %v419_v1 = vmov 0   ;;  %s512_s13 = smov (!%p191_p5, %s405_s13), 1  ;;  %s514_s23 = smov (!%p193_p6, %s190_s23), 5 }
   0xf   : > { %378 = vset.pattern.permute.xlu0 %v419_v1  ;;  %v222_v2 = vld [vmem:[%s499_s2] sm:$0xff]  ;;  %s336_s24 = smul.u32 6, %s512_s13 }
  0x10   : > { %216 = vperm.xlu0 %378, %v213_v0  }
  0x11   : > { %s196_s25 = sadd.s32 %s336_s24, %s514_s23 }
  0x12   : > { %s332_s26 = sshll.u32 %s196_s25, 3 }
  0x13   : > { %s198_s29 = scalar_lea.vmem %s497_s0, %s332_s26  ;;  %s208_s5 = scalar_lea.vmem %s500_s3, %s332_s26 }
  0x14   : > { %225 = vperm.xlu0 %378, %v222_v2   ;;  %v210_v4 = vld [vmem:[%s198_s29] sm:$0xff]  ;;  %v211_v5 = vld [vmem:[%s198_s29 + $0x8] sm:$0xff]  ;;  %v212_v6 = vld [vmem:[%s198_s29 + $0x10] sm:$0xff] }
  0x8b   : > { %v217_v3 = vpop.permute.xlu0 %216 }
  0x8c   : > { %v219_v7 = vmul.f32 %v217_v3, %v210_v4  ;;  %v220_v8 = vmul.f32 %v217_v3, %v211_v5  ;;  %v221_v9 = vmul.f32 %v217_v3, %v212_v6 }
  0x8f   : > { %v226_v10 = vpop.permute.xlu0 %225 }
  0x90   : > { %v228_v11 = vadd.f32 %v226_v10, %v219_v7  ;;  %v229_v12 = vadd.f32 %v226_v10, %v220_v8  ;;  %v230_v13 = vadd.f32 %v226_v10, %v221_v9 }
  0x92   : > { %v231_v14 = vmax.f32 %v228_v11, 0.0  ;;  %v232_v15 = vmax.f32 %v229_v12, 0.0  ;;  %v233_v16 = vmax.f32 %v230_v13, 0.0 }
  0x94   : > { %234 = vst [vmem:[%s208_s5] sm:$0xff] %v231_v14  ;;  %235 = vst [vmem:[%s208_s5 + $0x8] sm:$0xff] %v232_v15 }
  0x95   : > { %236 = vst [vmem:[%s208_s5 + $0x10] sm:$0xff] %v233_v16 }
  0x96 PF: > { %s13_s16 = sadd.s32 1, %s417_s16   ;;  %s501_s12 = smov %s409_s14 }
  0x97   : > { %p10_p7 = scmp.ge.s32.totalorder %s13_s16, 6   ;;  %s502_s13 = smov %s413_s15 }
  0x98   : > { %s503_s14 = smov %s506_s17  ;;  %s504_s15 = smov %s510_s18 }
  0x99   :  { %12 = sbr.rel (!%p10_p7) target bundleno = 3 (0x3), region = 62 }

// kernel: net2d_forward.25
= control target key start
LH: loop header
LB: loop body
LE: loop exit
PB: predicated region body
PF: predicated region fallthrough
CT: control target
= control target key end

     0   :  { %s1393_s26 = smov 0   ;;  %s1395_s27 = smov 0   ;;  %s1725_s0 = inlined_call_operand.vmem [shape: f32[2,8,768], index: 0, kind: input, shape index: {}]   ;;  %s1726_s1 = inlined_call_operand.vmem [shape: f32[8,1], index: 1, kind: input, shape index: {}]   ;;  %s1727_s2 = inlined_call_operand.vmem [shape: f32[8,1], index: 2, kind: input, shape index: {}]   ;;  %s1728_s3 = inlined_call_operand.vmem [shape: f32[128,8], index: 3, kind: input, shape index: {}]   ;;  %s1729_s4 = inlined_call_operand.vmem [shape: f32[128,1], index: 4, kind: input, shape index: {}]   ;;  %s1730_s5 = inlined_call_operand.vmem [shape: f32[1,128], index: 5, kind: input, shape index: {}]   ;;  %s1731_s6 = inlined_call_operand.<no memory space> [shape: f32[1,1], index: 6, kind: input, shape index: {}]   ;;  %s1732_s7 = inlined_call_operand.vmem [shape: f32[2,1,768], index: 7, kind: output, shape index: {}]  }
   0x1   :  { %v12_v0 = vstv %s1731_s6  ;;  %s1397_s28 = smov 0   ;;  %s1399_s29 = smov 0  }
   0x2   :  { %13 = vst [vmem:[#allocation2] sm:$0x1] %v12_v0  ;;  %s1401_s30 = smov 0  }
   0x3 LB: > { %s28_s6 = sadd.s32 1, %s1336_s28  ;;  %s31_s8 = sadd.s32 1, %s1340_s29  ;;  %s1344_s30 = sphi %s1401_s30, %s19_s30   ;;  %s1340_s29 = sphi %s1399_s29, %s1741_s29   ;;  %s1336_s28 = sphi %s1397_s28, %s1740_s28   ;;  %s1332_s27 = sphi %s1395_s27, %s1739_s27   ;;  %s1328_s26 = sphi %s1393_s26, %s1738_s26  }
   0x4   : > { %p29_p0 = scmp.ge.s32.totalorder %s28_s6, 2  ;;  %p1126_p1 = scmp.ge.s32.totalorder %s1344_s30, 1 }
   0x5   : > { %p260_p2 = scmp.lt.s32.totalorder %s1344_s30, 5 }
   0x6   : > { %s1743_s6 = smov (%p29_p0, %s28_s6), 0  ;;  %s1745_s8 = smov (!%p29_p0, %s31_s8), %s1340_s29 }
   0x7   : > { %p261_p3 = pnand %p1126_p1, %p260_p2  ;;  %p33_p4 = scmp.ge.s32.totalorder %s1745_s8, 2 }
   0x9   : > { %s1747_s8 = smov (%p33_p4, %s1745_s8), 0  ;;  %264 = sbr.rel (%p261_p3) target bundleno = 622 (0x26e), region = 48 }
   0xe   : > { %v321_v1 = vld [vmem:[%s1726_s1] sm:$0xff]  ;;  %v1346_v2 = vmov 0   ;;  %v1733_v4 = vmov 0.0   ;;  %v368_v5 = vld [vmem:[%s1729_s4 + $0x68] sm:$0xff]  ;;  %v366_v6 = vld [vmem:[%s1729_s4 + $0x58] sm:$0xff]  ;;  %p300_p5 = scmp.lt.s32.totalorder %s1332_s27, 1 }
   0xf   : > { %1304 = vset.pattern.permute.xlu0 %v1346_v2  ;;  %1305 = vset.pattern.permute.xlu1 %v1346_v2  ;;  %v330_v3 = vld [vmem:[%s1727_s2] sm:$0xff]  ;;  %v364_v7 = vld [vmem:[%s1729_s4 + $0x48] sm:$0xff]  ;;  %v362_v8 = vld [vmem:[%s1729_s4 + $0x38] sm:$0xff]  ;;  %s299_s11 = smul.u32 3, %s1328_s26  ;;  %vm451_vm0 = vcmask 64512   ;;  %vm1348_vm1 = vmmov 0  }
  0x10   : > { %324 = vperm.xlu0 %1304, %v321_v1   ;;  %564 = vmatprep.mubr.f32.mxu0 %v1733_v4  ;;  %v360_v9 = vld [vmem:[%s1729_s4 + $0x28] sm:$0xff]  ;;  %v358_v10 = vld [vmem:[%s1729_s4 + $0x18] sm:$0xff]  ;;  %v855_v12 = vld [vmem:[#allocation2] sm:$0x1]  ;;  %s1749_s27 = smov (!%p300_p5, %s1332_s27), 1 }
  0x11   : > { %636 = vmatprep.mubr.f32.mxu1 %v1733_v4  ;;  %v356_v11 = vld [vmem:[%s1729_s4 + $0x8] sm:$0xff]  ;;  %v370_v13 = vld [vmem:[%s1729_s4 + $0x78] sm:$0xff]  ;;  %v369_v14 = vld [vmem:[%s1729_s4 + $0x70] sm:$0xff]  ;;  %p302_p6 = scmp.lt.s32.totalorder %s299_s11, 5  ;;  %s1259_s12 = smul.u32 6, %s1749_s27 }
  0x12   : > { %448 = vperm.xlu1 %1305, %v370_v13   ;;  %v367_v15 = vld [vmem:[%s1729_s4 + $0x60] sm:$0xff]  ;;  %v365_v16 = vld [vmem:[%s1729_s4 + $0x50] sm:$0xff]  ;;  %v340_v35 = vld [vmem:[%s1728_s3 + $0x8] sm:$0xff] }
  0x13   : > { %v363_v17 = vld [vmem:[%s1729_s4 + $0x40] sm:$0xff]  ;;  %v361_v18 = vld [vmem:[%s1729_s4 + $0x30] sm:$0xff]  ;;  %s1751_s11 = smov (!%p302_p6, %s299_s11), 5  ;;  %v352_v36 = vld [vmem:[%s1728_s3 + $0x68] sm:$0xff] }
  0x14   : > { %333 = vperm.xlu0 %1304, %v330_v3   ;;  %v359_v19 = vld [vmem:[%s1729_s4 + $0x20] sm:$0xff]  ;;  %v357_v20 = vld [vmem:[%s1729_s4 + $0x10] sm:$0xff]  ;;  %s1486_s13 = sadd.s32 %s1259_s12, %s1751_s11  ;;  %v342_v39 = vld [vmem:[%s1728_s3 + $0x18] sm:$0xff] }
  0x15   : > { %v355_v21 = vld [vmem:[%s1729_s4] sm:$0xff]  ;;  %s1127_s14 = sshll.u32 %s1486_s13, 3  ;;  %v341_v37 = vld [vmem:[%s1728_s3 + $0x10] sm:$0xff]  ;;  %v354_v40 = vld [vmem:[%s1728_s3 + $0x78] sm:$0xff]  ;;  %s316_s26 = scalar_lea.vmem %s1732_s7, %s1486_s13 }
  0x16   : > { %443 = vperm.xlu1 %1305, %v369_v14   ;;  %s307_s17 = scalar_lea.vmem %s1725_s0, %s1127_s14  ;;  %v339_v32 = vld [vmem:[%s1728_s3] sm:$0xff]  ;;  %v353_v38 = vld [vmem:[%s1728_s3 + $0x70] sm:$0xff]  ;;  %v344_v42 = vld [vmem:[%s1728_s3 + $0x28] sm:$0xff] }
  0x17   : > { %v319_v23 = vld [vmem:[%s307_s17 + $0x8] sm:$0xff]  ;;  %v318_v24 = vld [vmem:[%s307_s17] sm:$0xff]  ;;  %v320_v25 = vld [vmem:[%s307_s17 + $0x10] sm:$0xff] }
  0x18   : > { %438 = vperm.xlu0 %1304, %v368_v5   ;;  %v351_v33 = vld [vmem:[%s1728_s3 + $0x60] sm:$0xff]  ;;  %v345_v43 = vld [vmem:[%s1728_s3 + $0x30] sm:$0xff]  ;;  %v346_v44 = vld [vmem:[%s1728_s3 + $0x38] sm:$0xff] }
  0x19   : > { %v343_v41 = vld [vmem:[%s1728_s3 + $0x20] sm:$0xff]  ;;  %v348_v46 = vld [vmem:[%s1728_s3 + $0x48] sm:$0xff]  ;;  %v349_v47 = vld [vmem:[%s1728_s3 + $0x50] sm:$0xff] }
  0x1a   : > { %433 = vperm.xlu1 %1305, %v367_v15   ;;  %v347_v45 = vld [vmem:[%s1728_s3 + $0x40] sm:$0xff]  ;;  %v350_v48 = vld [vmem:[%s1728_s3 + $0x58] sm:$0xff] }
  0x1c   : > { %428 = vperm.xlu0 %1304, %v366_v6  }
  0x1e   : > { %423 = vperm.xlu1 %1305, %v365_v16  }
  0x20   : > { %418 = vperm.xlu0 %1304, %v364_v7  }
  0x22   : > { %413 = vperm.xlu1 %1305, %v363_v17  }
  0x24   : > { %408 = vperm.xlu0 %1304, %v362_v8  }
  0x26   : > { %403 = vperm.xlu1 %1305, %v361_v18  }
  0x28   : > { %398 = vperm.xlu0 %1304, %v360_v9  }
  0x2a   : > { %393 = vperm.xlu1 %1305, %v359_v19  }
  0x2c   : > { %388 = vperm.xlu0 %1304, %v358_v10  }
  0x2e   : > { %383 = vperm.xlu1 %1305, %v357_v20  }
  0x30   : > { %378 = vperm.xlu0 %1304, %v356_v11  }
  0x32   : > { %373 = vperm.xlu1 %1305, %v355_v21  }
  0x34   : > { %858 = vperm.xlu0 %1304, %v855_v12  }
  0x8b   : > { %v325_v22 = vpop.permute.xlu0 %324 }
  0x8c   : > { %v328_v26 = vmul.f32 %v325_v22, %v319_v23  ;;  %v327_v27 = vmul.f32 %v325_v22, %v318_v24  ;;  %v329_v31 = vmul.f32 %v325_v22, %v320_v25 }
  0x8d   : > { %v1595_v55 = vpop.permute.xlu1 %448 }
  0x8f   : > { %v334_v28 = vpop.permute.xlu0 %333 }
  0x90   : > { %v337_v29 = vadd.f32 %v334_v28, %v328_v26  ;;  %v336_v30 = vadd.f32 %v334_v28, %v327_v27  ;;  %v338_v34 = vadd.f32 %v334_v28, %v329_v31 }
  0x91   : > { %v1603_v62 = vpop.permute.xlu1 %443 }
  0x92   : > { %530 = vmatprep.subr.mxu0 %v337_v29  ;;  %1257 = vmatprep.subr.mxu1 %v337_v29 }
  0x93   : > { %531 = vmatpush1.msra.mxu0 %v336_v30  ;;  %1258 = vmatpush1.msra.mxu1 %v336_v30  ;;  %v439_v5 = vpop.permute.xlu0 %438 }
  0x94   : > { %1128 = vmatmul.mubr.msk.f32.vlgmr.msra.gmra.mxu0 %vm451_vm0, %v339_v32  ;;  %1140 = vmatmul.mubr.msk.f32.vlgmr.msra.gmra.mxu1 %vm451_vm0, %v351_v33 }
  0x95   : > { %1196 = vmatprep.subr.mxu1 %v338_v34  ;;  %570 = vmatprep.mubr.f32.mxu0 %v1733_v4  ;;  %v1617_v11 = vpop.permute.xlu1 %433 }
  0x96   : > { %1197 = vmatpush3.msra.mxu1 %v338_v34  ;;  %642 = vmatprep.mubr.f32.mxu1 %v1733_v4 }
  0x97   : > { %1222 = vmatprep.subr.mxu0 %v1733_v4 }
  0x98   : > { %1129 = vmatmul.mubr.msk.f32.gmra.mxu0 %vm451_vm0, %v340_v35  ;;  %1141 = vmatmul.mubr.msk.f32.gmra.mxu1 %vm451_vm0, %v352_v36 }
  0x99   : > { %576 = vmatprep.mubr.f32.mxu0 %v1733_v4  ;;  %648 = vmatprep.mubr.f32.mxu1 %v1733_v4 }
  0x9c   : > { %1130 = vmatmul.mubr.msk.f32.gmra.mxu0 %vm451_vm0, %v341_v37  ;;  %1142 = vmatmul.mubr.msk.f32.gmra.mxu1 %vm451_vm0, %v353_v38 }
  0x9d   : > { %582 = vmatprep.mubr.f32.mxu0 %v1733_v4  ;;  %654 = vmatprep.mubr.f32.mxu1 %v1733_v4 }
  0xa0   : > { %1131 = vmatmul.mubr.msk.f32.gmra.mxu0 %vm451_vm0, %v342_v39  ;;  %1143 = vmatmul.mubr.msk.f32.gmra.mxu1 %vm451_vm0, %v354_v40 }
  0xa1   : > { %588 = vmatprep.mubr.f32.mxu0 %v1733_v4  ;;  %1198 = vmatprep.mubr.msk.f32.mxu1 %vm451_vm0, %v339_v32 }
  0xa4   : > { %1132 = vmatmul.mubr.msk.f32.gmra.mxu0 %vm451_vm0, %v343_v41  ;;  %1199 = vmatmul.mubr.msk.f32.vlgmr.msra.gmra.mxu1 %vm451_vm0, %v340_v35 }
  0xa5   : > { %594 = vmatprep.mubr.f32.mxu0 %v1733_v4  ;;  %1201 = vmatprep.mubr.msk.f32.mxu1 %vm451_vm0, %v341_v37 }
  0xa8   : > { %1133 = vmatmul.mubr.msk.f32.gmra.mxu0 %vm451_vm0, %v344_v42  ;;  %1202 = vmatmul.mubr.msk.f32.gmra.mxu1 %vm451_vm0, %v342_v39 }
  0xa9   : > { %600 = vmatprep.mubr.f32.mxu0 %v1733_v4  ;;  %1204 = vmatprep.mubr.msk.f32.mxu1 %vm451_vm0, %v343_v41  ;;  %v424_v41 = vpop.permute.xlu1 %423 }
  0xac   : > { %1134 = vmatmul.mubr.msk.f32.gmra.mxu0 %vm451_vm0, %v345_v43  ;;  %1205 = vmatmul.mubr.msk.f32.gmra.mxu1 %vm451_vm0, %v344_v42 }
  0xad   : > { %606 = vmatprep.mubr.f32.mxu0 %v1733_v4  ;;  %1207 = vmatprep.mubr.msk.f32.mxu1 %vm451_vm0, %v345_v43 }
  0xb0   : > { %1135 = vmatmul.mubr.msk.f32.gmra.mxu0 %vm451_vm0, %v346_v44  ;;  %1208 = vmatmul.mubr.msk.f32.gmra.mxu1 %vm451_vm0, %v346_v44 }
  0xb1   : > { %612 = vmatprep.mubr.f32.mxu0 %v1733_v4  ;;  %1210 = vmatprep.mubr.msk.f32.mxu1 %vm451_vm0, %v347_v45 }
  0xb4   : > { %1136 = vmatmul.mubr.msk.f32.gmra.mxu0 %vm451_vm0, %v347_v45  ;;  %1211 = vmatmul.mubr.msk.f32.gmra.mxu1 %vm451_vm0, %v348_v46 }
  0xb5   : > { %618 = vmatprep.mubr.f32.mxu0 %v1733_v4  ;;  %1213 = vmatprep.mubr.msk.f32.mxu1 %vm451_vm0, %v349_v47 }
  0xb8   : > { %1137 = vmatmul.mubr.msk.f32.gmra.mxu0 %vm451_vm0, %v348_v46  ;;  %1214 = vmatmul.mubr.msk.f32.gmra.mxu1 %vm451_vm0, %v350_v48 }
  0xb9   : > { %624 = vmatprep.mubr.f32.mxu0 %v1733_v4  ;;  %1216 = vmatprep.mubr.msk.f32.mxu1 %vm451_vm0, %v351_v33 }
  0xbc   : > { %1138 = vmatmul.mubr.msk.f32.gmra.mxu0 %vm451_vm0, %v349_v47  ;;  %1217 = vmatmul.mubr.msk.f32.gmra.mxu1 %vm451_vm0, %v352_v36 }
  0xbd   : > { %630 = vmatprep.mubr.f32.mxu0 %v1733_v4  ;;  %1219 = vmatprep.mubr.msk.f32.mxu1 %vm451_vm0, %v353_v38 }
  0xc0   : > { %1139 = vmatmul.mubr.msk.f32.gmra.mxu0 %vm451_vm0, %v350_v48  ;;  %1220 = vmatmul.mubr.msk.f32.gmra.mxu1 %vm451_vm0, %v354_v40  ;;  %v429_v40 = vpop.permute.xlu0 %428 }
  0xc1   : > { %929 = vmatprep.mubr.f32.mxu1 %v1733_v4  ;;  %1254 = vmatprep.mubr.msk.f32.mxu0 %vm1348_vm1, %v1733_v4 }
  0xc4   : > { %v419_v48 = vpop.permute.xlu0 %418 }
 0x154   : > { %v1589_v49 = vpop.f32.mrf.mxu0  ;;  %v638_v50 = vpop.f32.mrf.mxu1 }
 0x155   : > { %v639_v20 = vadd.f32 %v638_v50, %v1617_v11  ;;  %v414_v50 = vpop.permute.xlu1 %413 }
 0x156   : > { %v1591_v51 = vpop.f32.mrf.mxu0  ;;  %v640_v52 = vpop.f32.mrf.mxu1 }
 0x157   : > { %v641_v18 = vadd.f32 %v640_v52, %v1617_v11  ;;  %v842_v29 = vmax.f32 %v639_v20, 0.0 }
 0x158   : > { %v1593_v53 = vpop.f32.mrf.mxu0  ;;  %v644_v54 = vpop.f32.mrf.mxu1 }
 0x159   : > { %v645_v14 = vadd.f32 %v644_v54, %v439_v5  ;;  %v843_v28 = vmax.f32 %v641_v18, 0.0 }
 0x15a   : > { %v1597_v56 = vpop.f32.mrf.mxu0  ;;  %v646_v57 = vpop.f32.mrf.mxu1 }
 0x15b   : > { %v647_v12 = vadd.f32 %v646_v57, %v439_v5  ;;  %v845_v25 = vmax.f32 %v645_v14, 0.0 }
 0x15c   : > { %v1599_v58 = vpop.f32.mrf.mxu0  ;;  %v650_v59 = vpop.f32.mrf.mxu1 }
 0x15d   : > { %v651_v8 = vadd.f32 %v650_v59, %v1603_v62  ;;  %v846_v24 = vmax.f32 %v647_v12, 0.0 }
 0x15e   : > { %v1601_v60 = vpop.f32.mrf.mxu0  ;;  %v652_v61 = vpop.f32.mrf.mxu1 }
 0x15f   : > { %v653_v6 = vadd.f32 %v652_v61, %v1603_v62  ;;  %v848_v21 = vmax.f32 %v651_v8, 0.0 }
 0x160   : > { %v1605_v63 = vpop.f32.mrf.mxu0  ;;  %v656_v0 = vpop.f32.mrf.mxu1 }
 0x161   : > { %v657_v1 = vadd.f32 %v656_v0, %v1595_v55  ;;  %v849_v19 = vmax.f32 %v653_v6, 0.0 }
 0x162   : > { %v1608_v2 = vpop.f32.mrf.mxu0  ;;  %v658_v3 = vpop.f32.mrf.mxu1 }
 0x163   : > { %v659_v7 = vadd.f32 %v658_v3, %v1595_v55  ;;  %v851_v15 = vmax.f32 %v657_v1, 0.0  ;;  %v1647_v1 = vpop.permute.xlu0 %408  ;;  %v1649_v3 = vpop.permute.xlu1 %403 }
 0x164   : > { %v1613_v9 = vpop.f32.mrf.mxu0  ;;  %v1615_v10 = vpop.f32.mrf.mxu1 }
 0x165   : > { %v852_v13 = vmax.f32 %v659_v7, 0.0 }
 0x166   : > { %v1619_v16 = vpop.f32.mrf.mxu0  ;;  %v1621_v17 = vpop.f32.mrf.mxu1 }
 0x167   : > { %1735 = vst [vmem:[#allocation3_spill] sm:$0xff] %v1621_v17  ;;  %865 = vmatprep.subr.mxu1 %v852_v13  ;;  %v1736_v17 = vmov 0.0  }
 0x168   : > { %v1625_v22 = vpop.f32.mrf.mxu0  ;;  %v1627_v23 = vpop.f32.mrf.mxu1  ;;  %866 = vmatpush1.msra.mxu1 %v851_v15 }
 0x169   : > { %867 = vmatprep.subr.mxu1 %v849_v19 }
 0x16a   : > { %v1629_v26 = vpop.f32.mrf.mxu0  ;;  %v1631_v27 = vpop.f32.mrf.mxu1  ;;  %868 = vmatpush1.msra.mxu1 %v848_v21 }
 0x16b   : > { %869 = vmatprep.subr.mxu1 %v846_v24 }
 0x16c   : > { %v1633_v30 = vpop.f32.mrf.mxu0  ;;  %v1635_v31 = vpop.f32.mrf.mxu1  ;;  %870 = vmatpush1.msra.mxu1 %v845_v25 }
 0x16d   : > { %871 = vmatprep.subr.mxu1 %v843_v28 }
 0x16e   : > { %v1637_v32 = vpop.f32.mrf.mxu0  ;;  %v1639_v33 = vpop.f32.mrf.mxu1  ;;  %872 = vmatpush1.msra.mxu1 %v842_v29 }
 0x170   : > { %v608_v34 = vpop.f32.mrf.mxu0  ;;  %v1641_v35 = vpop.f32.mrf.mxu1 }
 0x172   : > { %v610_v36 = vpop.f32.mrf.mxu0  ;;  %v1643_v37 = vpop.f32.mrf.mxu1 }
 0x174   : > { %v614_v38 = vpop.f32.mrf.mxu0  ;;  %v1212_v39 = vpop.f32.mrf.mxu1 }
 0x176   : > { %v616_v42 = vpop.f32.mrf.mxu0  ;;  %v1645_v43 = vpop.f32.mrf.mxu1 }
 0x178   : > { %v620_v44 = vpop.f32.mrf.mxu0  ;;  %v1215_v45 = vpop.f32.mrf.mxu1 }
 0x179   : > { %v621_v29 = vadd.f32 %v620_v44, %v419_v48 }
 0x17a   : > { %v622_v46 = vpop.f32.mrf.mxu0  ;;  %v777_v47 = vpop.f32.mrf.mxu1 }
 0x17b   : > { %v623_v21 = vadd.f32 %v622_v46, %v419_v48 }
 0x17c   : > { %v626_v52 = vpop.f32.mrf.mxu0  ;;  %v1218_v54 = vpop.f32.mrf.mxu1 }
 0x17d   : > { %v793_v7 = vadd.f32 %v1218_v54, %v439_v5  ;;  %v627_v20 = vadd.f32 %v626_v52, %v424_v41  ;;  %v783_v5 = vadd.f32 %v1215_v45, %v429_v40  ;;  %v834_v44 = vmax.f32 %v623_v21, 0.0 }
 0x17e   : > { %v628_v57 = vpop.f32.mrf.mxu0  ;;  %v787_v59 = vpop.f32.mrf.mxu1  ;;  %v778_v52 = vadd.f32 %v777_v47, %v424_v41  ;;  %v773_v45 = vadd.f32 %v1212_v39, %v419_v48 }
 0x17f   : > { %v629_v14 = vadd.f32 %v628_v57, %v424_v41  ;;  %v788_v24 = vadd.f32 %v787_v59, %v1617_v11  ;;  %v847_v54 = vmax.f32 %v793_v7, 0.0  ;;  %v399_v57 = vpop.permute.xlu0 %398  ;;  %v836_v46 = vmax.f32 %v627_v20, 0.0 }
 0x180   : > { %v632_v61 = vpop.f32.mrf.mxu0  ;;  %v1221_v0 = vpop.f32.mrf.mxu1  ;;  %v611_v11 = vadd.f32 %v610_v36, %v1647_v1  ;;  %v603_v36 = vadd.f32 %v1633_v30, %v1649_v3  ;;  %v768_v7 = vadd.f32 %v1645_v43, %v414_v50  ;;  %v597_v48 = vadd.f32 %v1625_v22, %v399_v57 }
 0x181   : > { %v803_v6 = vadd.f32 %v1221_v0, %v1595_v55  ;;  %v633_v8 = vadd.f32 %v632_v61, %v429_v40  ;;  %v617_v55 = vadd.f32 %v616_v42, %v414_v50  ;;  %v837_v61 = vmax.f32 %v629_v14, 0.0  ;;  %v1655_v0 = vpop.permute.xlu1 %393 }
 0x182   : > { %v634_v12 = vpop.f32.mrf.mxu0  ;;  %v797_v13 = vpop.f32.mrf.mxu1  ;;  %v844_v59 = vmax.f32 %v788_v24, 0.0  ;;  %v833_v42 = vmax.f32 %v621_v29, 0.0  ;;  %v828_v47 = vmax.f32 %v611_v11, 0.0  ;;  %v593_v30 = vadd.f32 %v1619_v16, %v1655_v0 }
 0x183   : > { %v853_v15 = vmax.f32 %v803_v6, 0.0  ;;  %v635_v18 = vadd.f32 %v634_v12, %v429_v40  ;;  %v798_v19 = vadd.f32 %v797_v13, %v1603_v62  ;;  %v839_v4 = vmax.f32 %v633_v8, 0.0 }
 0x184   : > { %v615_v62 = vadd.f32 %v614_v38, %v414_v50  ;;  %v609_v40 = vadd.f32 %v608_v34, %v1647_v1  ;;  %v605_v38 = vadd.f32 %v1637_v32, %v1649_v3  ;;  %v841_v6 = vmax.f32 %v783_v5, 0.0  ;;  %v389_v32 = vpop.permute.xlu0 %388 }
 0x185   : > { %v840_v25 = vmax.f32 %v635_v18, 0.0  ;;  %v850_v28 = vmax.f32 %v798_v19, 0.0  ;;  %1223 = vmatpush3.msra.mxu0 %v853_v15  ;;  %v599_v34 = vadd.f32 %v1629_v26, %v399_v57  ;;  %v838_v8 = vmax.f32 %v778_v52, 0.0  ;;  %v384_v39 = vpop.permute.xlu1 %383 }
 0x186   : > { %1224 = vmatprep.subr.mxu0 %v1736_v17  ;;  %v830_v41 = vmax.f32 %v615_v62, 0.0  ;;  %v827_v12 = vmax.f32 %v609_v40, 0.0  ;;  %v825_v13 = vmax.f32 %v605_v38, 0.0  ;;  %v763_v26 = vadd.f32 %v1641_v35, %v1647_v1 }
 0x187   : > { %873 = vmatprep.subr.mxu1 %v840_v25  ;;  %1225 = vmatpush3.msra.mxu0 %v850_v28  ;;  %v835_v14 = vmax.f32 %v773_v45, 0.0  ;;  %v591_v43 = vadd.f32 %v1613_v9, %v1655_v0  ;;  %v824_v50 = vmax.f32 %v603_v36, 0.0  ;;  %v587_v22 = vadd.f32 %v1608_v2, %v389_v32 }
 0x188   : > { %874 = vmatpush1.msra.mxu1 %v839_v4  ;;  %1226 = vmatprep.subr.mxu0 %v1736_v17  ;;  %v831_v4 = vmax.f32 %v617_v55, 0.0  ;;  %v822_v15 = vmax.f32 %v599_v34, 0.0  ;;  %v758_v16 = vadd.f32 %v1643_v37, %v1649_v3  ;;  %v832_v18 = vmax.f32 %v768_v7, 0.0  ;;  %v379_v2 = vpop.permute.xlu0 %378 }
 0x189   : > { %875 = vmatprep.subr.mxu1 %v837_v61  ;;  %1227 = vmatpush3.msra.mxu0 %v847_v54  ;;  %v585_v35 = vadd.f32 %v1605_v63, %v389_v32  ;;  %v821_v1 = vmax.f32 %v597_v48, 0.0  ;;  %v581_v9 = vadd.f32 %v1601_v60, %v384_v39  ;;  %v819_v19 = vmax.f32 %v593_v30, 0.0  ;;  %v374_v24 = vpop.permute.xlu1 %373 }
 0x18a   : > { %876 = vmatpush1.msra.mxu1 %v836_v46  ;;  %1228 = vmatprep.subr.mxu0 %v1736_v17  ;;  %v753_v20 = vadd.f32 %v1635_v31, %v399_v57  ;;  %v829_v21 = vmax.f32 %v763_v26, 0.0  ;;  %v579_v37 = vadd.f32 %v1599_v58, %v384_v39  ;;  %v818_v3 = vmax.f32 %v591_v43, 0.0  ;;  %v1737_v46 = vld [vmem:[#allocation3_spill] sm:$0xff] }
 0x18b   : > { %877 = vmatprep.subr.mxu1 %v834_v44  ;;  %1229 = vmatpush3.msra.mxu0 %v844_v59  ;;  %v575_v63 = vadd.f32 %v1597_v56, %v379_v2  ;;  %v816_v25 = vmax.f32 %v587_v22, 0.0  ;;  %v748_v60 = vadd.f32 %v1639_v33, %v1655_v0  ;;  %v826_v28 = vmax.f32 %v758_v16, 0.0 }
 0x18c   : > { %878 = vmatpush1.msra.mxu1 %v833_v42  ;;  %1230 = vmatprep.subr.mxu0 %v1736_v17  ;;  %v573_v31 = vadd.f32 %v1593_v53, %v379_v2  ;;  %v815_v29 = vmax.f32 %v585_v35, 0.0  ;;  %v569_v58 = vadd.f32 %v1591_v51, %v374_v24  ;;  %v743_v55 = vadd.f32 %v1627_v23, %v389_v32 }
 0x18d   : > { %879 = vmatprep.subr.mxu1 %v831_v4  ;;  %1231 = vmatpush3.msra.mxu0 %v841_v6  ;;  %v823_v5 = vmax.f32 %v753_v20, 0.0  ;;  %v813_v56 = vmax.f32 %v581_v9, 0.0  ;;  %v812_v54 = vmax.f32 %v579_v37, 0.0  ;;  %v567_v33 = vadd.f32 %v1589_v49, %v374_v24  ;;  %v859_v4 = vpop.permute.xlu0 %858 }
 0x18e   : > { %880 = vmatpush1.msra.mxu1 %v830_v41  ;;  %1232 = vmatprep.subr.mxu0 %v1736_v17  ;;  %v810_v61 = vmax.f32 %v575_v63, 0.0  ;;  %v738_v53 = vadd.f32 %v1631_v27, %v384_v39  ;;  %v820_v57 = vmax.f32 %v748_v60, 0.0  ;;  %v809_v0 = vmax.f32 %v573_v31, 0.0  ;;  %v854_v27 = vld [vmem:[%s1730_s5] sm:$0x1] }
 0x18f   : > { %881 = vmatprep.subr.mxu1 %v828_v47  ;;  %1233 = vmatpush3.msra.mxu0 %v838_v8  ;;  %v733_v51 = vadd.f32 %v1615_v10, %v379_v2  ;;  %v807_v23 = vmax.f32 %v569_v58, 0.0  ;;  %v817_v62 = vmax.f32 %v743_v55, 0.0  ;;  %v806_v49 = vmax.f32 %v567_v33, 0.0 }
 0x190   : > { %882 = vmatpush1.msra.mxu1 %v827_v12  ;;  %1234 = vmatprep.subr.mxu0 %v1736_v17  ;;  %v728_v11 = vadd.f32 %v1737_v46, %v374_v24  ;;  %v814_v44 = vmax.f32 %v738_v53, 0.0  ;;  %v861_v59 = vlaneseq  ;;  %v1349_v42 = vmov 1966171168  }
 0x191   : > { %883 = vmatprep.subr.mxu1 %v825_v13  ;;  %1235 = vmatpush3.msra.mxu0 %v835_v14  ;;  %v811_v10 = vmax.f32 %v733_v51, 0.0  ;;  %v1011_v38 = vunpack.c.l.s4 %v1349_v42 }
 0x192   : > { %884 = vmatpush1.msra.mxu1 %v824_v50  ;;  %1236 = vmatprep.subr.mxu0 %v1736_v17  ;;  %v808_v52 = vmax.f32 %v728_v11, 0.0  ;;  %v862_v40 = vshrl.u32 %v861_v59, 7  ;;  %vm1035_vm2 = vcmp.lt.s32.totalorder %v861_v59, 384 }
 0x193   : > { %885 = vmatprep.subr.mxu1 %v822_v15  ;;  %1237 = vmatpush3.msra.mxu0 %v832_v18  ;;  %v1012_v6 = vunpack.c.0.s8 %v1011_v38 }
 0x194   : > { %886 = vmatpush1.msra.mxu1 %v821_v1  ;;  %1238 = vmatprep.subr.mxu0 %v1736_v17  ;;  %v863_v45 = vsub.s32 0, %v862_v40 }
 0x195   : > { %887 = vmatprep.subr.mxu1 %v819_v19  ;;  %1239 = vmatpush3.msra.mxu0 %v829_v21  ;;  %v1015_v47 = vsub.s32 %v1012_v6, %v862_v40 }
 0x196   : > { %888 = vmatpush1.msra.mxu1 %v818_v3  ;;  %1240 = vmatprep.subr.mxu0 %v1736_v17  ;;  %v864_v41 = vrot.slane %v859_v4, %v863_v45 }
 0x197   : > { %889 = vmatprep.subr.mxu1 %v816_v25  ;;  %1241 = vmatpush3.msra.mxu0 %v826_v28 }
 0x198   : > { %890 = vmatpush1.msra.mxu1 %v815_v29  ;;  %1242 = vmatprep.subr.mxu0 %v1736_v17 }
 0x199   : > { %891 = vmatprep.subr.mxu1 %v813_v56  ;;  %1243 = vmatpush3.msra.mxu0 %v823_v5 }
 0x19a   : > { %892 = vmatpush1.msra.mxu1 %v812_v54  ;;  %1244 = vmatprep.subr.mxu0 %v1736_v17 }
 0x19b   : > { %893 = vmatprep.subr.mxu1 %v810_v61  ;;  %1245 = vmatpush3.msra.mxu0 %v820_v57 }
 0x19c   : > { %894 = vmatpush1.msra.mxu1 %v809_v0  ;;  %1246 = vmatprep.subr.mxu0 %v1736_v17 }
 0x19d   : > { %895 = vmatprep.subr.mxu1 %v807_v23  ;;  %1247 = vmatpush3.msra.mxu0 %v817_v62 }
 0x19e   : > { %896 = vmatpush1.msra.mxu1 %v806_v49  ;;  %1248 = vmatprep.subr.mxu0 %v1736_v17 }
 0x19f   : > { %930 = vmatmul.mubr.f32.vlgmr.msra.gmra.mxu1 %v854_v27  ;;  %1249 = vmatpush3.msra.mxu0 %v814_v44 }
 0x1a0   : > { %1250 = vmatprep.subr.mxu0 %v1736_v17 }
 0x1a1   : > { %1251 = vmatpush3.msra.mxu0 %v811_v10 }
 0x1a2   : > { %1252 = vmatprep.subr.mxu0 %v1736_v17 }
 0x1a3   : > { %1253 = vmatpush3.msra.mxu0 %v808_v52 }
 0x1a4   : > { %1255 = vmatmul.mubr.f32.vlgmr.msra.gmra.mxu0 %v854_v27 }
 0x25f   : > { %v931_v36 = vpop.f32.mrf.mxu1 }
 0x260   : > { %v932_v7 = vadd.f32 %v931_v36, %v864_v41 }
 0x261   : > { %v933_v34 = vpop.f32.mrf.mxu1 }
 0x262   : > { %v934_v8 = vadd.f32 %v933_v34, %v864_v41 }
 0x264   : > { %v1009_v32 = vcombine.low %v932_v7, %v934_v8  ;;  %v1002_v39 = vpop.f32.mrf.mxu0 }
 0x265   : > { %v1003_v48 = vadd.f32 %v1002_v39, %v864_v41 }
 0x266   : > { %v1016_v17 = vrot.slane %v1009_v32, %v1015_v47  ;;  %v1256_v12 = vpop.f32.mrf.mxu0 }
 0x267   : > { %v1023_v30 = vrot.slane %v1003_v48, %v1015_v47 }
 0x269   : > { %v1024_v13 = vcombine.low %v1016_v17, %v1023_v30 }
 0x26b   : > { %v1031_v26 = vrot.slane %v1024_v13, %v1015_v47 }
 0x26d   : > { %1037 = vst.msk [vmem:[%s316_s26] sm:$0x7] %vm1035_vm2, %v1031_v26 }
 0x26e PF: > { %s19_s30 = sadd.s32 1, %s1344_s30   ;;  %s1738_s26 = smov %s1336_s28 }
 0x26f   : > { %p16_p7 = scmp.ge.s32.totalorder %s19_s30, 6   ;;  %s1739_s27 = smov %s1340_s29 }
 0x270   : > { %s1740_s28 = smov %s1743_s6  ;;  %s1741_s29 = smov %s1747_s8 }
 0x271   :  { %18 = sbr.rel (!%p16_p7) target bundleno = 3 (0x3), region = 78 }

</bundles_post_ra>
